<compile_context>
chip_gen: v7x
topology: tpu7x:2x2x1
jax: 0.10.0
libtpu: 0.0.40
codegen_flags: <defaults>
</compile_context>

<pallas_src>
import jax
import jax.numpy as jnp
from jax.experimental import pallas as pl
from jax.experimental.pallas import tpu as pltpu

NUM_MODALITIES = 5


# ----------------------------------------------------------------------------
# Single fused kernel
#   grid = (hidden_tiles, modalities)  -- modality innermost
# ----------------------------------------------------------------------------
def mycnn_fused_kernel(convwb_ref,                       # SMEM (12,) f32: 3x(w0,w1,w2,b)
                       c1_ref, c2_ref, c3_ref,           # VMEM (N,H,W) f32 (full blocks)
                       h1_ref, h2_ref,                   # VMEM (N,W) f32 (full blocks)
                       whz_ref,                          # VMEM (1,2,K,TN) bf16 weight block
                       w1_ref, b1_ref, w2_ref, b2_ref,   # FC head params (VMEM)
                       o_ref,                            # VMEM (1,num_classes) f32
                       x_sc, h_sc, z_sc, y_sc):          # VMEM scratch
    t = pl.program_id(0)          # hidden-dim tile (outer)
    m = pl.program_id(1)          # modality (inner)
    n_t = pl.num_programs(0)
    n_m = pl.num_programs(1)

    # ---- Prologue (runs once, at the very first grid step) --------------------------
    @pl.when(jnp.logical_and(t == 0, m == 0))
    def _prologue():
        def conv_feat(x_ref, off):
            # Conv2d(1,1,(3,1)) + ReLU + MaxPool over all valid conv rows.
            w0 = convwb_ref[off]
            w1 = convwb_ref[off + 1]
            w2 = convwb_ref[off + 2]
            b = convwb_ref[off + 3]
            x = x_ref[...]                                  # (N, H, W)
            hh = x.shape[1]
            y = (w0 * x[:, 0:hh - 2, :]
                 + w1 * x[:, 1:hh - 1, :]
                 + w2 * x[:, 2:hh, :] + b)
            y = jnp.maximum(y, 0.0)                         # ReLU
            return jnp.max(y, axis=1)                       # MaxPool -> (N, W)

        x_sc[0] = conv_feat(c1_ref, 0)
        x_sc[1] = jnp.tanh(h1_ref[...])
        x_sc[2] = conv_feat(c2_ref, 4)
        x_sc[3] = jnp.tanh(h2_ref[...])
        x_sc[4] = conv_feat(c3_ref, 8)
        y_sc[...] = jnp.zeros_like(y_sc)                    # FC1 accumulator

    # ---- Per (hidden tile, modality): GMU h/z (bf16 weights, f32 accumulation) ------
    x = x_sc[m].astype(jnp.bfloat16)                        # (N, K)
    h_sc[m] = jnp.tanh(jnp.dot(x, whz_ref[0, 0],
                               preferred_element_type=jnp.float32))
    z_sc[m] = jnp.dot(x, whz_ref[0, 1], preferred_element_type=jnp.float32)

    # ---- After the last modality of this tile: softmax over modalities + gated mix,
    #      then fold row 0 of this hidden tile into the first FC layer accumulator.
    @pl.when(m == n_m - 1)
    def _mix():
        zs = z_sc[...]                                      # (5, N, TN)
        zmax = jnp.max(zs, axis=0, keepdims=True)
        ez = jnp.exp(zs - zmax)
        zn = ez / jnp.sum(ez, axis=0, keepdims=True)        # softmax over modalities
        final = jnp.sum(zn * h_sc[...], axis=0)             # (N, TN)
        # Only batch row 0 reaches the FC head (MyCNN unpacks the GMU output on dim 0).
        y_sc[...] += jnp.dot(final[0:1], w1_ref[...],
                             preferred_element_type=jnp.float32)

    # ---- Very last grid step: finish the FC head ------------------------------------
    @pl.when(jnp.logical_and(t == n_t - 1, m == n_m - 1))
    def _head():
        y = jnp.maximum(y_sc[...] + b1_ref[...], 0.0)       # Linear(1024,256)+ReLU
        # Dropout(0.5) -> identity in inference mode.
        o_ref[...] = (jnp.dot(y, w2_ref[...], preferred_element_type=jnp.float32)
                      + b2_ref[...])                        # Linear(256,num_classes)


# ----------------------------------------------------------------------------
# Wrapper
# ----------------------------------------------------------------------------
@jax.jit
def mycnn_forward(c1, h1, c2, h2, c3, params):
    p = params
    n = c1.shape[0]
    k = p["whz"].shape[2]          # GMU input width (1024)
    hdim = p["whz"].shape[3]       # GMU hidden (1024)
    fch = p["w1_t"].shape[1]       # FC hidden (256)
    ncls = p["w2_t"].shape[1]      # num classes
    hc1, hc2, hc3 = c1.shape[2], c2.shape[2], c3.shape[2]

    tn = 512 if hdim % 512 == 0 else hdim                  # hidden-dim tile width
    n_t = hdim // tn

    out = pl.pallas_call(
        mycnn_fused_kernel,
        out_shape=jax.ShapeDtypeStruct((1, ncls), jnp.float32),
        grid=(n_t, NUM_MODALITIES),
        in_specs=[
            pl.BlockSpec(memory_space=pltpu.MemorySpace.SMEM),          # conv weights
            pl.BlockSpec((n, hc1, k), lambda t, m: (0, 0, 0)),          # c1 (N,H,W)
            pl.BlockSpec((n, hc2, k), lambda t, m: (0, 0, 0)),          # c2
            pl.BlockSpec((n, hc3, k), lambda t, m: (0, 0, 0)),          # c3
            pl.BlockSpec((n, k), lambda t, m: (0, 0)),                  # h1
            pl.BlockSpec((n, k), lambda t, m: (0, 0)),                  # h2
            pl.BlockSpec((1, 2, k, tn), lambda t, m: (m, 0, 0, t)),     # whz bf16
            pl.BlockSpec((tn, fch), lambda t, m: (t, 0)),               # w1_t tile
            pl.BlockSpec((1, fch), lambda t, m: (0, 0)),                # b1
            pl.BlockSpec((fch, ncls), lambda t, m: (0, 0)),             # w2_t
            pl.BlockSpec((1, ncls), lambda t, m: (0, 0)),               # b2
        ],
        out_specs=pl.BlockSpec((1, ncls), lambda t, m: (0, 0)),
        scratch_shapes=[
            pltpu.VMEM((NUM_MODALITIES, n, k), jnp.float32),    # x_sc : modality rows
            pltpu.VMEM((NUM_MODALITIES, n, tn), jnp.float32),   # h_sc : per-tile h_m
            pltpu.VMEM((NUM_MODALITIES, n, tn), jnp.float32),   # z_sc : per-tile z_m
            pltpu.VMEM((1, fch), jnp.float32),                  # y_sc : FC1 accumulator
        ],
        compiler_params=pltpu.CompilerParams(
            dimension_semantics=("arbitrary", "arbitrary"),
            vmem_limit_bytes=32 * 1024 * 1024,
        ),
    )(p["convwb"], c1[:, 0], c2[:, 0], c3[:, 0], h1, h2,
      p["whz"], p["w1_t"], p["b1"], p["w2_t"], p["b2"])
    return out[0]                                           # (num_classes,)


def prepare_params(raw):
    """Pack raw (PyTorch-shaped, f32) params into the fused-kernel layout."""
    convwb = jnp.concatenate([
        raw["cw1"], raw["cb1"], raw["cw2"], raw["cb2"], raw["cw3"], raw["cb3"]
    ]).astype(jnp.float32)                                          # (12,)
    whz = jnp.stack([raw["wh_t"], raw["wz_t"]], axis=1).astype(jnp.bfloat16)  # (5,2,K,H)
    return {
        "convwb": convwb,
        "whz": whz,
        "w1_t": raw["w1_t"].astype(jnp.float32),
        "b1": raw["b1"].astype(jnp.float32),
        "w2_t": raw["w2_t"].astype(jnp.float32),
        "b2": raw["b2"].astype(jnp.float32),
    }


# ----------------------------------------------------------------------------
# Pure-JAX reference (uses the same bf16-quantized GMU weights, f32 math)
# ----------------------------------------------------------------------------
def reference_forward(c1, h1, c2, h2, c3, p):
    def conv_block(x, w, b):
        x = x[:, 0]
        hh = x.shape[1]
        y = w[0] * x[:, 0:hh - 2] + w[1] * x[:, 1:hh - 1] + w[2] * x[:, 2:hh] + b
        y = jnp.maximum(y, 0.0)
        return jnp.max(y, axis=1)

    wcb = p["convwb"]
    c1f = conv_block(c1, wcb[0:3], wcb[3])
    c2f = conv_block(c2, wcb[4:7], wcb[7])
    c3f = conv_block(c3, wcb[8:11], wcb[11])
    xs = [c1f, jnp.tanh(h1), c2f, jnp.tanh(h2), c3f]
    whz = p["whz"].astype(jnp.float32)
    hs = jnp.stack([jnp.tanh(x @ whz[i, 0]) for i, x in enumerate(xs)], axis=0)
    zs = jnp.stack([x @ whz[i, 1] for i, x in enumerate(xs)], axis=0)
    zn = jax.nn.softmax(zs, axis=0)
    final = jnp.sum(zn * hs, axis=0)
    y = jnp.maximum(final[0:1] @ p["w1_t"] + p["b1"], 0.0)
    return (y @ p["w2_t"] + p["b2"])[0]


if __name__ == "__main__":
    key = jax.random.PRNGKey(0)
    num_classes = 10
    len_c1, len_c2, len_c3 = 7, 5, 11
    feat_w = 1024    # flatten width (GMU input size is hard-wired to 1024)
    hidden = 1024
    batch = 2        # must be 2 (GMU output is unpacked along dim 0 in MyCNN.forward)

    ks = jax.random.split(key, 16)
    # inputs (PyTorch layout: conv inputs are NCHW with C=1)
    c1 = jax.random.normal(ks[0], (batch, 1, len_c1, feat_w), jnp.float32)
    c2 = jax.random.normal(ks[1], (batch, 1, len_c2, feat_w), jnp.float32)
    c3 = jax.random.normal(ks[2], (batch, 1, len_c3, feat_w), jnp.float32)
    h1 = jax.random.normal(ks[3], (batch, feat_w), jnp.float32)
    h2 = jax.random.normal(ks[4], (batch, feat_w), jnp.float32)

    # deterministic synthetic parameters (shapes match the PyTorch module, weights pre-
    # transposed to (in, out) so kernels compute x @ W.T)
    raw_params = {
        "cw1": jax.random.normal(ks[5], (3,), jnp.float32) * 0.3,
        "cb1": jax.random.normal(ks[6], (1,), jnp.float32) * 0.1,
        "cw2": jax.random.normal(ks[7], (3,), jnp.float32) * 0.3,
        "cb2": jax.random.normal(ks[8], (1,), jnp.float32) * 0.1,
        "cw3": jax.random.normal(ks[9], (3,), jnp.float32) * 0.3,
        "cb3": jax.random.normal(ks[10], (1,), jnp.float32) * 0.1,
        "wh_t": jax.random.normal(ks[11], (NUM_MODALITIES, feat_w, hidden), jnp.float32) / 32.0,
        "wz_t": jax.random.normal(ks[12], (NUM_MODALITIES, feat_w, hidden), jnp.float32) / 32.0,
        "w1_t": jax.random.normal(ks[13], (hidden, 256), jnp.float32) / 32.0,
        "b1": jax.random.normal(ks[14], (1, 256), jnp.float32) * 0.1,
        "w2_t": jax.random.normal(ks[15], (256, num_classes), jnp.float32) / 16.0,
        "b2": jnp.zeros((1, num_classes), jnp.float32),
    }
    params = prepare_params(raw_params)

    out = mycnn_forward(c1, h1, c2, h2, c3, params)
    out = jax.block_until_ready(out)
    assert out.shape == (num_classes,), out.shape

    ref = jax.block_until_ready(reference_forward(c1, h1, c2, h2, c3, params))
    if not bool(jnp.allclose(out, ref, rtol=2e-2, atol=2e-2)):
        raise AssertionError(f"mismatch: pallas={out} ref={ref}")

    print("KERNEL_OK")
</pallas_src>

<mosaic_0001>
module attributes {stable_mosaic.version = 11 : i64} {
  func.func @mycnn_fused_kernel(%arg0: i32, %arg1: i32, %arg2: memref<12xf32, #tpu.memory_space<smem>>, %arg3: memref<2x7x1024xf32, #tpu.memory_space<vmem>>, %arg4: memref<2x5x1024xf32, #tpu.memory_space<vmem>>, %arg5: memref<2x11x1024xf32, #tpu.memory_space<vmem>>, %arg6: memref<2x1024xf32, #tpu.memory_space<vmem>>, %arg7: memref<2x1024xf32, #tpu.memory_space<vmem>>, %arg8: memref<1x2x1024x512xbf16, #tpu.memory_space<vmem>>, %arg9: memref<512x256xf32, #tpu.memory_space<vmem>>, %arg10: memref<1x256xf32, #tpu.memory_space<vmem>>, %arg11: memref<256x10xf32, #tpu.memory_space<vmem>>, %arg12: memref<1x10xf32, #tpu.memory_space<vmem>>, %arg13: memref<1x10xf32, #tpu.memory_space<vmem>>, %arg14: memref<5x2x1024xf32, #tpu.memory_space<vmem>>, %arg15: memref<5x2x512xf32, #tpu.memory_space<vmem>>, %arg16: memref<5x2x512xf32, #tpu.memory_space<vmem>>, %arg17: memref<1x256xf32, #tpu.memory_space<vmem>>) attributes {dimension_semantics = [#tpu.dimension_semantics<arbitrary>, #tpu.dimension_semantics<arbitrary>], iteration_bounds = array<i64: 2, 5>, scalar_prefetch = 0 : i64, scratch_operands = 4 : i64, tpu.core_type = #tpu.core_type<tc>, window_params = [{transform_indices = @transform_0, window_bounds = array<i64: 12>}, {pipeline_mode = #tpu.pipeline_mode<synchronous>, transform_indices = @transform_1, window_bounds = array<i64: 2, 7, 1024>}, {pipeline_mode = #tpu.pipeline_mode<synchronous>, transform_indices = @transform_2, window_bounds = array<i64: 2, 5, 1024>}, {pipeline_mode = #tpu.pipeline_mode<synchronous>, transform_indices = @transform_3, window_bounds = array<i64: 2, 11, 1024>}, {pipeline_mode = #tpu.pipeline_mode<synchronous>, transform_indices = @transform_4, window_bounds = array<i64: 2, 1024>}, {pipeline_mode = #tpu.pipeline_mode<synchronous>, transform_indices = @transform_5, window_bounds = array<i64: 2, 1024>}, {transform_indices = @transform_6, window_bounds = array<i64: 1, 2, 1024, 512>}, {transform_indices = @transform_7, window_bounds = array<i64: 512, 256>}, {pipeline_mode = #tpu.pipeline_mode<synchronous>, transform_indices = @transform_8, window_bounds = array<i64: 1, 256>}, {pipeline_mode = #tpu.pipeline_mode<synchronous>, transform_indices = @transform_9, window_bounds = array<i64: 256, 10>}, {pipeline_mode = #tpu.pipeline_mode<synchronous>, transform_indices = @transform_10, window_bounds = array<i64: 1, 10>}, {pipeline_mode = #tpu.pipeline_mode<synchronous>, transform_indices = @transform_11, window_bounds = array<i64: 1, 10>}]} {
    %c0_i32 = arith.constant 0 : i32
    %0 = arith.cmpi eq, %arg0, %c0_i32 : i32
    %c0_i32_0 = arith.constant 0 : i32
    %1 = arith.cmpi eq, %arg1, %c0_i32_0 : i32
    %2 = arith.andi %0, %1 : i1
    %3 = arith.extui %2 : i1 to i32
    %c0_i32_1 = arith.constant 0 : i32
    %4 = arith.cmpi ne, %3, %c0_i32_1 : i32
    scf.if %4 {
      %c0_18 = arith.constant 0 : index
      %32 = memref.load %arg2[%c0_18] : memref<12xf32, #tpu.memory_space<smem>>
      %c1_19 = arith.constant 1 : index
      %33 = memref.load %arg2[%c1_19] : memref<12xf32, #tpu.memory_space<smem>>
      %c2 = arith.constant 2 : index
      %34 = memref.load %arg2[%c2] : memref<12xf32, #tpu.memory_space<smem>>
      %c3 = arith.constant 3 : index
      %35 = memref.load %arg2[%c3] : memref<12xf32, #tpu.memory_space<smem>>
      %c0_20 = arith.constant 0 : index
      %c0_21 = arith.constant 0 : index
      %c0_22 = arith.constant 0 : index
      %36 = vector.load %arg3[%c0_20, %c0_21, %c0_22] : memref<2x7x1024xf32, #tpu.memory_space<vmem>>, vector<2x7x1024xf32>
      %37 = vector.extract_strided_slice %36 {offsets = [0, 0, 0], sizes = [2, 5, 1024], strides = [1, 1, 1]} : vector<2x7x1024xf32> to vector<2x5x1024xf32>
      %38 = vector.broadcast %32 : f32 to vector<2x5x1024xf32>
      %39 = arith.mulf %38, %37 : vector<2x5x1024xf32>
      %40 = vector.extract_strided_slice %36 {offsets = [0, 1, 0], sizes = [2, 5, 1024], strides = [1, 1, 1]} : vector<2x7x1024xf32> to vector<2x5x1024xf32>
      %41 = vector.broadcast %33 : f32 to vector<2x5x1024xf32>
      %42 = arith.mulf %41, %40 : vector<2x5x1024xf32>
      %43 = arith.addf %39, %42 : vector<2x5x1024xf32>
      %44 = vector.extract_strided_slice %36 {offsets = [0, 2, 0], sizes = [2, 5, 1024], strides = [1, 1, 1]} : vector<2x7x1024xf32> to vector<2x5x1024xf32>
      %45 = vector.broadcast %34 : f32 to vector<2x5x1024xf32>
      %46 = arith.mulf %45, %44 : vector<2x5x1024xf32>
      %47 = arith.addf %43, %46 : vector<2x5x1024xf32>
      %48 = vector.broadcast %35 : f32 to vector<2x5x1024xf32>
      %49 = arith.addf %47, %48 : vector<2x5x1024xf32>
      %cst_23 = arith.constant 0.000000e+00 : f32
      %50 = vector.broadcast %cst_23 : f32 to vector<2x5x1024xf32>
      %51 = arith.maximumf %49, %50 : vector<2x5x1024xf32>
      %cst_24 = arith.constant dense<0xFF800000> : vector<2x1024xf32>
      %52 = vector.multi_reduction <maximumf>, %51, %cst_24 [1] : vector<2x5x1024xf32> to vector<2x1024xf32>
      %c0_25 = arith.constant 0 : index
      %c0_26 = arith.constant 0 : index
      %c0_27 = arith.constant 0 : index
      %53 = vector.load %arg14[%c0_25, %c0_26, %c0_27] : memref<5x2x1024xf32, #tpu.memory_space<vmem>>, vector<1x2x1024xf32>
      %54 = vector.shape_cast %53 : vector<1x2x1024xf32> to vector<2x1024xf32>
      %55 = vector.shape_cast %52 : vector<2x1024xf32> to vector<1x2x1024xf32>
      tpu.vector_store %arg14[%c0_25, %c0_26, %c0_27], %55 {strides = array<i32>} : memref<5x2x1024xf32, #tpu.memory_space<vmem>>, vector<1x2x1024xf32>,
      %c0_28 = arith.constant 0 : index
      %c0_29 = arith.constant 0 : index
      %56 = vector.load %arg6[%c0_28, %c0_29] : memref<2x1024xf32, #tpu.memory_space<vmem>>, vector<2x1024xf32>
      %57 = math.tanh %56 : vector<2x1024xf32>
      %c1_30 = arith.constant 1 : index
      %c0_31 = arith.constant 0 : index
      %c0_32 = arith.constant 0 : index
      %58 = vector.load %arg14[%c1_30, %c0_31, %c0_32] : memref<5x2x1024xf32, #tpu.memory_space<vmem>>, vector<1x2x1024xf32>
      %59 = vector.shape_cast %58 : vector<1x2x1024xf32> to vector<2x1024xf32>
      %60 = vector.shape_cast %57 : vector<2x1024xf32> to vector<1x2x1024xf32>
      tpu.vector_store %arg14[%c1_30, %c0_31, %c0_32], %60 {strides = array<i32>} : memref<5x2x1024xf32, #tpu.memory_space<vmem>>, vector<1x2x1024xf32>,
      %c4 = arith.constant 4 : index
      %61 = memref.load %arg2[%c4] : memref<12xf32, #tpu.memory_space<smem>>
      %c5 = arith.constant 5 : index
      %62 = memref.load %arg2[%c5] : memref<12xf32, #tpu.memory_space<smem>>
      %c6 = arith.constant 6 : index
      %63 = memref.load %arg2[%c6] : memref<12xf32, #tpu.memory_space<smem>>
      %c7 = arith.constant 7 : index
      %64 = memref.load %arg2[%c7] : memref<12xf32, #tpu.memory_space<smem>>
      %c0_33 = arith.constant 0 : index
      %c0_34 = arith.constant 0 : index
      %c0_35 = arith.constant 0 : index
      %65 = vector.load %arg4[%c0_33, %c0_34, %c0_35] : memref<2x5x1024xf32, #tpu.memory_space<vmem>>, vector<2x5x1024xf32>
      %66 = vector.extract_strided_slice %65 {offsets = [0, 0, 0], sizes = [2, 3, 1024], strides = [1, 1, 1]} : vector<2x5x1024xf32> to vector<2x3x1024xf32>
      %67 = vector.broadcast %61 : f32 to vector<2x3x1024xf32>
      %68 = arith.mulf %67, %66 : vector<2x3x1024xf32>
      %69 = vector.extract_strided_slice %65 {offsets = [0, 1, 0], sizes = [2, 3, 1024], strides = [1, 1, 1]} : vector<2x5x1024xf32> to vector<2x3x1024xf32>
      %70 = vector.broadcast %62 : f32 to vector<2x3x1024xf32>
      %71 = arith.mulf %70, %69 : vector<2x3x1024xf32>
      %72 = arith.addf %68, %71 : vector<2x3x1024xf32>
      %73 = vector.extract_strided_slice %65 {offsets = [0, 2, 0], sizes = [2, 3, 1024], strides = [1, 1, 1]} : vector<2x5x1024xf32> to vector<2x3x1024xf32>
      %74 = vector.broadcast %63 : f32 to vector<2x3x1024xf32>
      %75 = arith.mulf %74, %73 : vector<2x3x1024xf32>
      %76 = arith.addf %72, %75 : vector<2x3x1024xf32>
      %77 = vector.broadcast %64 : f32 to vector<2x3x1024xf32>
      %78 = arith.addf %76, %77 : vector<2x3x1024xf32>
      %cst_36 = arith.constant 0.000000e+00 : f32
      %79 = vector.broadcast %cst_36 : f32 to vector<2x3x1024xf32>
      %80 = arith.maximumf %78, %79 : vector<2x3x1024xf32>
      %cst_37 = arith.constant dense<0xFF800000> : vector<2x1024xf32>
      %81 = vector.multi_reduction <maximumf>, %80, %cst_37 [1] : vector<2x3x1024xf32> to vector<2x1024xf32>
      %c2_38 = arith.constant 2 : index
      %c0_39 = arith.constant 0 : index
      %c0_40 = arith.constant 0 : index
      %82 = vector.load %arg14[%c2_38, %c0_39, %c0_40] : memref<5x2x1024xf32, #tpu.memory_space<vmem>>, vector<1x2x1024xf32>
      %83 = vector.shape_cast %82 : vector<1x2x1024xf32> to vector<2x1024xf32>
      %84 = vector.shape_cast %81 : vector<2x1024xf32> to vector<1x2x1024xf32>
      tpu.vector_store %arg14[%c2_38, %c0_39, %c0_40], %84 {strides = array<i32>} : memref<5x2x1024xf32, #tpu.memory_space<vmem>>, vector<1x2x1024xf32>,
      %c0_41 = arith.constant 0 : index
      %c0_42 = arith.constant 0 : index
      %85 = vector.load %arg7[%c0_41, %c0_42] : memref<2x1024xf32, #tpu.memory_space<vmem>>, vector<2x1024xf32>
      %86 = math.tanh %85 : vector<2x1024xf32>
      %c3_43 = arith.constant 3 : index
      %c0_44 = arith.constant 0 : index
      %c0_45 = arith.constant 0 : index
      %87 = vector.load %arg14[%c3_43, %c0_44, %c0_45] : memref<5x2x1024xf32, #tpu.memory_space<vmem>>, vector<1x2x1024xf32>
      %88 = vector.shape_cast %87 : vector<1x2x1024xf32> to vector<2x1024xf32>
      %89 = vector.shape_cast %86 : vector<2x1024xf32> to vector<1x2x1024xf32>
      tpu.vector_store %arg14[%c3_43, %c0_44, %c0_45], %89 {strides = array<i32>} : memref<5x2x1024xf32, #tpu.memory_space<vmem>>, vector<1x2x1024xf32>,
      %c8 = arith.constant 8 : index
      %90 = memref.load %arg2[%c8] : memref<12xf32, #tpu.memory_space<smem>>
      %c9 = arith.constant 9 : index
      %91 = memref.load %arg2[%c9] : memref<12xf32, #tpu.memory_space<smem>>
      %c10 = arith.constant 10 : index
      %92 = memref.load %arg2[%c10] : memref<12xf32, #tpu.memory_space<smem>>
      %c11 = arith.constant 11 : index
      %93 = memref.load %arg2[%c11] : memref<12xf32, #tpu.memory_space<smem>>
      %c0_46 = arith.constant 0 : index
      %c0_47 = arith.constant 0 : index
      %c0_48 = arith.constant 0 : index
      %94 = vector.load %arg5[%c0_46, %c0_47, %c0_48] : memref<2x11x1024xf32, #tpu.memory_space<vmem>>, vector<2x11x1024xf32>
      %95 = vector.extract_strided_slice %94 {offsets = [0, 0, 0], sizes = [2, 9, 1024], strides = [1, 1, 1]} : vector<2x11x1024xf32> to vector<2x9x1024xf32>
      %96 = vector.broadcast %90 : f32 to vector<2x9x1024xf32>
      %97 = arith.mulf %96, %95 : vector<2x9x1024xf32>
      %98 = vector.extract_strided_slice %94 {offsets = [0, 1, 0], sizes = [2, 9, 1024], strides = [1, 1, 1]} : vector<2x11x1024xf32> to vector<2x9x1024xf32>
      %99 = vector.broadcast %91 : f32 to vector<2x9x1024xf32>
      %100 = arith.mulf %99, %98 : vector<2x9x1024xf32>
      %101 = arith.addf %97, %100 : vector<2x9x1024xf32>
      %102 = vector.extract_strided_slice %94 {offsets = [0, 2, 0], sizes = [2, 9, 1024], strides = [1, 1, 1]} : vector<2x11x1024xf32> to vector<2x9x1024xf32>
      %103 = vector.broadcast %92 : f32 to vector<2x9x1024xf32>
      %104 = arith.mulf %103, %102 : vector<2x9x1024xf32>
      %105 = arith.addf %101, %104 : vector<2x9x1024xf32>
      %106 = vector.broadcast %93 : f32 to vector<2x9x1024xf32>
      %107 = arith.addf %105, %106 : vector<2x9x1024xf32>
      %cst_49 = arith.constant 0.000000e+00 : f32
      %108 = vector.broadcast %cst_49 : f32 to vector<2x9x1024xf32>
      %109 = arith.maximumf %107, %108 : vector<2x9x1024xf32>
      %cst_50 = arith.constant dense<0xFF800000> : vector<2x1024xf32>
      %110 = vector.multi_reduction <maximumf>, %109, %cst_50 [1] : vector<2x9x1024xf32> to vector<2x1024xf32>
      %c4_51 = arith.constant 4 : index
      %c0_52 = arith.constant 0 : index
      %c0_53 = arith.constant 0 : index
      %111 = vector.load %arg14[%c4_51, %c0_52, %c0_53] : memref<5x2x1024xf32, #tpu.memory_space<vmem>>, vector<1x2x1024xf32>
      %112 = vector.shape_cast %111 : vector<1x2x1024xf32> to vector<2x1024xf32>
      %113 = vector.shape_cast %110 : vector<2x1024xf32> to vector<1x2x1024xf32>
      tpu.vector_store %arg14[%c4_51, %c0_52, %c0_53], %113 {strides = array<i32>} : memref<5x2x1024xf32, #tpu.memory_space<vmem>>, vector<1x2x1024xf32>,
      %cst_54 = arith.constant 0.000000e+00 : f32
      %114 = vector.broadcast %cst_54 : f32 to vector<1x256xf32>
      %c0_55 = arith.constant 0 : index
      %c0_56 = arith.constant 0 : index
      %115 = vector.load %arg17[%c0_55, %c0_56] : memref<1x256xf32, #tpu.memory_space<vmem>>, vector<1x256xf32>
      tpu.vector_store %arg17[%c0_55, %c0_56], %114 {strides = array<i32>} : memref<1x256xf32, #tpu.memory_space<vmem>>, vector<1x256xf32>,
    } else {
    }
    %5 = arith.index_cast %arg1 : i32 to index
    %c0 = arith.constant 0 : index
    %c0_2 = arith.constant 0 : index
    %6 = vector.load %arg14[%5, %c0, %c0_2] : memref<5x2x1024xf32, #tpu.memory_space<vmem>>, vector<1x2x1024xf32>
    %7 = vector.shape_cast %6 : vector<1x2x1024xf32> to vector<2x1024xf32>
    %8 = arith.truncf %7 : vector<2x1024xf32> to vector<2x1024xbf16>
    %c0_3 = arith.constant 0 : index
    %c0_4 = arith.constant 0 : index
    %c0_5 = arith.constant 0 : index
    %c0_6 = arith.constant 0 : index
    %9 = vector.load %arg8[%c0_3, %c0_4, %c0_5, %c0_6] : memref<1x2x1024x512xbf16, #tpu.memory_space<vmem>>, vector<1x1x1024x512xbf16>
    %10 = vector.shape_cast %9 : vector<1x1x1024x512xbf16> to vector<1024x512xbf16>
    %cst = arith.constant dense<0.000000e+00> : vector<2x512xf32>
    %11 = tpu.matmul %8, %10, %cst {dimension_numbers = #tpu.dot_dimension_numbers<[1], [0], [0], [1], [0, 0, 1, 1], [], []>} : vector<2x1024xbf16>, vector<1024x512xbf16>, vector<2x512xf32> -> vector<2x512xf32>
    %12 = math.tanh %11 : vector<2x512xf32>
    %13 = arith.index_cast %arg1 : i32 to index
    %c0_7 = arith.constant 0 : index
    %c0_8 = arith.constant 0 : index
    %14 = vector.load %arg15[%13, %c0_7, %c0_8] : memref<5x2x512xf32, #tpu.memory_space<vmem>>, vector<1x2x512xf32>
    %15 = vector.shape_cast %14 : vector<1x2x512xf32> to vector<2x512xf32>
    %16 = vector.shape_cast %12 : vector<2x512xf32> to vector<1x2x512xf32>
    tpu.vector_store %arg15[%13, %c0_7, %c0_8], %16 {strides = array<i32>} : memref<5x2x512xf32, #tpu.memory_space<vmem>>, vector<1x2x512xf32>,
    %c0_9 = arith.constant 0 : index
    %c1 = arith.constant 1 : index
    %c0_10 = arith.constant 0 : index
    %c0_11 = arith.constant 0 : index
    %17 = vector.load %arg8[%c0_9, %c1, %c0_10, %c0_11] : memref<1x2x1024x512xbf16, #tpu.memory_space<vmem>>, vector<1x1x1024x512xbf16>
    %18 = vector.shape_cast %17 : vector<1x1x1024x512xbf16> to vector<1024x512xbf16>
    %cst_12 = arith.constant dense<0.000000e+00> : vector<2x512xf32>
    %19 = tpu.matmul %8, %18, %cst_12 {dimension_numbers = #tpu.dot_dimension_numbers<[1], [0], [0], [1], [0, 0, 1, 1], [], []>} : vector<2x1024xbf16>, vector<1024x512xbf16>, vector<2x512xf32> -> vector<2x512xf32>
    %20 = arith.index_cast %arg1 : i32 to index
    %c0_13 = arith.constant 0 : index
    %c0_14 = arith.constant 0 : index
    %21 = vector.load %arg16[%20, %c0_13, %c0_14] : memref<5x2x512xf32, #tpu.memory_space<vmem>>, vector<1x2x512xf32>
    %22 = vector.shape_cast %21 : vector<1x2x512xf32> to vector<2x512xf32>
    %23 = vector.shape_cast %19 : vector<2x512xf32> to vector<1x2x512xf32>
    tpu.vector_store %arg16[%20, %c0_13, %c0_14], %23 {strides = array<i32>} : memref<5x2x512xf32, #tpu.memory_space<vmem>>, vector<1x2x512xf32>,
    %c4_i32 = arith.constant 4 : i32
    %24 = arith.cmpi eq, %arg1, %c4_i32 : i32
    %25 = arith.extui %24 : i1 to i32
    %c0_i32_15 = arith.constant 0 : i32
    %26 = arith.cmpi ne, %25, %c0_i32_15 : i32
    scf.if %26 {
      %c0_18 = arith.constant 0 : index
      %c0_19 = arith.constant 0 : index
      %c0_20 = arith.constant 0 : index
      %32 = vector.load %arg16[%c0_18, %c0_19, %c0_20] : memref<5x2x512xf32, #tpu.memory_space<vmem>>, vector<5x2x512xf32>
      %cst_21 = arith.constant dense<0xFF800000> : vector<2x512xf32>
      %33 = vector.multi_reduction <maximumf>, %32, %cst_21 [0] : vector<5x2x512xf32> to vector<2x512xf32>
      %34 = vector.shape_cast %33 : vector<2x512xf32> to vector<1x2x512xf32>
      %35 = vector.broadcast %34 : vector<1x2x512xf32> to vector<5x2x512xf32>
      %36 = arith.subf %32, %35 : vector<5x2x512xf32>
      %37 = math.exp %36 : vector<5x2x512xf32>
      %cst_22 = arith.constant dense<0.000000e+00> : vector<2x512xf32>
      %38 = vector.multi_reduction <add>, %37, %cst_22 [0] : vector<5x2x512xf32> to vector<2x512xf32>
      %39 = vector.shape_cast %38 : vector<2x512xf32> to vector<1x2x512xf32>
      %40 = vector.broadcast %39 : vector<1x2x512xf32> to vector<5x2x512xf32>
      %41 = arith.divf %37, %40 : vector<5x2x512xf32>
      %c0_23 = arith.constant 0 : index
      %c0_24 = arith.constant 0 : index
      %c0_25 = arith.constant 0 : index
      %42 = vector.load %arg15[%c0_23, %c0_24, %c0_25] : memref<5x2x512xf32, #tpu.memory_space<vmem>>, vector<5x2x512xf32>
      %43 = arith.mulf %41, %42 : vector<5x2x512xf32>
      %cst_26 = arith.constant dense<0.000000e+00> : vector<2x512xf32>
      %44 = vector.multi_reduction <add>, %43, %cst_26 [0] : vector<5x2x512xf32> to vector<2x512xf32>
      %c0_27 = arith.constant 0 : index
      %c0_28 = arith.constant 0 : index
      %45 = vector.load %arg17[%c0_27, %c0_28] : memref<1x256xf32, #tpu.memory_space<vmem>>, vector<1x256xf32>
      %46 = vector.extract_strided_slice %44 {offsets = [0, 0], sizes = [1, 512], strides = [1, 1]} : vector<2x512xf32> to vector<1x512xf32>
      %c0_29 = arith.constant 0 : index
      %c0_30 = arith.constant 0 : index
      %47 = vector.load %arg9[%c0_29, %c0_30] : memref<512x256xf32, #tpu.memory_space<vmem>>, vector<512x256xf32>
      %cst_31 = arith.constant dense<0.000000e+00> : vector<1x256xf32>
      %48 = tpu.matmul %46, %47, %cst_31 {dimension_numbers = #tpu.dot_dimension_numbers<[1], [0], [0], [1], [0, 0, 1, 1], [], []>} : vector<1x512xf32>, vector<512x256xf32>, vector<1x256xf32> -> vector<1x256xf32>
      %49 = arith.addf %45, %48 : vector<1x256xf32>
      %c0_32 = arith.constant 0 : index
      %c0_33 = arith.constant 0 : index
      %50 = vector.load %arg17[%c0_32, %c0_33] : memref<1x256xf32, #tpu.memory_space<vmem>>, vector<1x256xf32>
      tpu.vector_store %arg17[%c0_32, %c0_33], %49 {strides = array<i32>} : memref<1x256xf32, #tpu.memory_space<vmem>>, vector<1x256xf32>,
    } else {
    }
    %c1_i32 = arith.constant 1 : i32
    %27 = arith.cmpi eq, %arg0, %c1_i32 : i32
    %c4_i32_16 = arith.constant 4 : i32
    %28 = arith.cmpi eq, %arg1, %c4_i32_16 : i32
    %29 = arith.andi %27, %28 : i1
    %30 = arith.extui %29 : i1 to i32
    %c0_i32_17 = arith.constant 0 : i32
    %31 = arith.cmpi ne, %30, %c0_i32_17 : i32
    scf.if %31 {
      %c0_18 = arith.constant 0 : index
      %c0_19 = arith.constant 0 : index
      %32 = vector.load %arg17[%c0_18, %c0_19] : memref<1x256xf32, #tpu.memory_space<vmem>>, vector<1x256xf32>
      %c0_20 = arith.constant 0 : index
      %c0_21 = arith.constant 0 : index
      %33 = vector.load %arg10[%c0_20, %c0_21] : memref<1x256xf32, #tpu.memory_space<vmem>>, vector<1x256xf32>
      %34 = arith.addf %32, %33 : vector<1x256xf32>
      %cst_22 = arith.constant 0.000000e+00 : f32
      %35 = vector.broadcast %cst_22 : f32 to vector<1x256xf32>
      %36 = arith.maximumf %34, %35 : vector<1x256xf32>
      %c0_23 = arith.constant 0 : index
      %c0_24 = arith.constant 0 : index
      %37 = vector.load %arg11[%c0_23, %c0_24] : memref<256x10xf32, #tpu.memory_space<vmem>>, vector<256x10xf32>
      %cst_25 = arith.constant dense<0.000000e+00> : vector<1x10xf32>
      %38 = tpu.matmul %36, %37, %cst_25 {dimension_numbers = #tpu.dot_dimension_numbers<[1], [0], [0], [1], [0, 0, 1, 1], [], []>} : vector<1x256xf32>, vector<256x10xf32>, vector<1x10xf32> -> vector<1x10xf32>
      %c0_26 = arith.constant 0 : index
      %c0_27 = arith.constant 0 : index
      %39 = vector.load %arg12[%c0_26, %c0_27] : memref<1x10xf32, #tpu.memory_space<vmem>>, vector<1x10xf32>
      %40 = arith.addf %38, %39 : vector<1x10xf32>
      %c0_28 = arith.constant 0 : index
      %c0_29 = arith.constant 0 : index
      %41 = vector.load %arg13[%c0_28, %c0_29] : memref<1x10xf32, #tpu.memory_space<vmem>>, vector<1x10xf32>
      tpu.vector_store %arg13[%c0_28, %c0_29], %40 {strides = array<i32>} : memref<1x10xf32, #tpu.memory_space<vmem>>, vector<1x10xf32>,
    } else {
    }
    return
  }
  func.func @transform_0(%arg0: i32, %arg1: i32) -> i32 {
    %c0_i32 = arith.constant 0 : i32
    %c0_i32_0 = arith.constant 0 : i32
    return %c0_i32 : i32
  }
  func.func @transform_1(%arg0: i32, %arg1: i32) -> (i32, i32, i32) {
    %c0_i32 = arith.constant 0 : i32
    %c0_i32_0 = arith.constant 0 : i32
    %c0_i32_1 = arith.constant 0 : i32
    %c0_i32_2 = arith.constant 0 : i32
    return %c0_i32, %c0_i32_0, %c0_i32_1 : i32, i32, i32
  }
  func.func @transform_2(%arg0: i32, %arg1: i32) -> (i32, i32, i32) {
    %c0_i32 = arith.constant 0 : i32
    %c0_i32_0 = arith.constant 0 : i32
    %c0_i32_1 = arith.constant 0 : i32
    %c0_i32_2 = arith.constant 0 : i32
    return %c0_i32, %c0_i32_0, %c0_i32_1 : i32, i32, i32
  }
  func.func @transform_3(%arg0: i32, %arg1: i32) -> (i32, i32, i32) {
    %c0_i32 = arith.constant 0 : i32
    %c0_i32_0 = arith.constant 0 : i32
    %c0_i32_1 = arith.constant 0 : i32
    %c0_i32_2 = arith.constant 0 : i32
    return %c0_i32, %c0_i32_0, %c0_i32_1 : i32, i32, i32
  }
  func.func @transform_4(%arg0: i32, %arg1: i32) -> (i32, i32) {
    %c0_i32 = arith.constant 0 : i32
    %c0_i32_0 = arith.constant 0 : i32
    %c0_i32_1 = arith.constant 0 : i32
    return %c0_i32, %c0_i32_0 : i32, i32
  }
  func.func @transform_5(%arg0: i32, %arg1: i32) -> (i32, i32) {
    %c0_i32 = arith.constant 0 : i32
    %c0_i32_0 = arith.constant 0 : i32
    %c0_i32_1 = arith.constant 0 : i32
    return %c0_i32, %c0_i32_0 : i32, i32
  }
  func.func @transform_6(%arg0: i32, %arg1: i32) -> (i32, i32, i32, i32) {
    %c0_i32 = arith.constant 0 : i32
    %c0_i32_0 = arith.constant 0 : i32
    %c0_i32_1 = arith.constant 0 : i32
    return %arg1, %c0_i32, %c0_i32_0, %arg0 : i32, i32, i32, i32
  }
  func.func @transform_7(%arg0: i32, %arg1: i32) -> (i32, i32) {
    %c0_i32 = arith.constant 0 : i32
    %c0_i32_0 = arith.constant 0 : i32
    return %arg0, %c0_i32 : i32, i32
  }
  func.func @transform_8(%arg0: i32, %arg1: i32) -> (i32, i32) {
    %c0_i32 = arith.constant 0 : i32
    %c0_i32_0 = arith.constant 0 : i32
    %c0_i32_1 = arith.constant 0 : i32
    return %c0_i32, %c0_i32_0 : i32, i32
  }
  func.func @transform_9(%arg0: i32, %arg1: i32) -> (i32, i32) {
    %c0_i32 = arith.constant 0 : i32
    %c0_i32_0 = arith.constant 0 : i32
    %c0_i32_1 = arith.constant 0 : i32
    return %c0_i32, %c0_i32_0 : i32, i32
  }
  func.func @transform_10(%arg0: i32, %arg1: i32) -> (i32, i32) {
    %c0_i32 = arith.constant 0 : i32
    %c0_i32_0 = arith.constant 0 : i32
    %c0_i32_1 = arith.constant 0 : i32
    return %c0_i32, %c0_i32_0 : i32, i32
  }
  func.func @transform_11(%arg0: i32, %arg1: i32) -> (i32, i32) {
    %c0_i32 = arith.constant 0 : i32
    %c0_i32_0 = arith.constant 0 : i32
    %c0_i32_1 = arith.constant 0 : i32
    return %c0_i32, %c0_i32_0 : i32, i32
  }
}

</mosaic_0001>

<bundles_post_ra>
// kernel: mycnn_forward.1
= control target key start
LH: loop header
LB: loop body
LE: loop exit
PB: predicated region body
PF: predicated region fallthrough
CT: control target
= control target key end

     0   :  { %s12071_s0 = inlined_call_operand.hbm [shape: f32[12], index: 0, kind: input, shape index: {}]   ;;  %s12072_s1 = inlined_call_operand.vmem [shape: f32[2,7,1024], index: 1, kind: input, shape index: {}]   ;;  %s12073_s2 = inlined_call_operand.vmem [shape: f32[2,5,1024], index: 2, kind: input, shape index: {}]   ;;  %s12074_s3 = inlined_call_operand.vmem [shape: f32[2,11,1024], index: 3, kind: input, shape index: {}]   ;;  %s12075_s4 = inlined_call_operand.hbm [shape: f32[2,1024], index: 4, kind: input, shape index: {}]   ;;  %s12076_s5 = inlined_call_operand.hbm [shape: f32[2,1024], index: 5, kind: input, shape index: {}]   ;;  %s12077_s6 = inlined_call_operand.hbm [shape: bf16[5,2,1024,1024], index: 6, kind: input, shape index: {}]   ;;  %s12078_s7 = inlined_call_operand.hbm [shape: f32[1024,256], index: 7, kind: input, shape index: {}]   ;;  %s12079_s8 = inlined_call_operand.hbm [shape: f32[1,256], index: 8, kind: input, shape index: {}]   ;;  %s12080_s9 = inlined_call_operand.vmem [shape: f32[256,10], index: 9, kind: input, shape index: {}]   ;;  %s12081_s10 = inlined_call_operand.hbm [shape: f32[1,10], index: 10, kind: input, shape index: {}]   ;;  %s12082_s11 = inlined_call_operand.hbm [shape: f32[1,10], index: 11, kind: output, shape index: {}]  }
   0x1   :  { %12145 = sst [smem:[#allocation81_spill]] %s12072_s1 }
   0x2   :  { %12146 = sst [smem:[#allocation82_spill]] %s12073_s2 }
   0x3   :  { %12147 = sst [smem:[#allocation83_spill]] %s12074_s3 }
   0x4   :  { %12148 = sst [smem:[#allocation84_spill]] %s12075_s4 }
   0x5   :  { %12149 = sst [smem:[#allocation85_spill]] %s12076_s5 }
   0x6   :  { %12150 = sst [smem:[#allocation86_spill]] %s12078_s7 }
   0x7   :  { %12151 = sst [smem:[#allocation87_spill]] %s12080_s9 }
   0x8   :  { %12152 = sst [smem:[#allocation88_spill]] %s12082_s11 }
   0x9   :  { %16 = vsyncpa [#allocation9], 0 }
   0xa   :  { %17 = vsyncpa [#allocation7], 0 }
   0xb   :  { %18 = vsyncpa [#allocation12], 0 }
   0xc   :  { %19 = vsyncpa [#allocation17], 0 }
   0xd   :  { %20 = vsyncpa [#allocation8], 0  ;;  %s9357_s17 = smov 0   ;;  %s9359_s18 = smov 0  }
   0xe   :  { %s9361_s19 = smov 0   ;;  %s9363_s20 = smov 0  }
   0xf   :  { %s9365_s21 = smov 0   ;;  %s9367_s22 = smov 0  }
  0x10   :  { %s9369_s23 = smov 0   ;;  %s9371_s24 = smov 0  }
  0x11   :  { %s9373_s25 = smov 0   ;;  %s9375_s26 = smov 0  }
  0x12   :  { %s9377_s27 = smov 0  }
  0x13 LB: > { %12153 = sst [smem:[#allocation27_spill]] %s9256_s21  ;;  %s9282_s28 = smov [#allocation10]   ;;  %s9280_s27 = sphi %s9377_s27, %s26_s27   ;;  %s9276_s26 = sphi %s9375_s26, %s12352_s26   ;;  %s9272_s25 = sphi %s9373_s25, %s12351_s25   ;;  %s9268_s24 = sphi %s9371_s24, %s12350_s24   ;;  %s9264_s23 = sphi %s9369_s23, %s12349_s23   ;;  %s9260_s22 = sphi %s9367_s22, %s12348_s22   ;;  %s9256_s21 = sphi %s9365_s21, %s12347_s21   ;;  %s9252_s20 = sphi %s9363_s20, %s12341_s20   ;;  %s9248_s19 = sphi %s9361_s19, %s12346_s19   ;;  %s9244_s18 = sphi %s9359_s18, %s12345_s18   ;;  %s9240_s17 = sphi %s9357_s17, %s12344_s17  }
  0x14   : > { %12154 = sst [smem:[#allocation28_spill]] %s9264_s23  ;;  %s338_s29 = sshll.u32 %s9282_s28, 4  ;;  %s339_s29 = int_to_ptr.vmem [resolvable:$true] %s338_s29 }
  0x15   : > { %12155 = sst [smem:[#allocation29_spill]] %s9268_s24  ;;  %s9413_s30 = sadd.s32 4294967295, %s9280_s27  }
  0x16   : > { %p6926_p0 = scmp.ge.s32.totalorder %s9280_s27, 1  ;;  %p12088_p1 = scmp.eq.s32.totalorder %s9413_s30, 0 }
  0x17   : > { %p307_p2 = scmp.lt.s32.totalorder %s9280_s27, 11  ;;  %s9283_s13 = smov [#allocation11]  }
  0x18   : > { %s349_s14 = sshll.u32 %s9283_s13, 4  ;;  %s12159_s4 = sld [smem:[#allocation84_spill]]  ;;  %s9424_s14 = int_to_ptr.vmem [resolvable:$true] %s349_s14 }
  0x19   : > { %p9418_p3 = pnand %p6926_p0, %p307_p2 }
  0x1b   : > { %s12156_s12 = scalar_select %p9418_p3, 1, 0 }
  0x1c   : > { %p8016_p4 = pneg %p9418_p3 }
  0x1d   : > { %12157 = sst [smem:[#allocation30_spill]] %s12156_s12 }
  0x1e   : > { %p9428_p5 = pnand %p8016_p4, %p12088_p1  ;;  %s8951_s11 = scalar_lea.hbm %s12159_s4, 256 }
  0x1f   : > { %p8952_p6 = scmp.ne.s32.totalorder %s12159_s4, %s8951_s11  ;;  %p8958_p10 = scmp.lt.u32.totalorder %s8951_s11, %s12159_s4 }
  0x20   : > { %s12158_s15 = scalar_select %p9428_p5, 1, 0 }
  0x21   : > { %p9440_p7 = pneg %p9428_p5 }
  0x23   : > { %p8954_p8 = pnand %p9440_p7, %p8952_p6 }
  0x25   : > { %p8955_p9 = pneg %p8954_p8 }
  0x27   : > { %p8960_p11 = pnand %p8958_p10, %p8955_p9 }
  0x29   : > { %8963 = shalt.err (!%p8960_p11)
}
  0x2a   : > { %s8964_s16 = scalar_lea.vmem %s339_s29, 256  ;;  %p8972_p2 = scmp.lt.s32.totalorder %s339_s29, %s339_s29 }
  0x2b   : > { %p8965_p12 = scmp.ne.s32.totalorder %s339_s29, %s8964_s16  ;;  %p8973_p4 = scmp.lt.s32.totalorder %s8964_s16, %s8964_s16 }
  0x2d   : > { %p8967_p13 = pnand %p8965_p12, %p9440_p7  ;;  %p8974_p1 = por %p8973_p4, %p8972_p2 }
  0x2f   : > { %p8968_p0 = pneg %p8967_p13 }
  0x31   : > { %p8975_p3 = pnand %p8974_p1, %p8968_p0 }
  0x33   : > { %8978 = shalt.err (!%p8975_p3)
}
  0x34   : > { %8022 = dma.hbm_to_vmem [thread:$0]  (!%p9428_p5), %s12159_s4, 256, %s339_s29, [#allocation7]  }
  0x35   : > { %s12161_s5 = sld [smem:[#allocation85_spill]] }
  0x3b   : > { %s8979_s28 = scalar_lea.hbm %s12161_s5, 256 }
  0x3c   : > { %p8980_p6 = scmp.ne.s32.totalorder %s12161_s5, %s8979_s28  ;;  %p8986_p1 = scmp.lt.u32.totalorder %s8979_s28, %s12161_s5 }
  0x3e   : > { %p8982_p8 = pnand %p8980_p6, %p9440_p7 }
  0x40   : > { %p8983_p9 = pneg %p8982_p8 }
  0x42   : > { %p8988_p3 = pnand %p8986_p1, %p8983_p9 }
  0x44   : > { %8991 = shalt.err (!%p8988_p3)
}
  0x45   : > { %s8992_s29 = scalar_lea.vmem %s9424_s14, 256  ;;  %p9000_p13 = scmp.lt.s32.totalorder %s9424_s14, %s9424_s14 }
  0x46   : > { %p8993_p10 = scmp.ne.s32.totalorder %s9424_s14, %s8992_s29  ;;  %p9001_p0 = scmp.lt.s32.totalorder %s8992_s29, %s8992_s29 }
  0x48   : > { %p8995_p11 = pnand %p8993_p10, %p9440_p7  ;;  %p9002_p2 = por %p9001_p0, %p9000_p13 }
  0x4a   : > { %p8996_p12 = pneg %p8995_p11 }
  0x4c   : > { %p9003_p4 = pnand %p9002_p2, %p8996_p12 }
  0x4e   : > { %9006 = shalt.err (!%p9003_p4)
}
  0x4f   : > { %8025 = dma.hbm_to_vmem [thread:$0]  (!%p9428_p5), %s12161_s5, 256, %s9424_s14, [#allocation12]  }
  0x50   : > { %s35_s3 = sadd.s32 1, %s9272_s25  ;;  %s38_s9 = sadd.s32 1, %s9276_s26 }
  0x51   : > { %p36_p6 = scmp.ge.s32.totalorder %s35_s3, 5  ;;  %s173_s1 = sadd.s32 1, %s9260_s22 }
  0x52   : > { %p180_p8 = scmp.ne.s32.totalorder %s9260_s22, %s9256_s21  ;;  %p12099_p9 = scmp.eq.s32.totalorder %s9280_s27, 0 }
  0x53   : > { %s12354_s3 = smov (%p36_p6, %s35_s3), 0  ;;  %s12356_s9 = smov (!%p36_p6, %s38_s9), %s9276_s26 }
  0x54   : > { %12162 = sst [smem:[#allocation31_spill]] %s12354_s3  ;;  %s168_s11 = ssub.s32 %s9272_s25, %s12354_s3 }
  0x55   : > { %p9492_p1 = por %p12099_p9, %p180_p8  ;;  %p40_p3 = scmp.ge.s32.totalorder %s12356_s9, 2 }
  0x56   : > { %p186_p10 = scmp.ne.s32.totalorder %s9256_s21, %s9252_s20  ;;  %p12098_p11 = scmp.lt.s32.totalorder %s9280_s27, 10 }
  0x57   : > { %s385_s28 = sand.u32 1, %s9280_s27   ;;  %s12358_s9 = smov (%p40_p3, %s12356_s9), 0 }
  0x58   : > { %12164 = sst [smem:[#allocation32_spill]] %s12358_s9  ;;  %p12165_p12 = scmp.eq.s32.totalorder %s9413_s30, 0 }
  0x59   : > { %s9510_s16 = ssub.s32 %s9276_s26, %s12358_s9  ;;  %s387_s29 = sand.u32 1, %s9260_s22  }
  0x5a   : > { %p9504_p13 = por %p12165_p12, %p186_p10  ;;  %s170_s23 = sor.u32 %s9510_s16, %s168_s11 }
  0x5b   : > { %p171_p2 = scmp.eq.s32.totalorder %s170_s23, 0  ;;  %s6933_s20 = sshll.u32 %s387_s29, 12 }
  0x5c   : > { %s12166_s13 = scalar_select %p9504_p13, 1, 0 }
  0x5d   : > { %s6934_s24 = sshll.u32 %s9276_s26, 2  ;;  %s6935_s5 = sshll.u32 %s9272_s25, 11 }
  0x5e   : > { %12167 = sst [smem:[#allocation33_spill]] %s12166_s13  ;;  %s389_s3 = scalar_lea.vmem [#allocation13], %s6933_s20 }
  0x5f   : > { %s9517_s4 = scalar_select %p171_p2, %s9260_s22, %s173_s1  }
  0x60   : > { %s398_s21 = sshll.u32 %s389_s3, 4  ;;  %s395_s12 = sadd.s32 %s6935_s5, %s6934_s24  ;;  %s9520_s21 = int_to_ptr.vmem [resolvable:$true] %s398_s21 }
  0x61   : > { %s6936_s7 = sshll.u32 %s395_s12, 6  ;;  %p9526_p4 = pnand %p12098_p11, %p9492_p1 }
  0x62   : > { %s9533_s1 = scalar_lea.hbm %s12077_s6, %s6936_s7  ;;  %s9535_s5 = scalar_lea.sflag [#allocation7], %s385_s28 }
  0x63   : > { %s9007_s12 = scalar_lea.hbm %s9533_s1, 65536  ;;  %p9009_p8 = pneg %p9526_p4 }
  0x64   : > { %p9008_p6 = scmp.ne.s32.totalorder %s9533_s1, %s9007_s12  ;;  %s9012_s13 = scalar_lea.hbm %s12077_s6, 655360 }
  0x65   : > { %p9013_p10 = scmp.lt.u32.totalorder %s9533_s1, %s12077_s6  ;;  %p9014_p12 = scmp.lt.u32.totalorder %s9012_s13, %s9007_s12 }
  0x66   : > { %p9010_p1 = pnand %p9009_p8, %p9008_p6  ;;  %p9016_p11 = scmp.lt.u32.totalorder %s9007_s12, %s9533_s1 }
  0x67   : > { %p9015_p2 = por %p9014_p12, %p9013_p10 }
  0x68   : > { %p9011_p3 = pneg %p9010_p1 }
  0x69   : > { %p9017_p9 = por %p9016_p11, %p9015_p2 }
  0x6b   : > { %p9018_p0 = pnand %p9017_p9, %p9011_p3 }
  0x6d   : > { %9021 = shalt.err (!%p9018_p0)
}
  0x6e   : > { %s9022_s28 = scalar_lea.vmem %s9520_s21, 65536  ;;  %s9284_s23 = smov [#allocation13]  }
  0x6f   : > { %p9023_p6 = scmp.ne.s32.totalorder %s9520_s21, %s9022_s28  ;;  %s9027_s20 = sshll.u32 %s9284_s23, 4  ;;  %s9028_s20 = int_to_ptr.vmem [resolvable:$false] %s9027_s20 }
  0x70   : > { %s9029_s24 = scalar_lea.vmem %s9028_s20, 131072  ;;  %p9030_p5 = scmp.lt.s32.totalorder %s9520_s21, %s9028_s20 }
  0x71   : > { %p9025_p1 = pnand %p9023_p6, %p9009_p8  ;;  %p9031_p10 = scmp.lt.s32.totalorder %s9029_s24, %s9022_s28 }
  0x73   : > { %p9026_p13 = pneg %p9025_p1  ;;  %p9032_p12 = por %p9031_p10, %p9030_p5 }
  0x75   : > { %p9033_p11 = pnand %p9032_p12, %p9026_p13 }
  0x77   : > { %9036 = shalt.err (!%p9033_p11)
}
  0x78   : > { %s9285_s11 = smov 512   ;;  %s9286_s12 = smov 256  }
  0x79   : > { %s9287_s3 = smov 16   ;;  %s9037_s7 = scalar_lea.hbm %s12071_s0, 16 }
  0x7a   : > { %8035 = dma.hbm_to_vmem [thread:$0]  (!%p9526_p4), %s9533_s1, 65536, %s9520_s21, %s9535_s5, %s9285_s11, %s9286_s12, %s9287_s3  }
  0x7b   : > { %p9038_p5 = scmp.ne.s32.totalorder %s12071_s0, %s9037_s7  ;;  %p9044_p0 = scmp.lt.u32.totalorder %s9037_s7, %s12071_s0 }
  0x7d   : > { %p9040_p9 = pnand %p9038_p5, %p9440_p7 }
  0x7f   : > { %p9041_p13 = pneg %p9040_p9 }
  0x81   : > { %p9046_p8 = pnand %p9044_p0, %p9041_p13 }
  0x83   : > { %9049 = shalt.err (!%p9046_p8)
}
  0x84   : > { %s9288_s9 = smov [#allocation6]   ;;  %p12169_p4 = scmp.ne.s32.totalorder %s12158_s15, 0 }
  0x85   : > { %s9289_s24 = smov [#allocation15]   ;;  %s9290_s14 = smov [#allocation16]  }
  0x86   : > { %8019 = dma.hbm_to_smem (!%p12169_p4), %s12071_s0, 16, %s9288_s9, [#allocation9]  }
  0x87   : > { %s360_s11 = sshll.u32 %s9289_s24, 4  ;;  %s374_s13 = sshll.u32 %s9290_s14, 4  ;;  %s361_s11 = int_to_ptr.vmem [resolvable:$true] %s360_s11  ;;  %s9581_s13 = int_to_ptr.vmem [resolvable:$true] %s374_s13 }
  0x88   : > { %s9050_s7 = scalar_lea.hbm %s12079_s8, 32 }
  0x89   : > { %p9051_p3 = scmp.ne.s32.totalorder %s12079_s8, %s9050_s7  ;;  %p9057_p1 = scmp.lt.u32.totalorder %s9050_s7, %s12079_s8 }
  0x8b   : > { %p9053_p2 = pnand %p9051_p3, %p9440_p7 }
  0x8d   : > { %p9054_p6 = pneg %p9053_p2 }
  0x8f   : > { %p9059_p10 = pnand %p9057_p1, %p9054_p6 }
  0x91   : > { %9062 = shalt.err (!%p9059_p10)
}
  0x92   : > { %s9063_s1 = scalar_lea.vmem %s361_s11, 32  ;;  %p9071_p9 = scmp.lt.s32.totalorder %s361_s11, %s361_s11 }
  0x93   : > { %p9064_p12 = scmp.ne.s32.totalorder %s361_s11, %s9063_s1  ;;  %p9072_p13 = scmp.lt.s32.totalorder %s9063_s1, %s9063_s1 }
  0x95   : > { %p9066_p11 = pnand %p9064_p12, %p9440_p7  ;;  %p9073_p0 = por %p9072_p13, %p9071_p9 }
  0x97   : > { %p9067_p5 = pneg %p9066_p11 }
  0x99   : > { %p9074_p8 = pnand %p9073_p0, %p9067_p5 }
  0x9b   : > { %9077 = shalt.err (!%p9074_p8)
}
  0x9c   : > { %8028 = dma.hbm_to_vmem [thread:$0]  (!%p12169_p4), %s12079_s8, 32, %s361_s11, [#allocation12]  }
  0x9d   : > { %s9078_s7 = scalar_lea.hbm %s12081_s10, 16 }
  0x9e   : > { %p9079_p3 = scmp.ne.s32.totalorder %s12081_s10, %s9078_s7  ;;  %p9085_p1 = scmp.lt.u32.totalorder %s9078_s7, %s12081_s10 }
  0xa0   : > { %p9081_p2 = pnand %p9079_p3, %p9440_p7 }
  0xa2   : > { %p9082_p6 = pneg %p9081_p2 }
  0xa4   : > { %p9087_p10 = pnand %p9085_p1, %p9082_p6 }
  0xa6   : > { %9090 = shalt.err (!%p9087_p10)
}
  0xa7   : > { %s9091_s11 = scalar_lea.vmem %s9581_s13, 16  ;;  %s9098_s1 = scalar_lea.vmem %s9581_s13, 32 }
  0xa8   : > { %p9092_p12 = scmp.ne.s32.totalorder %s9581_s13, %s9091_s11  ;;  %p9099_p9 = scmp.lt.s32.totalorder %s9581_s13, %s9581_s13 }
  0xa9   : > { %p9100_p13 = scmp.lt.s32.totalorder %s9098_s1, %s9091_s11 }
  0xaa   : > { %p9094_p11 = pnand %p9092_p12, %p9440_p7 }
  0xab   : > { %p9101_p0 = por %p9100_p13, %p9099_p9 }
  0xac   : > { %p9095_p5 = pneg %p9094_p11 }
  0xae   : > { %p9102_p8 = pnand %p9101_p0, %p9095_p5 }
  0xb0   : > { %9105 = shalt.err (!%p9102_p8)
}
  0xb1   : > { %8031 = dma.hbm_to_vmem [thread:$0]  (!%p12169_p4), %s12081_s10, 16, %s9581_s13, [#allocation17]  }
  0xb2   : > { %s199_s2 = sadd.s32 1, %s9248_s19  ;;  %p206_p7 = scmp.ne.s32.totalorder %s9248_s19, %s9244_s18 }
  0xb3   : > { %p12170_p3 = scmp.eq.s32.totalorder %s9510_s16, 0  ;;  %p12171_p2 = scmp.eq.s32.totalorder %s9280_s27, 0 }
  0xb4   : > { %p212_p1 = scmp.ne.s32.totalorder %s9244_s18, %s9240_s17  ;;  %s410_s29 = sand.u32 1, %s9248_s19  }
  0xb5   : > { %s9631_s15 = scalar_select %p12170_p3, %s9248_s19, %s199_s2  }
  0xb6   : > { %p208_p6 = por %p206_p7, %p12171_p2  ;;  %s7739_s28 = sshll.u32 %s9276_s26, 14 }
  0xb7   : > { %p12172_p10 = scmp.eq.s32.totalorder %s9413_s30, 0  ;;  %s6937_s23 = sshll.u32 %s410_s29, 10 }
  0xb8   : > { %s12174_s9 = sld [smem:[#allocation86_spill]]  ;;  %s412_s16 = scalar_lea.vmem [#allocation14], %s6937_s23 }
  0xb9   : > { %p9641_p12 = por %p212_p1, %p12172_p10  ;;  %s420_s11 = sshll.u32 %s412_s16, 4  ;;  %s9656_s11 = int_to_ptr.vmem [resolvable:$true] %s420_s11 }
  0xba   : > { %p12175_p4 = scmp.lt.s32.totalorder %s9280_s27, 10 }
  0xbc   : > { %p9652_p11 = pnand %p12175_p4, %p208_p6 }
  0xbe   : > { %s9648_s13 = scalar_lea.hbm %s12174_s9, %s7739_s28  ;;  %p9108_p9 = pneg %p9652_p11 }
  0xbf   : > { %s9106_s1 = scalar_lea.hbm %s9648_s13, 16384  ;;  %s9111_s2 = scalar_lea.hbm %s12174_s9, 32768 }
  0xc0   : > { %p9107_p5 = scmp.ne.s32.totalorder %s9648_s13, %s9106_s1  ;;  %p9112_p8 = scmp.lt.u32.totalorder %s9648_s13, %s12174_s9 }
  0xc1   : > { %p9113_p7 = scmp.lt.u32.totalorder %s9111_s2, %s9106_s1  ;;  %p9115_p2 = scmp.lt.u32.totalorder %s9106_s1, %s9648_s13 }
  0xc2   : > { %p9109_p13 = pnand %p9108_p9, %p9107_p5 }
  0xc3   : > { %p9114_p3 = por %p9113_p7, %p9112_p8 }
  0xc4   : > { %p9110_p0 = pneg %p9109_p13 }
  0xc5   : > { %p9116_p6 = por %p9115_p2, %p9114_p3 }
  0xc7   : > { %p9117_p1 = pnand %p9116_p6, %p9110_p0 }
  0xc9   : > { %9120 = shalt.err (!%p9117_p1)
}
  0xca   : > { %s9121_s23 = scalar_lea.vmem %s9656_s11, 16384  ;;  %s9291_s20 = smov [#allocation14]  }
  0xcb   : > { %p9122_p10 = scmp.ne.s32.totalorder %s9656_s11, %s9121_s23  ;;  %s9126_s21 = sshll.u32 %s9291_s20, 4  ;;  %s9127_s21 = int_to_ptr.vmem [resolvable:$false] %s9126_s21 }
  0xcc   : > { %s9128_s16 = scalar_lea.vmem %s9127_s21, 32768  ;;  %p9129_p13 = scmp.lt.s32.totalorder %s9656_s11, %s9127_s21 }
  0xcd   : > { %p9124_p4 = pnand %p9122_p10, %p9108_p9  ;;  %p9130_p8 = scmp.lt.s32.totalorder %s9128_s16, %s9121_s23 }
  0xcf   : > { %p9125_p5 = pneg %p9124_p4  ;;  %p9131_p7 = por %p9130_p8, %p9129_p13 }
  0xd1   : > { %p9132_p3 = pnand %p9131_p7, %p9125_p5 }
  0xd3   : > { %9135 = shalt.err (!%p9132_p3)
}
  0xd4   : > { %8038 = dma.hbm_to_vmem [thread:$0]  (!%p9652_p11), %s9648_s13, 16384, %s9656_s11, %s9535_s5, %s9286_s12, %s9286_s12, %s9287_s3  }
  0xd5   : > { %s12177_s1 = sld [smem:[#allocation30_spill]] }
  0xdb   : > { %p12178_p9 = scmp.ne.s32.totalorder %s12177_s1, 0 }
  0xdc   : > { %p12179_p0 = scmp.eq.s32.totalorder (!%p12178_p9), %s9413_s30, 0 }
  0xdd   : > { %432 = sbr.rel (%p12178_p9) target bundleno = 1920 (0x780), region = 64 }
  0xe4   : > { %9207 = dma.done.wait (%p12179_p0), [#allocation9], 16   ;;  %p12180_p2 = pmov %p12179_p0 }
  0xe5   : > { %p12181_p6 = pmov %p12179_p0 }
  0xe6   : > { %9209 = vsyncadd (%p12180_p2), [#allocation9], 4294967280 }
  0xe7   : > { %9211 = dma.done.wait (%p12181_p6), [#allocation7], 256   ;;  %p12182_p1 = pmov %p12179_p0 }
  0xe8   : > { %p12183_p10 = pmov %p12179_p0 }
  0xe9   : > { %9213 = vsyncadd (%p12182_p1), [#allocation7], 4294967040 }
  0xea   : > { %9215 = dma.done.wait (%p12183_p10), [#allocation12], 256   ;;  %p12184_p11 = pmov %p12179_p0 }
  0xeb   : > { %s12185_s5 = sld [smem:[#allocation27_spill]]  ;;  %s12186_s12 = sld [smem:[#allocation33_spill]] }
  0xec   : > { %9217 = vsyncadd (%p12184_p11), [#allocation12], 4294967040  ;;  %s446_s3 = sand.u32 1, %s9413_s30  }
  0xed   : > { %s447_s17 = scalar_lea.sflag [#allocation7], %s446_s3 }
  0xf1   : > { %s448_s13 = sand.u32 1, %s12185_s5   ;;  %p12187_p4 = scmp.ne.s32.totalorder %s12186_s12, 0 }
  0xf2   : > { %s6945_s11 = sshll.u32 %s448_s13, 12 }
  0xf3   : > { %s9703_s24 = scalar_lea.vmem [#allocation13], %s6945_s11 }
  0xf4   : > { %9219 = dma.done.wait (%p12187_p4), %s447_s17, 65536  }
  0xf5   : > { %9221 = vsyncadd (%p12187_p4), %s447_s17, 4294901760  ;;  %s457_s14 = sand.u32 1, %s9244_s18  }
  0xf6   : > { %s6946_s2 = sshll.u32 %s457_s14, 10 }
  0xf7   : > { %s9710_s29 = scalar_lea.vmem [#allocation14], %s6946_s2 }
  0xf8   : > { %9223 = dma.done.wait (%p9641_p12), %s447_s17, 16384  }
  0xf9   : > { %9225 = vsyncadd (%p9641_p12), %s447_s17, 4294950912  ;;  %p12188_p5 = pmov %p12179_p0 }
  0xfa   : > { %p12189_p13 = pmov %p12179_p0 }
  0xfb   : > { %9227 = dma.done.wait (%p12188_p5), [#allocation12], 32  }
  0xfc   : > { %9229 = vsyncadd (%p12189_p13), [#allocation12], 4294967264  ;;  %p12190_p8 = pmov %p12179_p0 }
  0xfd   : > { %p12191_p7 = pmov %p12179_p0 }
  0xfe   : > { %9231 = dma.done.wait (%p12190_p8), [#allocation17], 16  }
  0xff   : > { %9233 = vsyncadd (%p12191_p7), [#allocation17], 4294967280 }
 0x100   : > { %472 = sfence }
 0x101   : > { %s12192_s28 = sld [smem:[#allocation29_spill]]  ;;  %s12193_s23 = sld [smem:[#allocation28_spill]] }
 0x107   : > { %p509_p3 = scmp.eq.s32.totalorder %s12192_s28, 0  ;;  %p510_p9 = scmp.eq.s32.totalorder %s12193_s23, 0 }
 0x109   : > { %p511_p0 = pnand %p510_p9, %p509_p3 }
 0x10b   : > { %514 = sbr.rel (%p511_p0) target bundleno = 568 (0x238), region = 96 }
 0x112   : > { %s515_s7 = sld [smem:[#allocation6]]  ;;  %s6949_s20 = sld [smem:[#allocation6 + $0x1]]  ;;  %vm747_vm0 = vcmask 1044480   ;;  %vm949_vm1 = vcmask 1041409   ;;  %vm951_vm2 = vcmask 1043459   ;;  %vm953_vm3 = vcmask 1045509  }
 0x113   : > { %s12194_s1 = sld [smem:[#allocation81_spill]]  ;;  %s9839_s11 = sld [smem:[#allocation6 + $0x3]]  ;;  %vm955_vm4 = vcmask 1047559   ;;  %vm1207_vm5 = vcmask 1042432   ;;  %vm1564_vm6 = vcmask 1046528   ;;  %vm1742_vm7 = vcmask 1045504  }
 0x114   : > { %s9942_s17 = sld [smem:[#allocation6 + $0x4]]  ;;  %s9953_s14 = sld [smem:[#allocation6 + $0x5]]  ;;  %vm1920_vm9 = vcmask 1040384  }
 0x115   : > { %s12210_s28 = sld [smem:[#allocation83_spill]] }
 0x116   : > { %s10363_s21 = sld [smem:[#allocation6 + $0xa]] }
 0x118   : > { %v535_v6 = vstv %s515_s7  ;;  %v552_v14 = vstv %s6949_s20  ;;  %s9833_s7 = sld [smem:[#allocation6 + $0x2]]  ;;  %s12203_s20 = sld [smem:[#allocation82_spill]] }
 0x119   : > { %v9729_v0 = vld [vmem:[%s12194_s1] sm:$0x7f]  ;;  %v9734_v1 = vld [vmem:[%s12194_s1 + $0x8] sm:$0x7f]  ;;  %v9739_v2 = vld [vmem:[%s12194_s1 + $0x10] sm:$0x7f] }
 0x11a   : > { %v9744_v3 = vld [vmem:[%s12194_s1 + $0x18] sm:$0x7f]  ;;  %v9749_v4 = vld [vmem:[%s12194_s1 + $0x20] sm:$0x7f]  ;;  %v9754_v5 = vld [vmem:[%s12194_s1 + $0x28] sm:$0x7f]  ;;  %v536_v11 = vmul.f32 %v535_v6, %v9729_v0  ;;  %v537_v12 = vmul.f32 %v535_v6, %v9734_v1  ;;  %v538_v13 = vmul.f32 %v535_v6, %v9739_v2  ;;  %v553_v35 = vmul.f32 %v552_v14, %v9729_v0 }
 0x11b   : > { %v9759_v8 = vld [vmem:[%s12194_s1 + $0x30] sm:$0x7f]  ;;  %v9764_v9 = vld [vmem:[%s12194_s1 + $0x38] sm:$0x7f]  ;;  %v9769_v10 = vld [vmem:[%s12194_s1 + $0x40] sm:$0x7f]  ;;  %v539_v18 = vmul.f32 %v535_v6, %v9744_v3  ;;  %v540_v19 = vmul.f32 %v535_v6, %v9749_v4  ;;  %v541_v20 = vmul.f32 %v535_v6, %v9754_v5  ;;  %v554_v36 = vmul.f32 %v552_v14, %v9734_v1 }
 0x11c   : > { %v9777_v15 = vld [vmem:[%s12194_s1 + $0x48] sm:$0x7f]  ;;  %v9782_v16 = vld [vmem:[%s12194_s1 + $0x50] sm:$0x7f]  ;;  %v9787_v17 = vld [vmem:[%s12194_s1 + $0x58] sm:$0x7f]  ;;  %v542_v21 = vmul.f32 %v535_v6, %v9759_v8  ;;  %v543_v25 = vmul.f32 %v535_v6, %v9764_v9  ;;  %v544_v26 = vmul.f32 %v535_v6, %v9769_v10  ;;  %v555_v37 = vmul.f32 %v552_v14, %v9739_v2 }
 0x11d   : > { %v9796_v22 = vld [vmem:[%s12194_s1 + $0x60] sm:$0x7f]  ;;  %v9801_v23 = vld [vmem:[%s12194_s1 + $0x68] sm:$0x7f]  ;;  %v9806_v24 = vld [vmem:[%s12194_s1 + $0x70] sm:$0x7f]  ;;  %v545_v27 = vmul.f32 %v535_v6, %v9777_v15  ;;  %v546_v28 = vmul.f32 %v535_v6, %v9782_v16  ;;  %v547_v30 = vmul.f32 %v535_v6, %v9787_v17  ;;  %v556_v38 = vmul.f32 %v552_v14, %v9744_v3 }
 0x11e   : > { %12195 = vst [vmem:[#allocation34_spill] sm:$0xff] %v9796_v22  ;;  %12196 = vst [vmem:[#allocation35_spill] sm:$0xff] %v9801_v23  ;;  %v9815_v29 = vld [vmem:[%s12194_s1 + $0x78] sm:$0x7f]  ;;  %v548_v31 = vmul.f32 %v535_v6, %v9796_v22  ;;  %v549_v32 = vmul.f32 %v535_v6, %v9801_v23  ;;  %v550_v33 = vmul.f32 %v535_v6, %v9806_v24  ;;  %v585_v51 = vrot.slane %v553_v35, 1  ;;  %s12204_s16 = smov %s12203_s20 }
 0x11f   : > { %12197 = vst [vmem:[#allocation36_spill] sm:$0xff] %v9806_v24  ;;  %v551_v34 = vmul.f32 %v535_v6, %v9815_v29  ;;  %v557_v39 = vmul.f32 %v552_v14, %v9749_v4  ;;  %v558_v40 = vmul.f32 %v552_v14, %v9754_v5  ;;  %v559_v41 = vmul.f32 %v552_v14, %v9759_v8 }
 0x120   : > { %v560_v42 = vmul.f32 %v552_v14, %v9764_v9  ;;  %v561_v43 = vmul.f32 %v552_v14, %v9769_v10  ;;  %v562_v44 = vmul.f32 %v552_v14, %v9777_v15  ;;  %v563_v45 = vmul.f32 %v552_v14, %v9782_v16 }
 0x121   : > { %v564_v46 = vmul.f32 %v552_v14, %v9787_v17  ;;  %v565_v47 = vmul.f32 %v552_v14, %v9796_v22  ;;  %v566_v48 = vmul.f32 %v552_v14, %v9801_v23  ;;  %v567_v49 = vmul.f32 %v552_v14, %v9806_v24 }
 0x122   : > { %v568_v50 = vmul.f32 %v552_v14, %v9815_v29  ;;  %v586_v52 = vrot.slane %v554_v36, 1  ;;  %v587_v53 = vrot.slane %v555_v37, 1  ;;  %v588_v54 = vrot.slane %v556_v38, 1 }
 0x123   : > { %v589_v55 = vrot.slane %v557_v39, 1  ;;  %v590_v56 = vrot.slane %v558_v40, 1  ;;  %v591_v57 = vrot.slane %v559_v41, 1  ;;  %v592_v58 = vrot.slane %v560_v42, 1 }
 0x124   : > { %v593_v59 = vrot.slane %v561_v43, 1  ;;  %v594_v60 = vrot.slane %v562_v44, 1  ;;  %v595_v61 = vrot.slane %v563_v45, 1  ;;  %v596_v62 = vrot.slane %v564_v46, 1 }
 0x125   : > { %v597_v63 = vrot.slane %v565_v47, 1  ;;  %v598_v6 = vrot.slane %v566_v48, 1  ;;  %v599_v7 = vrot.slane %v567_v49, 1  ;;  %v600_v24 = vrot.slane %v568_v50, 1 }
 0x126   : > { %v617_v23 = vadd.f32 %v585_v51, %v536_v11  ;;  %v618_v22 = vadd.f32 %v586_v52, %v537_v12  ;;  %v619_v14 = vadd.f32 %v587_v53, %v538_v13  ;;  %v620_v35 = vadd.f32 %v588_v54, %v539_v18 }
 0x127   : > { %v621_v36 = vadd.f32 %v589_v55, %v540_v19  ;;  %v622_v37 = vadd.f32 %v590_v56, %v541_v20  ;;  %v623_v38 = vadd.f32 %v591_v57, %v542_v21  ;;  %v624_v39 = vadd.f32 %v592_v58, %v543_v25 }
 0x128   : > { %v625_v40 = vadd.f32 %v593_v59, %v544_v26  ;;  %v626_v41 = vadd.f32 %v594_v60, %v545_v27  ;;  %v627_v42 = vadd.f32 %v595_v61, %v546_v28  ;;  %v628_v43 = vadd.f32 %v596_v62, %v547_v30  ;;  %v12198_v26 = vld [vmem:[#allocation34_spill] sm:$0xff]  ;;  %v12199_v27 = vld [vmem:[#allocation35_spill] sm:$0xff]  ;;  %v12200_v28 = vld [vmem:[#allocation36_spill] sm:$0xff] }
 0x129   : > { %v629_v44 = vadd.f32 %v597_v63, %v548_v31  ;;  %v630_v45 = vadd.f32 %v598_v6, %v549_v32  ;;  %v631_v46 = vadd.f32 %v599_v7, %v550_v33  ;;  %v632_v47 = vadd.f32 %v600_v24, %v551_v34 }
 0x12a   : > { %v633_v48 = vstv %s9833_s7  ;;  %v9844_v49 = vstv %s9839_s11  ;;  %s10120_s7 = sld [smem:[#allocation6 + $0x7]]  ;;  %s10239_s11 = sld [smem:[#allocation6 + $0x8]] }
 0x12b   : > { %v634_v11 = vmul.f32 %v633_v48, %v9729_v0  ;;  %v635_v12 = vmul.f32 %v633_v48, %v9734_v1  ;;  %v636_v13 = vmul.f32 %v633_v48, %v9739_v2  ;;  %v637_v18 = vmul.f32 %v633_v48, %v9744_v3 }
 0x12c   : > { %v638_v19 = vmul.f32 %v633_v48, %v9749_v4  ;;  %v639_v20 = vmul.f32 %v633_v48, %v9754_v5  ;;  %v640_v21 = vmul.f32 %v633_v48, %v9759_v8  ;;  %v641_v7 = vmul.f32 %v633_v48, %v9764_v9 }
 0x12d   : > { %v642_v24 = vmul.f32 %v633_v48, %v9769_v10  ;;  %v643_v25 = vmul.f32 %v633_v48, %v9777_v15  ;;  %v644_v0 = vmul.f32 %v633_v48, %v9782_v16  ;;  %v645_v1 = vmul.f32 %v633_v48, %v9787_v17 }
 0x12e   : > { %v646_v2 = vmul.f32 %v633_v48, %v12198_v26  ;;  %v647_v3 = vmul.f32 %v633_v48, %v12199_v27  ;;  %v648_v4 = vmul.f32 %v633_v48, %v12200_v28  ;;  %v649_v5 = vmul.f32 %v633_v48, %v9815_v29 }
 0x12f   : > { %v666_v30 = vrot.slane %v634_v11, 2  ;;  %v667_v8 = vrot.slane %v635_v12, 2  ;;  %v668_v31 = vrot.slane %v636_v13, 2  ;;  %v669_v9 = vrot.slane %v637_v18, 2 }
 0x130   : > { %v670_v32 = vrot.slane %v638_v19, 2  ;;  %v671_v10 = vrot.slane %v639_v20, 2  ;;  %v672_v33 = vrot.slane %v640_v21, 2  ;;  %v673_v15 = vrot.slane %v641_v7, 2 }
 0x131   : > { %v674_v34 = vrot.slane %v642_v24, 2  ;;  %v675_v16 = vrot.slane %v643_v25, 2  ;;  %v676_v50 = vrot.slane %v644_v0, 2  ;;  %v677_v17 = vrot.slane %v645_v1, 2 }
 0x132   : > { %v678_v51 = vrot.slane %v646_v2, 2  ;;  %v679_v52 = vrot.slane %v647_v3, 2  ;;  %v680_v53 = vrot.slane %v648_v4, 2  ;;  %v681_v54 = vrot.slane %v649_v5, 2 }
 0x133   : > { %v698_v55 = vadd.f32 %v666_v30, %v617_v23  ;;  %v699_v56 = vadd.f32 %v667_v8, %v618_v22  ;;  %v700_v57 = vadd.f32 %v668_v31, %v619_v14  ;;  %v701_v29 = vadd.f32 %v669_v9, %v620_v35 }
 0x134   : > { %v702_v58 = vadd.f32 %v670_v32, %v621_v36  ;;  %v703_v59 = vadd.f32 %v671_v10, %v622_v37  ;;  %v704_v60 = vadd.f32 %v672_v33, %v623_v38  ;;  %v705_v61 = vadd.f32 %v673_v15, %v624_v39 }
 0x135   : > { %v706_v62 = vadd.f32 %v674_v34, %v625_v40  ;;  %v707_v63 = vadd.f32 %v675_v16, %v626_v41  ;;  %v708_v6 = vadd.f32 %v676_v50, %v627_v42  ;;  %v709_v48 = vadd.f32 %v677_v17, %v628_v43 }
 0x136   : > { %v710_v11 = vadd.f32 %v678_v51, %v629_v44  ;;  %v711_v12 = vadd.f32 %v679_v52, %v630_v45  ;;  %v712_v13 = vadd.f32 %v680_v53, %v631_v46  ;;  %v713_v18 = vadd.f32 %v681_v54, %v632_v47 }
 0x137   : > { %v715_v19 = vadd.f32 %v9844_v49, %v698_v55  ;;  %v716_v23 = vadd.f32 %v9844_v49, %v699_v56  ;;  %v717_v22 = vadd.f32 %v9844_v49, %v700_v57  ;;  %v718_v14 = vadd.f32 %v9844_v49, %v701_v29 }
 0x138   : > { %v719_v35 = vadd.f32 %v9844_v49, %v702_v58  ;;  %v720_v36 = vadd.f32 %v9844_v49, %v703_v59  ;;  %v721_v37 = vadd.f32 %v9844_v49, %v704_v60  ;;  %v722_v38 = vadd.f32 %v9844_v49, %v705_v61 }
 0x139   : > { %v9871_v39 = vadd.f32 %v9844_v49, %v706_v62  ;;  %v9874_v40 = vadd.f32 %v9844_v49, %v707_v63  ;;  %v9877_v41 = vadd.f32 %v9844_v49, %v708_v6  ;;  %v9880_v42 = vadd.f32 %v9844_v49, %v709_v48 }
 0x13a   : > { %v9883_v43 = vadd.f32 %v9844_v49, %v710_v11  ;;  %v9886_v44 = vadd.f32 %v9844_v49, %v711_v12  ;;  %v9889_v45 = vadd.f32 %v9844_v49, %v712_v13  ;;  %v9892_v46 = vadd.f32 %v9844_v49, %v713_v18 }
 0x13b   : > { %v731_v47 = vmax.f32 %v715_v19, 0.0  ;;  %v732_v20 = vmax.f32 %v716_v23, 0.0  ;;  %v733_v21 = vmax.f32 %v717_v22, 0.0  ;;  %v734_v7 = vmax.f32 %v718_v14, 0.0 }
 0x13c   : > { %v735_v24 = vmax.f32 %v719_v35, 0.0  ;;  %v736_v25 = vmax.f32 %v720_v36, 0.0  ;;  %v737_v0 = vmax.f32 %v721_v37, 0.0  ;;  %v738_v1 = vmax.f32 %v722_v38, 0.0 }
 0x13d   : > { %v739_v26 = vmax.f32 %v9871_v39, 0.0  ;;  %v740_v2 = vmax.f32 %v9874_v40, 0.0  ;;  %v741_v27 = vmax.f32 %v9877_v41, 0.0  ;;  %v742_v3 = vmax.f32 %v9880_v42, 0.0 }
 0x13e   : > { %v743_v28 = vmax.f32 %v9883_v43, 0.0  ;;  %v744_v49 = vmax.f32 %v9886_v44, 0.0  ;;  %v745_v4 = vmax.f32 %v9889_v45, 0.0  ;;  %v746_v5 = vmax.f32 %v9892_v46, 0.0 }
 0x13f   : > { %v748_v30 = vsel %vm747_vm0, %v731_v47, -inf  ;;  %v755_v8 = vsel %vm747_vm0, %v732_v20, -inf  ;;  %v762_v31 = vsel %vm747_vm0, %v733_v21, -inf  ;;  %v769_v9 = vsel %vm747_vm0, %v734_v7, -inf }
 0x140   : > { %v749_v32 = vrot.slane %v748_v30, 4  ;;  %v756_v10 = vrot.slane %v755_v8, 4  ;;  %v763_v33 = vrot.slane %v762_v31, 4  ;;  %v770_v15 = vrot.slane %v769_v9, 4 }
 0x141   : > { %v776_v34 = vsel %vm747_vm0, %v735_v24, -inf  ;;  %v783_v16 = vsel %vm747_vm0, %v736_v25, -inf  ;;  %v790_v50 = vsel %vm747_vm0, %v737_v0, -inf  ;;  %v797_v17 = vsel %vm747_vm0, %v738_v1, -inf }
 0x142   : > { %v750_v51 = vmax.f32 %v748_v30, %v749_v32  ;;  %v757_v52 = vmax.f32 %v755_v8, %v756_v10  ;;  %v764_v53 = vmax.f32 %v762_v31, %v763_v33  ;;  %v771_v54 = vmax.f32 %v769_v9, %v770_v15 }
 0x143   : > { %v777_v55 = vrot.slane %v776_v34, 4  ;;  %v784_v56 = vrot.slane %v783_v16, 4  ;;  %v791_v57 = vrot.slane %v790_v50, 4  ;;  %v798_v29 = vrot.slane %v797_v17, 4 }
 0x144   : > { %v751_v58 = vrot.slane %v750_v51, 2  ;;  %v758_v59 = vrot.slane %v757_v52, 2  ;;  %v765_v60 = vrot.slane %v764_v53, 2  ;;  %v772_v61 = vrot.slane %v771_v54, 2 }
 0x145   : > { %v778_v62 = vmax.f32 %v776_v34, %v777_v55  ;;  %v785_v63 = vmax.f32 %v783_v16, %v784_v56  ;;  %v792_v6 = vmax.f32 %v790_v50, %v791_v57  ;;  %v799_v48 = vmax.f32 %v797_v17, %v798_v29 }
 0x146   : > { %v752_v11 = vmax.f32 %v750_v51, %v751_v58  ;;  %v759_v12 = vmax.f32 %v757_v52, %v758_v59  ;;  %v766_v13 = vmax.f32 %v764_v53, %v765_v60  ;;  %v773_v18 = vmax.f32 %v771_v54, %v772_v61 }
 0x147   : > { %v779_v19 = vrot.slane %v778_v62, 2  ;;  %v786_v23 = vrot.slane %v785_v63, 2  ;;  %v793_v22 = vrot.slane %v792_v6, 2  ;;  %v800_v14 = vrot.slane %v799_v48, 2 }
 0x148   : > { %v753_v35 = vrot.slane %v752_v11, 1  ;;  %v760_v36 = vrot.slane %v759_v12, 1  ;;  %v767_v37 = vrot.slane %v766_v13, 1  ;;  %v774_v38 = vrot.slane %v773_v18, 1 }
 0x149   : > { %v780_v39 = vmax.f32 %v778_v62, %v779_v19  ;;  %v787_v40 = vmax.f32 %v785_v63, %v786_v23  ;;  %v794_v41 = vmax.f32 %v792_v6, %v793_v22  ;;  %v801_v42 = vmax.f32 %v799_v48, %v800_v14 }
 0x14a   : > { %v9910_v47 = vmax.f32 %v752_v11, %v753_v35  ;;  %v9912_v20 = vmax.f32 %v759_v12, %v760_v36  ;;  %v9914_v21 = vmax.f32 %v766_v13, %v767_v37  ;;  %v9916_v7 = vmax.f32 %v773_v18, %v774_v38 }
 0x14b   : > { %v781_v24 = vrot.slane %v780_v39, 1  ;;  %v788_v25 = vrot.slane %v787_v40, 1  ;;  %v795_v0 = vrot.slane %v794_v41, 1  ;;  %v802_v1 = vrot.slane %v801_v42, 1 }
 0x14c   : > { %v804_v30 = vsel %vm747_vm0, %v739_v26, -inf  ;;  %v811_v8 = vsel %vm747_vm0, %v740_v2, -inf  ;;  %v818_v31 = vsel %vm747_vm0, %v741_v27, -inf  ;;  %v825_v9 = vsel %vm747_vm0, %v742_v3, -inf }
 0x14d   : > { %v9922_v32 = vmax.f32 %v780_v39, %v781_v24  ;;  %v9924_v10 = vmax.f32 %v787_v40, %v788_v25  ;;  %v9926_v33 = vmax.f32 %v794_v41, %v795_v0  ;;  %v9928_v15 = vmax.f32 %v801_v42, %v802_v1 }
 0x14e   : > { %v805_v34 = vrot.slane %v804_v30, 4  ;;  %v812_v16 = vrot.slane %v811_v8, 4  ;;  %v819_v50 = vrot.slane %v818_v31, 4  ;;  %v826_v17 = vrot.slane %v825_v9, 4 }
 0x14f   : > { %v832_v26 = vsel %vm747_vm0, %v743_v28, -inf  ;;  %v839_v2 = vsel %vm747_vm0, %v744_v49, -inf  ;;  %v846_v27 = vsel %vm747_vm0, %v745_v4, -inf  ;;  %v853_v3 = vsel %vm747_vm0, %v746_v5, -inf }
 0x150   : > { %v806_v51 = vmax.f32 %v804_v30, %v805_v34  ;;  %v813_v52 = vmax.f32 %v811_v8, %v812_v16  ;;  %v820_v53 = vmax.f32 %v818_v31, %v819_v50  ;;  %v827_v54 = vmax.f32 %v825_v9, %v826_v17  ;;  %v968_v50 = vld [vmem:[#allocation10] sm:$0xff] }
 0x151   : > { %v833_v55 = vrot.slane %v832_v26, 4  ;;  %v840_v43 = vrot.slane %v839_v2, 4  ;;  %v847_v56 = vrot.slane %v846_v27, 4  ;;  %v854_v28 = vrot.slane %v853_v3, 4 }
 0x152   : > { %v807_v57 = vrot.slane %v806_v51, 2  ;;  %v814_v44 = vrot.slane %v813_v52, 2  ;;  %v821_v29 = vrot.slane %v820_v53, 2  ;;  %v828_v49 = vrot.slane %v827_v54, 2 }
 0x153   : > { %v834_v58 = vmax.f32 %v832_v26, %v833_v55  ;;  %v841_v45 = vmax.f32 %v839_v2, %v840_v43  ;;  %v848_v59 = vmax.f32 %v846_v27, %v847_v56  ;;  %v855_v4 = vmax.f32 %v853_v3, %v854_v28 }
 0x154   : > { %v808_v60 = vmax.f32 %v806_v51, %v807_v57  ;;  %v815_v46 = vmax.f32 %v813_v52, %v814_v44  ;;  %v822_v61 = vmax.f32 %v820_v53, %v821_v29  ;;  %v829_v5 = vmax.f32 %v827_v54, %v828_v49  ;;  %v9985_v44 = vld [vmem:[%s12204_s16 + $0x10] sm:$0x1f]  ;;  %v9990_v29 = vld [vmem:[%s12204_s16 + $0x18] sm:$0x1f] }
 0x155   : > { %v835_v62 = vrot.slane %v834_v58, 2  ;;  %v842_v63 = vrot.slane %v841_v45, 2  ;;  %v849_v6 = vrot.slane %v848_v59, 2  ;;  %v856_v48 = vrot.slane %v855_v4, 2 }
 0x156   : > { %v809_v11 = vrot.slane %v808_v60, 1  ;;  %v816_v12 = vrot.slane %v815_v46, 1  ;;  %v823_v13 = vrot.slane %v822_v61, 1  ;;  %v830_v18 = vrot.slane %v829_v5, 1 }
 0x157   : > { %v836_v19 = vmax.f32 %v834_v58, %v835_v62  ;;  %v843_v23 = vmax.f32 %v841_v45, %v842_v63  ;;  %v850_v22 = vmax.f32 %v848_v59, %v849_v6  ;;  %v857_v14 = vmax.f32 %v855_v4, %v856_v48  ;;  %v9995_v45 = vld [vmem:[%s12204_s16 + $0x20] sm:$0x1f]  ;;  %v10000_v59 = vld [vmem:[%s12204_s16 + $0x28] sm:$0x1f]  ;;  %v10005_v4 = vld [vmem:[%s12204_s16 + $0x30] sm:$0x1f] }
 0x158   : > { %v810_v35 = vmax.f32 %v808_v60, %v809_v11  ;;  %v817_v36 = vmax.f32 %v815_v46, %v816_v12  ;;  %v824_v37 = vmax.f32 %v822_v61, %v823_v13  ;;  %v831_v38 = vmax.f32 %v829_v5, %v830_v18  ;;  %v10016_v62 = vld [vmem:[%s12204_s16 + $0x38] sm:$0x1f]  ;;  %v10021_v63 = vld [vmem:[%s12204_s16 + $0x40] sm:$0x1f]  ;;  %v10026_v6 = vld [vmem:[%s12204_s16 + $0x48] sm:$0x1f] }
 0x159   : > { %v837_v39 = vrot.slane %v836_v19, 1  ;;  %v844_v40 = vrot.slane %v843_v23, 1  ;;  %v851_v41 = vrot.slane %v850_v22, 1  ;;  %v858_v42 = vrot.slane %v857_v14, 1  ;;  %v10037_v12 = vld [vmem:[%s12204_s16 + $0x50] sm:$0x1f] }
 0x15a   : > { %v876_v24 = vcombine.low %v9910_v47, %v9912_v20  ;;  %v877_v25 = vcombine.low %v9914_v21, %v9916_v7  ;;  %v9292_v0 = vmov 1983009808   ;;  %v12201_v30 = vlaneseq  ;;  %v969_v21 = vld [vmem:[#allocation10 + $0x8] sm:$0xff]  ;;  %v10042_v13 = vld [vmem:[%s12204_s16 + $0x58] sm:$0x1f] }
 0x15b   : > { %v879_v1 = vunpack.c.l.s4 %v9292_v0  ;;  %v838_v31 = vmax.f32 %v836_v19, %v837_v39  ;;  %v845_v9 = vmax.f32 %v843_v23, %v844_v40  ;;  %v852_v34 = vmax.f32 %v850_v22, %v851_v41  ;;  %v10047_v18 = vld [vmem:[%s12204_s16 + $0x60] sm:$0x1f]  ;;  %v10080_v41 = vld [vmem:[%s12204_s16 + $0x78] sm:$0x1f] }
 0x15c   : > { %v882_v8 = vshrl.u32 %v12201_v30, 7  ;;  %v859_v16 = vmax.f32 %v857_v14, %v858_v42  ;;  %v893_v26 = vcombine.low %v9922_v32, %v9924_v10  ;;  %v894_v47 = vcombine.low %v9926_v33, %v9928_v15  ;;  %v9960_v32 = vld [vmem:[%s12203_s20] sm:$0x1f]  ;;  %v9965_v10 = vld [vmem:[%s12204_s16 + $0x8] sm:$0x1f] }
 0x15d   : > { %v880_v17 = vunpack.c.0.s8 %v879_v1  ;;  %v910_v20 = vcombine.low %v810_v35, %v817_v36  ;;  %v911_v7 = vcombine.low %v824_v37, %v831_v38  ;;  %v927_v2 = vcombine.low %v838_v31, %v845_v9  ;;  %v10064_v37 = vld [vmem:[%s12204_s16 + $0x68] sm:$0x1f]  ;;  %v10069_v38 = vld [vmem:[%s12204_s16 + $0x70] sm:$0x1f] }
 0x15e   : > { %v928_v27 = vcombine.low %v852_v34, %v859_v16  ;;  %8153 = vtanh.f32 %v968_v50  ;;  %v995_v33 = vstv %s9942_s17  ;;  %12205 = vst [vmem:[#allocation35_spill] sm:$0xff] %v10064_v37  ;;  %12206 = vst [vmem:[#allocation36_spill] sm:$0xff] %v10069_v38  ;;  %v1012_v0 = vstv %s9953_s14  ;;  %s10114_s14 = sld [smem:[#allocation6 + $0x6]] }
 0x15f   : > { %v9955_v3 = vsub.s32 %v880_v17, %v882_v8  ;;  %8155 = vtanh.f32 %v969_v21  ;;  %v9969_v15 = vmul.f32 %v995_v33, %v9960_v32  ;;  %v9972_v51 = vmul.f32 %v995_v33, %v9965_v10 }
 0x160   : > { %v10008_v60 = vmul.f32 %v995_v33, %v9985_v44  ;;  %v10011_v46 = vmul.f32 %v995_v33, %v9990_v29  ;;  %v10029_v48 = vmul.f32 %v995_v33, %v9995_v45  ;;  %v10032_v11 = vmul.f32 %v995_v33, %v10000_v59 }
 0x161   : > { %12202 = vst [vmem:[#allocation34_spill] sm:$0xff] %v9955_v3  ;;  %v884_v52 = vrot.slane %v876_v24, %v9955_v3  ;;  %v891_v53 = vrot.slane %v877_v25, %v9955_v3  ;;  %v901_v54 = vrot.slane %v893_v26, %v9955_v3  ;;  %v908_v55 = vrot.slane %v894_v47, %v9955_v3 }
 0x162   : > { %v918_v43 = vrot.slane %v910_v20, %v9955_v3  ;;  %v925_v56 = vrot.slane %v911_v7, %v9955_v3  ;;  %v935_v28 = vrot.slane %v927_v2, %v9955_v3  ;;  %v942_v57 = vrot.slane %v928_v27, %v9955_v3 }
 0x163   : > { %v892_v49 = vcombine.low %v884_v52, %v891_v53  ;;  %v909_v58 = vcombine.low %v901_v54, %v908_v55  ;;  %v10050_v19 = vmul.f32 %v995_v33, %v10005_v4  ;;  %v10053_v23 = vmul.f32 %v995_v33, %v10016_v62 }
 0x164   : > { %v926_v61 = vcombine.low %v918_v43, %v925_v56  ;;  %v943_v5 = vcombine.low %v935_v28, %v942_v57  ;;  %v10056_v22 = vmul.f32 %v995_v33, %v10021_v63  ;;  %v10059_v14 = vmul.f32 %v995_v33, %v10026_v6 }
 0x165   : > { %v10072_v39 = vmul.f32 %v995_v33, %v10037_v12  ;;  %v10075_v40 = vmul.f32 %v995_v33, %v10042_v13  ;;  %v10083_v42 = vmul.f32 %v995_v33, %v10047_v18  ;;  %v10086_v24 = vmul.f32 %v995_v33, %v10064_v37 }
 0x166   : > { %v948_v35 = vrot.slane %v926_v61, 7  ;;  %v959_v36 = vrot.slane %v943_v5, 7  ;;  %v10089_v25 = vmul.f32 %v995_v33, %v10069_v38  ;;  %v10095_v31 = vmul.f32 %v995_v33, %v10080_v41 }
 0x167   : > { %v1013_v9 = vmul.f32 %v1012_v0, %v9960_v32  ;;  %v1014_v17 = vmul.f32 %v1012_v0, %v9965_v10  ;;  %v1015_v26 = vmul.f32 %v1012_v0, %v9985_v44  ;;  %v1016_v7 = vmul.f32 %v1012_v0, %v9990_v29 }
 0x168   : > { %v950_v1 = vsel %vm949_vm1, %v948_v35, %v892_v49  ;;  %v960_v8 = vsel %vm949_vm1, %v959_v36, %v909_v58  ;;  %v8154_v34 = vpop.eup %8153  ;;  %v1017_v2 = vmul.f32 %v1012_v0, %v9995_v45  ;;  %v1018_v52 = vmul.f32 %v1012_v0, %v10000_v59 }
 0x169   : > { %v952_v16 = vsel %vm951_vm2, %v948_v35, %v950_v1  ;;  %v961_v50 = vsel %vm951_vm2, %v959_v36, %v960_v8  ;;  %v8156_v47 = vpop.eup %8155  ;;  %973 = vst [vmem:[#allocation2 + $0x10] sm:$0xff] %v8154_v34  ;;  %v1019_v53 = vmul.f32 %v1012_v0, %v10005_v4  ;;  %v1020_v54 = vmul.f32 %v1012_v0, %v10016_v62 }
 0x16a   : > { %v954_v20 = vsel %vm953_vm3, %v948_v35, %v952_v16  ;;  %v962_v21 = vsel %vm953_vm3, %v959_v36, %v961_v50  ;;  %974 = vst [vmem:[#allocation2 + $0x18] sm:$0xff] %v8156_v47  ;;  %v1021_v55 = vmul.f32 %v1012_v0, %v10021_v63  ;;  %v1022_v43 = vmul.f32 %v1012_v0, %v10026_v6 }
 0x16b   : > { %v956_v27 = vsel %vm955_vm4, %v948_v35, %v954_v20  ;;  %v963_v33 = vsel %vm955_vm4, %v959_v36, %v962_v21  ;;  %v1023_v56 = vmul.f32 %v1012_v0, %v10037_v12  ;;  %v1024_v28 = vmul.f32 %v1012_v0, %v10042_v13 }
 0x16c   : > { %966 = vst [vmem:[#allocation2] sm:$0xff] %v956_v27  ;;  %967 = vst [vmem:[#allocation2 + $0x8] sm:$0xff] %v963_v33  ;;  %v1025_v57 = vmul.f32 %v1012_v0, %v10047_v18  ;;  %v1026_v49 = vmul.f32 %v1012_v0, %v10064_v37  ;;  %v1027_v58 = vmul.f32 %v1012_v0, %v10069_v38  ;;  %v1045_v5 = vrot.slane %v1013_v9, 1 }
 0x16d   : > { %v1028_v61 = vmul.f32 %v1012_v0, %v10080_v41  ;;  %v1046_v35 = vrot.slane %v1014_v17, 1  ;;  %v1047_v36 = vrot.slane %v1015_v26, 1  ;;  %v1048_v1 = vrot.slane %v1016_v7, 1 }
 0x16e   : > { %v1049_v8 = vrot.slane %v1017_v2, 1  ;;  %v1050_v34 = vrot.slane %v1018_v52, 1  ;;  %v1051_v16 = vrot.slane %v1019_v53, 1  ;;  %v1052_v50 = vrot.slane %v1020_v54, 1  ;;  %v1423_v52 = vld [vmem:[#allocation11] sm:$0xff] }
 0x16f   : > { %v1053_v47 = vrot.slane %v1021_v55, 1  ;;  %v1054_v20 = vrot.slane %v1022_v43, 1  ;;  %v1055_v21 = vrot.slane %v1023_v56, 1  ;;  %v1056_v27 = vrot.slane %v1024_v28, 1 }
 0x170   : > { %v1057_v33 = vrot.slane %v1025_v57, 1  ;;  %v1058_v30 = vrot.slane %v1026_v49, 1  ;;  %v1059_v3 = vrot.slane %v1027_v58, 1  ;;  %v1060_v38 = vrot.slane %v1028_v61, 1 }
 0x171   : > { %v1077_v37 = vadd.f32 %v1045_v5, %v9969_v15  ;;  %v1078_v0 = vadd.f32 %v1046_v35, %v9972_v51  ;;  %v1079_v9 = vadd.f32 %v1047_v36, %v10008_v60  ;;  %v1080_v17 = vadd.f32 %v1048_v1, %v10011_v46 }
 0x172   : > { %v1081_v26 = vadd.f32 %v1049_v8, %v10029_v48  ;;  %v1082_v7 = vadd.f32 %v1050_v34, %v10032_v11  ;;  %v1083_v2 = vadd.f32 %v1051_v16, %v10050_v19  ;;  %v1084_v53 = vadd.f32 %v1052_v50, %v10053_v23 }
 0x173   : > { %v1085_v54 = vadd.f32 %v1053_v47, %v10056_v22  ;;  %v1086_v15 = vadd.f32 %v1054_v20, %v10059_v14  ;;  %v1087_v51 = vadd.f32 %v1055_v21, %v10072_v39  ;;  %v1088_v60 = vadd.f32 %v1056_v27, %v10075_v40 }
 0x174   : > { %v1089_v55 = vadd.f32 %v1057_v33, %v10083_v42  ;;  %v1090_v46 = vadd.f32 %v1058_v30, %v10086_v24  ;;  %v1091_v48 = vadd.f32 %v1059_v3, %v10089_v25  ;;  %v1092_v11 = vadd.f32 %v1060_v38, %v10095_v31  ;;  %v12207_v25 = vld [vmem:[#allocation35_spill] sm:$0xff]  ;;  %v12208_v31 = vld [vmem:[#allocation36_spill] sm:$0xff] }
 0x175   : > { %v1093_v19 = vstv %s10114_s14  ;;  %v10141_v43 = vstv %s10120_s7  ;;  %8157 = vtanh.f32 %v1423_v52  ;;  %s10289_s7 = sld [smem:[#allocation6 + $0x9]] }
 0x176   : > { %v1094_v23 = vmul.f32 %v1093_v19, %v9960_v32  ;;  %v1095_v22 = vmul.f32 %v1093_v19, %v9965_v10  ;;  %v1096_v14 = vmul.f32 %v1093_v19, %v9985_v44  ;;  %v1097_v39 = vmul.f32 %v1093_v19, %v9990_v29 }
 0x177   : > { %v1098_v40 = vmul.f32 %v1093_v19, %v9995_v45  ;;  %v1099_v30 = vmul.f32 %v1093_v19, %v10000_v59  ;;  %v1100_v3 = vmul.f32 %v1093_v19, %v10005_v4  ;;  %v1101_v38 = vmul.f32 %v1093_v19, %v10016_v62 }
 0x178   : > { %v1102_v42 = vmul.f32 %v1093_v19, %v10021_v63  ;;  %v1103_v24 = vmul.f32 %v1093_v19, %v10026_v6  ;;  %v1104_v32 = vmul.f32 %v1093_v19, %v10037_v12  ;;  %v1105_v10 = vmul.f32 %v1093_v19, %v10042_v13 }
 0x179   : > { %v1106_v44 = vmul.f32 %v1093_v19, %v10047_v18  ;;  %v1107_v29 = vmul.f32 %v1093_v19, %v12207_v25  ;;  %v1108_v45 = vmul.f32 %v1093_v19, %v12208_v31  ;;  %v1109_v59 = vmul.f32 %v1093_v19, %v10080_v41 }
 0x17a   : > { %v1126_v56 = vrot.slane %v1094_v23, 2  ;;  %v1127_v4 = vrot.slane %v1095_v22, 2  ;;  %v1128_v28 = vrot.slane %v1096_v14, 2  ;;  %v1129_v62 = vrot.slane %v1097_v39, 2 }
 0x17b   : > { %v1130_v57 = vrot.slane %v1098_v40, 2  ;;  %v1131_v63 = vrot.slane %v1099_v30, 2  ;;  %v1132_v49 = vrot.slane %v1100_v3, 2  ;;  %v1133_v6 = vrot.slane %v1101_v38, 2 }
 0x17c   : > { %v1134_v58 = vrot.slane %v1102_v42, 2  ;;  %v1135_v12 = vrot.slane %v1103_v24, 2  ;;  %v1136_v61 = vrot.slane %v1104_v32, 2  ;;  %v1137_v13 = vrot.slane %v1105_v10, 2 }
 0x17d   : > { %v1138_v5 = vrot.slane %v1106_v44, 2  ;;  %v1139_v18 = vrot.slane %v1107_v29, 2  ;;  %v1140_v35 = vrot.slane %v1108_v45, 2  ;;  %v1141_v36 = vrot.slane %v1109_v59, 2 }
 0x17e   : > { %v1158_v1 = vadd.f32 %v1126_v56, %v1077_v37  ;;  %v1159_v8 = vadd.f32 %v1127_v4, %v1078_v0  ;;  %v1160_v34 = vadd.f32 %v1128_v28, %v1079_v9  ;;  %v1161_v41 = vadd.f32 %v1129_v62, %v1080_v17 }
 0x17f   : > { %v8158_v16 = vpop.eup %8157  ;;  %v1162_v50 = vadd.f32 %v1130_v57, %v1081_v26  ;;  %v1163_v47 = vadd.f32 %v1131_v63, %v1082_v7  ;;  %v1164_v20 = vadd.f32 %v1132_v49, %v1083_v2  ;;  %v1165_v21 = vadd.f32 %v1133_v6, %v1084_v53 }
 0x180   : > { %v1166_v27 = vadd.f32 %v1134_v58, %v1085_v54  ;;  %v1167_v33 = vadd.f32 %v1135_v12, %v1086_v15  ;;  %v1168_v52 = vadd.f32 %v1136_v61, %v1087_v51  ;;  %v1169_v19 = vadd.f32 %v1137_v13, %v1088_v60  ;;  %1428 = vst [vmem:[#allocation2 + $0x30] sm:$0xff] %v8158_v16 }
 0x181   : > { %v1170_v23 = vadd.f32 %v1138_v5, %v1089_v55  ;;  %v1171_v22 = vadd.f32 %v1139_v18, %v1090_v46  ;;  %v1172_v14 = vadd.f32 %v1140_v35, %v1091_v48  ;;  %v1173_v39 = vadd.f32 %v1141_v36, %v1092_v11 }
 0x182   : > { %v1175_v37 = vadd.f32 %v10141_v43, %v1158_v1  ;;  %v1176_v0 = vadd.f32 %v10141_v43, %v1159_v8  ;;  %v1177_v9 = vadd.f32 %v10141_v43, %v1160_v34  ;;  %v1178_v17 = vadd.f32 %v10141_v43, %v1161_v41 }
 0x183   : > { %v1179_v26 = vadd.f32 %v10141_v43, %v1162_v50  ;;  %v1180_v7 = vadd.f32 %v10141_v43, %v1163_v47  ;;  %v1181_v2 = vadd.f32 %v10141_v43, %v1164_v20  ;;  %v1182_v53 = vadd.f32 %v10141_v43, %v1165_v21 }
 0x184   : > { %v10168_v54 = vadd.f32 %v10141_v43, %v1166_v27  ;;  %v10171_v15 = vadd.f32 %v10141_v43, %v1167_v33  ;;  %v10174_v51 = vadd.f32 %v10141_v43, %v1168_v52  ;;  %v10177_v60 = vadd.f32 %v10141_v43, %v1169_v19 }
 0x185   : > { %v10180_v55 = vadd.f32 %v10141_v43, %v1170_v23  ;;  %v10183_v46 = vadd.f32 %v10141_v43, %v1171_v22  ;;  %v10186_v48 = vadd.f32 %v10141_v43, %v1172_v14  ;;  %v10189_v11 = vadd.f32 %v10141_v43, %v1173_v39 }
 0x186   : > { %v1191_v40 = vmax.f32 %v1175_v37, 0.0  ;;  %v1192_v30 = vmax.f32 %v1176_v0, 0.0  ;;  %v1193_v3 = vmax.f32 %v1177_v9, 0.0  ;;  %v1194_v38 = vmax.f32 %v1178_v17, 0.0 }
 0x187   : > { %v1195_v42 = vmax.f32 %v1179_v26, 0.0  ;;  %v1196_v24 = vmax.f32 %v1180_v7, 0.0  ;;  %v1197_v32 = vmax.f32 %v1181_v2, 0.0  ;;  %v1198_v10 = vmax.f32 %v1182_v53, 0.0 }
 0x188   : > { %v1199_v44 = vmax.f32 %v10168_v54, 0.0  ;;  %v1200_v25 = vmax.f32 %v10171_v15, 0.0  ;;  %v1201_v29 = vmax.f32 %v10174_v51, 0.0  ;;  %v1202_v31 = vmax.f32 %v10177_v60, 0.0 }
 0x189   : > { %v1203_v45 = vmax.f32 %v10180_v55, 0.0  ;;  %v1204_v43 = vmax.f32 %v10183_v46, 0.0  ;;  %v1205_v59 = vmax.f32 %v10186_v48, 0.0  ;;  %v1206_v56 = vmax.f32 %v10189_v11, 0.0 }
 0x18a   : > { %v1208_v4 = vsel %vm1207_vm5, %v1191_v40, -inf  ;;  %v1215_v28 = vsel %vm1207_vm5, %v1192_v30, -inf  ;;  %v1222_v62 = vsel %vm1207_vm5, %v1193_v3, -inf  ;;  %v1229_v57 = vsel %vm1207_vm5, %v1194_v38, -inf }
 0x18b   : > { %v1209_v63 = vrot.slane %v1208_v4, 4  ;;  %v1216_v49 = vrot.slane %v1215_v28, 4  ;;  %v1223_v6 = vrot.slane %v1222_v62, 4  ;;  %v1230_v58 = vrot.slane %v1229_v57, 4 }
 0x18c   : > { %v1236_v12 = vsel %vm1207_vm5, %v1195_v42, -inf  ;;  %v1243_v61 = vsel %vm1207_vm5, %v1196_v24, -inf  ;;  %v1250_v13 = vsel %vm1207_vm5, %v1197_v32, -inf  ;;  %v1257_v5 = vsel %vm1207_vm5, %v1198_v10, -inf }
 0x18d   : > { %v1210_v18 = vmax.f32 %v1208_v4, %v1209_v63  ;;  %v1217_v35 = vmax.f32 %v1215_v28, %v1216_v49  ;;  %v1224_v36 = vmax.f32 %v1222_v62, %v1223_v6  ;;  %v1231_v1 = vmax.f32 %v1229_v57, %v1230_v58 }
 0x18e   : > { %v1237_v8 = vrot.slane %v1236_v12, 4  ;;  %v1244_v34 = vrot.slane %v1243_v61, 4  ;;  %v1251_v41 = vrot.slane %v1250_v13, 4  ;;  %v1258_v16 = vrot.slane %v1257_v5, 4 }
 0x18f   : > { %v1211_v50 = vrot.slane %v1210_v18, 2  ;;  %v1218_v47 = vrot.slane %v1217_v35, 2  ;;  %v1225_v20 = vrot.slane %v1224_v36, 2  ;;  %v1232_v21 = vrot.slane %v1231_v1, 2 }
 0x190   : > { %v1238_v27 = vmax.f32 %v1236_v12, %v1237_v8  ;;  %v1245_v33 = vmax.f32 %v1243_v61, %v1244_v34  ;;  %v1252_v52 = vmax.f32 %v1250_v13, %v1251_v41  ;;  %v1259_v19 = vmax.f32 %v1257_v5, %v1258_v16 }
 0x191   : > { %v1212_v23 = vmax.f32 %v1210_v18, %v1211_v50  ;;  %v1219_v22 = vmax.f32 %v1217_v35, %v1218_v47  ;;  %v1226_v14 = vmax.f32 %v1224_v36, %v1225_v20  ;;  %v1233_v39 = vmax.f32 %v1231_v1, %v1232_v21 }
 0x192   : > { %v1239_v37 = vrot.slane %v1238_v27, 2  ;;  %v1246_v0 = vrot.slane %v1245_v33, 2  ;;  %v1253_v9 = vrot.slane %v1252_v52, 2  ;;  %v1260_v17 = vrot.slane %v1259_v19, 2 }
 0x193   : > { %v1213_v26 = vrot.slane %v1212_v23, 1  ;;  %v1220_v7 = vrot.slane %v1219_v22, 1  ;;  %v1227_v2 = vrot.slane %v1226_v14, 1  ;;  %v1234_v53 = vrot.slane %v1233_v39, 1 }
 0x194   : > { %v1240_v54 = vmax.f32 %v1238_v27, %v1239_v37  ;;  %v1247_v15 = vmax.f32 %v1245_v33, %v1246_v0  ;;  %v1254_v51 = vmax.f32 %v1252_v52, %v1253_v9  ;;  %v1261_v60 = vmax.f32 %v1259_v19, %v1260_v17 }
 0x195   : > { %v10207_v40 = vmax.f32 %v1212_v23, %v1213_v26  ;;  %v10209_v30 = vmax.f32 %v1219_v22, %v1220_v7  ;;  %v10211_v3 = vmax.f32 %v1226_v14, %v1227_v2  ;;  %v10213_v38 = vmax.f32 %v1233_v39, %v1234_v53 }
 0x196   : > { %v1241_v42 = vrot.slane %v1240_v54, 1  ;;  %v1248_v24 = vrot.slane %v1247_v15, 1  ;;  %v1255_v32 = vrot.slane %v1254_v51, 1  ;;  %v1262_v10 = vrot.slane %v1261_v60, 1 }
 0x197   : > { %v1264_v4 = vsel %vm1207_vm5, %v1199_v44, -inf  ;;  %v1271_v28 = vsel %vm1207_vm5, %v1200_v25, -inf  ;;  %v1278_v62 = vsel %vm1207_vm5, %v1201_v29, -inf  ;;  %v1285_v57 = vsel %vm1207_vm5, %v1202_v31, -inf }
 0x198   : > { %v10219_v63 = vmax.f32 %v1240_v54, %v1241_v42  ;;  %v10221_v49 = vmax.f32 %v1247_v15, %v1248_v24  ;;  %v10223_v6 = vmax.f32 %v1254_v51, %v1255_v32  ;;  %v10225_v58 = vmax.f32 %v1261_v60, %v1262_v10 }
 0x199   : > { %v1265_v12 = vrot.slane %v1264_v4, 4  ;;  %v1272_v61 = vrot.slane %v1271_v28, 4  ;;  %v1279_v13 = vrot.slane %v1278_v62, 4  ;;  %v1286_v5 = vrot.slane %v1285_v57, 4 }
 0x19a   : > { %v1292_v44 = vsel %vm1207_vm5, %v1203_v45, -inf  ;;  %v1299_v25 = vsel %vm1207_vm5, %v1204_v43, -inf  ;;  %v1306_v29 = vsel %vm1207_vm5, %v1205_v59, -inf  ;;  %v1313_v31 = vsel %vm1207_vm5, %v1206_v56, -inf }
 0x19b   : > { %v1266_v18 = vmax.f32 %v1264_v4, %v1265_v12  ;;  %v1273_v35 = vmax.f32 %v1271_v28, %v1272_v61  ;;  %v1280_v36 = vmax.f32 %v1278_v62, %v1279_v13  ;;  %v1287_v1 = vmax.f32 %v1285_v57, %v1286_v5  ;;  %v1424_v12 = vld [vmem:[#allocation11 + $0x8] sm:$0xff]  ;;  %v12209_v61 = vld [vmem:[#allocation34_spill] sm:$0xff] }
 0x19c   : > { %v1293_v8 = vrot.slane %v1292_v44, 4  ;;  %v1300_v55 = vrot.slane %v1299_v25, 4  ;;  %v1307_v34 = vrot.slane %v1306_v29, 4  ;;  %v1314_v45 = vrot.slane %v1313_v31, 4 }
 0x19d   : > { %v1267_v41 = vrot.slane %v1266_v18, 2  ;;  %v1274_v46 = vrot.slane %v1273_v35, 2  ;;  %v1281_v16 = vrot.slane %v1280_v36, 2  ;;  %v1288_v43 = vrot.slane %v1287_v1, 2 }
 0x19e   : > { %v1294_v50 = vmax.f32 %v1292_v44, %v1293_v8  ;;  %v1301_v48 = vmax.f32 %v1299_v25, %v1300_v55  ;;  %v1308_v47 = vmax.f32 %v1306_v29, %v1307_v34  ;;  %v1315_v59 = vmax.f32 %v1313_v31, %v1314_v45  ;;  %v10263_v31 = vld [vmem:[%s12210_s28] sm:$0xff]  ;;  %v10278_v8 = vld [vmem:[%s12210_s28 + $0x18] sm:$0xff] }
 0x19f   : > { %v1268_v20 = vmax.f32 %v1266_v18, %v1267_v41  ;;  %v1275_v11 = vmax.f32 %v1273_v35, %v1274_v46  ;;  %v1282_v21 = vmax.f32 %v1280_v36, %v1281_v16  ;;  %v1289_v56 = vmax.f32 %v1287_v1, %v1288_v43  ;;  %12211 = vst [vmem:[#allocation35_spill] sm:$0xff] %v10263_v31  ;;  %v10268_v18 = vld [vmem:[%s12210_s28 + $0x8] sm:$0xff]  ;;  %v10273_v1 = vld [vmem:[%s12210_s28 + $0x10] sm:$0xff]  ;;  %v10283_v55 = vld [vmem:[%s12210_s28 + $0x20] sm:$0xff] }
 0x1a0   : > { %v1295_v27 = vrot.slane %v1294_v50, 2  ;;  %v1302_v33 = vrot.slane %v1301_v48, 2  ;;  %v1309_v52 = vrot.slane %v1308_v47, 2  ;;  %v1316_v19 = vrot.slane %v1315_v59, 2  ;;  %12212 = vst [vmem:[#allocation36_spill] sm:$0xff] %v10268_v18  ;;  %12213 = vst [vmem:[#allocation37_spill] sm:$0xff] %v10273_v1 }
 0x1a1   : > { %v1269_v23 = vrot.slane %v1268_v20, 1  ;;  %v1276_v22 = vrot.slane %v1275_v11, 1  ;;  %v1283_v14 = vrot.slane %v1282_v21, 1  ;;  %v1290_v39 = vrot.slane %v1289_v56, 1  ;;  %12214 = vst [vmem:[#allocation38_spill] sm:$0xff] %v10278_v8  ;;  %12215 = vst [vmem:[#allocation39_spill] sm:$0xff] %v10283_v55 }
 0x1a2   : > { %v1296_v37 = vmax.f32 %v1294_v50, %v1295_v27  ;;  %v1303_v0 = vmax.f32 %v1301_v48, %v1302_v33  ;;  %v1310_v9 = vmax.f32 %v1308_v47, %v1309_v52  ;;  %v1317_v17 = vmax.f32 %v1315_v59, %v1316_v19  ;;  %v10294_v46 = vld [vmem:[%s12210_s28 + $0x28] sm:$0xff]  ;;  %v10299_v16 = vld [vmem:[%s12210_s28 + $0x30] sm:$0xff]  ;;  %v10304_v43 = vld [vmem:[%s12210_s28 + $0x38] sm:$0xff] }
 0x1a3   : > { %v1270_v26 = vmax.f32 %v1268_v20, %v1269_v23  ;;  %v1277_v7 = vmax.f32 %v1275_v11, %v1276_v22  ;;  %v1284_v2 = vmax.f32 %v1282_v21, %v1283_v14  ;;  %v1291_v53 = vmax.f32 %v1289_v56, %v1290_v39  ;;  %12216 = vst [vmem:[#allocation40_spill] sm:$0xff] %v10294_v46  ;;  %v10317_v47 = vld [vmem:[%s12210_s28 + $0x40] sm:$0x7]  ;;  %v10322_v59 = vld [vmem:[%s12210_s28 + $0x48] sm:$0x7] }
 0x1a4   : > { %v1297_v54 = vrot.slane %v1296_v37, 1  ;;  %v1304_v15 = vrot.slane %v1303_v0, 1  ;;  %v1311_v51 = vrot.slane %v1310_v9, 1  ;;  %v1318_v60 = vrot.slane %v1317_v17, 1  ;;  %12217 = vst [vmem:[#allocation41_spill] sm:$0xff] %v10299_v16  ;;  %12218 = vst [vmem:[#allocation42_spill] sm:$0xff] %v10304_v43 }
 0x1a5   : > { %v1336_v42 = vcombine.low %v10207_v40, %v10209_v30  ;;  %v1337_v24 = vcombine.low %v10211_v3, %v10213_v38  ;;  %v1353_v32 = vcombine.low %v10219_v63, %v10221_v49  ;;  %v1354_v10 = vcombine.low %v10223_v6, %v10225_v58  ;;  %12219 = vst [vmem:[#allocation43_spill] sm:$0xff] %v10317_v47  ;;  %v10327_v20 = vld [vmem:[%s12210_s28 + $0x50] sm:$0x7]  ;;  %v10348_v19 = vld [vmem:[%s12210_s28 + $0x58] sm:$0x7] }
 0x1a6   : > { %v1298_v4 = vmax.f32 %v1296_v37, %v1297_v54  ;;  %v1305_v28 = vmax.f32 %v1303_v0, %v1304_v15  ;;  %v1312_v62 = vmax.f32 %v1310_v9, %v1311_v51  ;;  %v1319_v57 = vmax.f32 %v1317_v17, %v1318_v60  ;;  %12220 = vst [vmem:[#allocation44_spill] sm:$0xff] %v10322_v59  ;;  %v10353_v23 = vld [vmem:[%s12210_s28 + $0x60] sm:$0x7]  ;;  %v10368_v39 = vld [vmem:[%s12210_s28 + $0x68] sm:$0x7] }
 0x1a7   : > { %v1344_v13 = vrot.slane %v1336_v42, %v12209_v61  ;;  %v1351_v5 = vrot.slane %v1337_v24, %v12209_v61  ;;  %v1361_v40 = vrot.slane %v1353_v32, %v12209_v61  ;;  %v1368_v30 = vrot.slane %v1354_v10, %v12209_v61  ;;  %12221 = vst [vmem:[#allocation45_spill] sm:$0xff] %v10327_v20  ;;  %v10373_v37 = vld [vmem:[%s12210_s28 + $0x70] sm:$0x7]  ;;  %v10401_v54 = vld [vmem:[%s12210_s28 + $0x80] sm:$0xff]  ;;  %v10416_v24 = vld [vmem:[%s12210_s28 + $0x88] sm:$0xff] }
 0x1a8   : > { %v1370_v3 = vcombine.low %v1270_v26, %v1277_v7  ;;  %v1371_v38 = vcombine.low %v1284_v2, %v1291_v53  ;;  %v1387_v63 = vcombine.low %v1298_v4, %v1305_v28  ;;  %v1388_v49 = vcombine.low %v1312_v62, %v1319_v57  ;;  %12222 = vst [vmem:[#allocation46_spill] sm:$0xff] %v10348_v19  ;;  %v10396_v53 = vld [vmem:[%s12210_s28 + $0x78] sm:$0x7]  ;;  %v10421_v32 = vld [vmem:[%s12210_s28 + $0x90] sm:$0xff] }
 0x1a9   : > { %8159 = vtanh.f32 %v1424_v12  ;;  %v10254_v44 = vstv %s10239_s11  ;;  %v1352_v35 = vcombine.low %v1344_v13, %v1351_v5  ;;  %v1369_v36 = vcombine.low %v1361_v40, %v1368_v30  ;;  %12223 = vst [vmem:[#allocation47_spill] sm:$0xff] %v10353_v23  ;;  %12224 = vst [vmem:[#allocation48_spill] sm:$0xff] %v10368_v39  ;;  %v10426_v10 = vld [vmem:[%s12210_s28 + $0x98] sm:$0xff]  ;;  %v10441_v12 = vld [vmem:[%s12210_s28 + $0xa0] sm:$0xff] }
 0x1aa   : > { %v1378_v6 = vrot.slane %v1370_v3, %v12209_v61  ;;  %v1385_v58 = vrot.slane %v1371_v38, %v12209_v61  ;;  %v1395_v25 = vrot.slane %v1387_v63, %v12209_v61  ;;  %v1402_v29 = vrot.slane %v1388_v49, %v12209_v61  ;;  %12225 = vst [vmem:[#allocation49_spill] sm:$0xff] %v10373_v37  ;;  %v10446_v13 = vld [vmem:[%s12210_s28 + $0xa8] sm:$0xff]  ;;  %v10451_v5 = vld [vmem:[%s12210_s28 + $0xb0] sm:$0xff]  ;;  %v10466_v49 = vld [vmem:[%s12210_s28 + $0xb8] sm:$0xff] }
 0x1ab   : > { %v10287_v34 = vmul.f32 %v10254_v44, %v10263_v31  ;;  %v10308_v50 = vmul.f32 %v10254_v44, %v10268_v18  ;;  %v10312_v48 = vmul.f32 %v10254_v44, %v10273_v1  ;;  %v10331_v11 = vmul.f32 %v10254_v44, %v10278_v8  ;;  %12226 = vst [vmem:[#allocation50_spill] sm:$0xff] %v10396_v53 }
 0x1ac   : > { %v1386_v45 = vcombine.low %v1378_v6, %v1385_v58  ;;  %v1403_v41 = vcombine.low %v1395_v25, %v1402_v29  ;;  %v10335_v21 = vmul.f32 %v10254_v44, %v10283_v55  ;;  %v10339_v56 = vmul.f32 %v10254_v44, %v10294_v46  ;;  %12227 = vst [vmem:[#allocation51_spill] sm:$0xff] %v10401_v54  ;;  %v10471_v6 = vld [vmem:[%s12210_s28 + $0xc0] sm:$0x7]  ;;  %v10476_v58 = vld [vmem:[%s12210_s28 + $0xc8] sm:$0x7] }
 0x1ad   : > { %v10343_v27 = vmul.f32 %v10254_v44, %v10299_v16  ;;  %v10357_v22 = vmul.f32 %v10254_v44, %v10304_v43  ;;  %v10361_v14 = vmul.f32 %v10254_v44, %v10317_v47  ;;  %v10377_v0 = vmul.f32 %v10254_v44, %v10322_v59  ;;  %12228 = vst [vmem:[#allocation52_spill] sm:$0xff] %v10416_v24 }
 0x1ae   : > { %v1406_v33 = vrot.slane %v1386_v45, 7  ;;  %v1413_v52 = vrot.slane %v1403_v41, 7  ;;  %v10381_v9 = vmul.f32 %v10254_v44, %v10327_v20  ;;  %v10385_v17 = vmul.f32 %v10254_v44, %v10348_v19  ;;  %12229 = vst [vmem:[#allocation53_spill] sm:$0xff] %v10421_v32  ;;  %12230 = vst [vmem:[#allocation54_spill] sm:$0xff] %v10426_v10  ;;  %v10499_v45 = vld [vmem:[%s12210_s28 + $0xe0] sm:$0x7] }
 0x1af   : > { %v10389_v26 = vmul.f32 %v10254_v44, %v10353_v23  ;;  %v10405_v15 = vmul.f32 %v10254_v44, %v10368_v39  ;;  %v10409_v51 = vmul.f32 %v10254_v44, %v10373_v37  ;;  %v10430_v4 = vmul.f32 %v10254_v44, %v10396_v53  ;;  %12231 = vst [vmem:[#allocation55_spill] sm:$0xff] %v10441_v12 }
 0x1b0   : > { %v1407_v7 = vsel %vm949_vm1, %v1406_v33, %v1352_v35  ;;  %v1414_v2 = vsel %vm949_vm1, %v1413_v52, %v1369_v36  ;;  %v10434_v28 = vmul.f32 %v10254_v44, %v10401_v54  ;;  %12232 = vst [vmem:[#allocation56_spill] sm:$0xff] %v10446_v13  ;;  %12233 = vst [vmem:[#allocation57_spill] sm:$0xff] %v10451_v5  ;;  %v10489_v35 = vld [vmem:[%s12210_s28 + $0xd0] sm:$0x7]  ;;  %v10494_v36 = vld [vmem:[%s12210_s28 + $0xd8] sm:$0x7] }
 0x1b1   : > { %v1408_v60 = vsel %vm951_vm2, %v1406_v33, %v1407_v7  ;;  %v1415_v42 = vsel %vm951_vm2, %v1413_v52, %v1414_v2  ;;  %v10455_v40 = vmul.f32 %v10254_v44, %v10416_v24  ;;  %v10459_v30 = vmul.f32 %v10254_v44, %v10421_v32  ;;  %12234 = vst [vmem:[#allocation58_spill] sm:$0xff] %v10466_v49  ;;  %v10520_v2 = vld [vmem:[%s12210_s28 + $0xe8] sm:$0x7] }
 0x1b2   : > { %v1409_v62 = vsel %vm953_vm3, %v1406_v33, %v1408_v60  ;;  %v1416_v57 = vsel %vm953_vm3, %v1413_v52, %v1415_v42  ;;  %12235 = vst [vmem:[#allocation59_spill] sm:$0xff] %v10471_v6  ;;  %12236 = vst [vmem:[#allocation60_spill] sm:$0xff] %v10476_v58  ;;  %v10480_v25 = vmul.f32 %v10254_v44, %v10426_v10  ;;  %v10525_v60 = vld [vmem:[%s12210_s28 + $0xf0] sm:$0x7]  ;;  %v10530_v42 = vld [vmem:[%s12210_s28 + $0xf8] sm:$0x7] }
 0x1b3   : > { %v8160_v3 = vpop.eup %8159  ;;  %v1410_v38 = vsel %vm955_vm4, %v1406_v33, %v1409_v62  ;;  %v1417_v63 = vsel %vm955_vm4, %v1413_v52, %v1416_v57  ;;  %v10484_v29 = vmul.f32 %v10254_v44, %v10441_v12  ;;  %12239 = vst [vmem:[#allocation63_spill] sm:$0xff] %v10489_v35  ;;  %12240 = vst [vmem:[#allocation64_spill] sm:$0xff] %v10494_v36 }
 0x1b4   : > { %12237 = vst [vmem:[#allocation61_spill] sm:$0xff] %v10480_v25  ;;  %1421 = vst [vmem:[#allocation2 + $0x20] sm:$0xff] %v1410_v38  ;;  %v10503_v41 = vmul.f32 %v10254_v44, %v10446_v13  ;;  %v10507_v33 = vmul.f32 %v10254_v44, %v10451_v5  ;;  %v10511_v52 = vmul.f32 %v10254_v44, %v10466_v49 }
 0x1b5   : > { %12238 = vst [vmem:[#allocation62_spill] sm:$0xff] %v10484_v29  ;;  %1422 = vst [vmem:[#allocation2 + $0x28] sm:$0xff] %v1417_v63  ;;  %v10515_v7 = vmul.f32 %v10254_v44, %v10471_v6  ;;  %v10534_v62 = vmul.f32 %v10254_v44, %v10476_v58  ;;  %v10538_v57 = vmul.f32 %v10254_v44, %v10489_v35 }
 0x1b6   : > { %1429 = vst [vmem:[#allocation2 + $0x38] sm:$0xff] %v8160_v3  ;;  %12241 = vst [vmem:[#allocation65_spill] sm:$0xff] %v10499_v45  ;;  %v10542_v3 = vmul.f32 %v10254_v44, %v10494_v36  ;;  %v10546_v38 = vmul.f32 %v10254_v44, %v10499_v45  ;;  %v10550_v63 = vmul.f32 %v10254_v44, %v10520_v2 }
 0x1b7   : > { %12242 = vst [vmem:[#allocation66_spill] sm:$0xff] %v10503_v41  ;;  %12243 = vst [vmem:[#allocation67_spill] sm:$0xff] %v10507_v33  ;;  %v10554_v61 = vmul.f32 %v10254_v44, %v10525_v60 }
 0x1b8   : > { %12244 = vst [vmem:[#allocation68_spill] sm:$0xff] %v10511_v52  ;;  %12245 = vst [vmem:[#allocation69_spill] sm:$0xff] %v10515_v7 }
 0x1b9   : > { %12246 = vst [vmem:[#allocation70_spill] sm:$0xff] %v10520_v2  ;;  %12247 = vst [vmem:[#allocation71_spill] sm:$0xff] %v10525_v60 }
 0x1ba   : > { %12248 = vst [vmem:[#allocation72_spill] sm:$0xff] %v10530_v42  ;;  %12249 = vst [vmem:[#allocation73_spill] sm:$0xff] %v10534_v62  ;;  %v10558_v62 = vmul.f32 %v10254_v44, %v10530_v42 }
 0x1bb   : > { %12250 = vst [vmem:[#allocation74_spill] sm:$0xff] %v10538_v57  ;;  %12251 = vst [vmem:[#allocation75_spill] sm:$0xff] %v10542_v3  ;;  %v1499_v57 = vstv %s10289_s7  ;;  %s10886_s7 = sld [smem:[#allocation6 + $0xb]] }
 0x1bc   : > { %12252 = vst [vmem:[#allocation76_spill] sm:$0xff] %v10546_v38  ;;  %12253 = vst [vmem:[#allocation77_spill] sm:$0xff] %v10550_v63  ;;  %v1500_v7 = vmul.f32 %v1499_v57, %v10263_v31  ;;  %v1501_v3 = vmul.f32 %v1499_v57, %v10268_v18  ;;  %v1502_v52 = vmul.f32 %v1499_v57, %v10273_v1  ;;  %v10565_v38 = vstv %s10363_s21 }
 0x1bd   : > { %12254 = vst [vmem:[#allocation78_spill] sm:$0xff] %v10554_v61  ;;  %12255 = vst [vmem:[#allocation79_spill] sm:$0xff] %v10558_v62  ;;  %v1503_v33 = vmul.f32 %v1499_v57, %v10278_v8  ;;  %v1504_v63 = vmul.f32 %v1499_v57, %v10283_v55  ;;  %v1505_v41 = vmul.f32 %v1499_v57, %v10294_v46 }
 0x1be   : > { %12256 = vst [vmem:[#allocation80_spill] sm:$0xff] %v10565_v38  ;;  %v1506_v61 = vmul.f32 %v1499_v57, %v10299_v16  ;;  %v1507_v44 = vmul.f32 %v1499_v57, %v10304_v43  ;;  %v10573_v62 = vmul.f32 %v1499_v57, %v10317_v47  ;;  %v10576_v18 = vmul.f32 %v1499_v57, %v10322_v59 }
 0x1bf   : > { %v10579_v1 = vmul.f32 %v1499_v57, %v10327_v20  ;;  %v10582_v8 = vmul.f32 %v1499_v57, %v10348_v19  ;;  %v10585_v55 = vmul.f32 %v1499_v57, %v10353_v23  ;;  %v10588_v16 = vmul.f32 %v1499_v57, %v10368_v39 }
 0x1c0   : > { %v10591_v43 = vmul.f32 %v1499_v57, %v10373_v37  ;;  %v10594_v47 = vmul.f32 %v1499_v57, %v10396_v53  ;;  %v1516_v59 = vmul.f32 %v1499_v57, %v10401_v54  ;;  %v1517_v20 = vmul.f32 %v1499_v57, %v10416_v24 }
 0x1c1   : > { %v1518_v46 = vmul.f32 %v1499_v57, %v10421_v32  ;;  %v1519_v19 = vmul.f32 %v1499_v57, %v10426_v10  ;;  %v1520_v23 = vmul.f32 %v1499_v57, %v10441_v12  ;;  %v1521_v38 = vmul.f32 %v1499_v57, %v10446_v13 }
 0x1c2   : > { %v1522_v39 = vmul.f32 %v1499_v57, %v10451_v5  ;;  %v1523_v37 = vmul.f32 %v1499_v57, %v10466_v49  ;;  %v10605_v31 = vmul.f32 %v1499_v57, %v10471_v6  ;;  %v10608_v53 = vmul.f32 %v1499_v57, %v10476_v58 }
 0x1c3   : > { %v10611_v24 = vmul.f32 %v1499_v57, %v10489_v35  ;;  %v10614_v32 = vmul.f32 %v1499_v57, %v10494_v36  ;;  %v10617_v12 = vmul.f32 %v1499_v57, %v10499_v45  ;;  %v10620_v13 = vmul.f32 %v1499_v57, %v10520_v2 }
 0x1c4   : > { %v10623_v49 = vmul.f32 %v1499_v57, %v10525_v60  ;;  %v1565_v6 = vrot.slane %v1500_v7, 1  ;;  %v1566_v5 = vrot.slane %v10573_v62, 1  ;;  %v1568_v58 = vrot.slane %v1501_v3, 1 }
 0x1c5   : > { %v1569_v10 = vrot.slane %v10576_v18, 1  ;;  %v1571_v35 = vrot.slane %v1502_v52, 1  ;;  %v1572_v54 = vrot.slane %v10579_v1, 1  ;;  %v1574_v36 = vrot.slane %v1503_v33, 1 }
 0x1c6   : > { %v1575_v29 = vrot.slane %v10582_v8, 1  ;;  %v10630_v45 = vmul.f32 %v1499_v57, %v10530_v42  ;;  %v1567_v2 = vsel %vm1564_vm6, %v1565_v6, %v1566_v5  ;;  %v1577_v25 = vrot.slane %v1504_v63, 1 }
 0x1c7   : > { %v1578_v60 = vrot.slane %v10585_v55, 1  ;;  %v1570_v7 = vsel %vm1564_vm6, %v1568_v58, %v1569_v10  ;;  %v1573_v62 = vsel %vm1564_vm6, %v1571_v35, %v1572_v54  ;;  %v1580_v3 = vrot.slane %v1505_v41, 1 }
 0x1c8   : > { %v1581_v18 = vrot.slane %v10588_v16, 1  ;;  %v1576_v1 = vsel %vm1564_vm6, %v1574_v36, %v1575_v29  ;;  %v1583_v33 = vrot.slane %v1506_v61, 1  ;;  %v1584_v8 = vrot.slane %v10591_v43, 1 }
 0x1c9   : > { %v1586_v52 = vrot.slane %v1507_v44, 1  ;;  %v1579_v57 = vsel %vm1564_vm6, %v1577_v25, %v1578_v60  ;;  %v1587_v6 = vrot.slane %v10594_v47, 1  ;;  %v1589_v63 = vrot.slane %v1516_v59, 1 }
 0x1ca   : > { %v1590_v55 = vrot.slane %v10605_v31, 1  ;;  %v1582_v58 = vsel %vm1564_vm6, %v1580_v3, %v1581_v18  ;;  %v1592_v42 = vrot.slane %v1517_v20, 1  ;;  %v1593_v35 = vrot.slane %v10608_v53, 1 }
 0x1cb   : > { %v1595_v41 = vrot.slane %v1518_v46, 1  ;;  %v1585_v16 = vsel %vm1564_vm6, %v1583_v33, %v1584_v8  ;;  %v1588_v61 = vsel %vm1564_vm6, %v1586_v52, %v1587_v6  ;;  %v1596_v43 = vrot.slane %v10611_v24, 1 }
 0x1cc   : > { %v1598_v36 = vrot.slane %v1519_v19, 1  ;;  %v1591_v25 = vsel %vm1564_vm6, %v1589_v63, %v1590_v55  ;;  %v1599_v47 = vrot.slane %v10614_v32, 1  ;;  %v1601_v59 = vrot.slane %v1520_v23, 1 }
 0x1cd   : > { %v1602_v31 = vrot.slane %v10617_v12, 1  ;;  %v1594_v44 = vsel %vm1564_vm6, %v1592_v42, %v1593_v35  ;;  %v1604_v20 = vrot.slane %v1521_v38, 1  ;;  %v1605_v53 = vrot.slane %v10620_v13, 1 }
 0x1ce   : > { %v1607_v46 = vrot.slane %v1522_v39, 1  ;;  %v1597_v3 = vsel %vm1564_vm6, %v1595_v41, %v1596_v43  ;;  %v1600_v33 = vsel %vm1564_vm6, %v1598_v36, %v1599_v47  ;;  %v1608_v24 = vrot.slane %v10623_v49, 1 }
 0x1cf   : > { %v1610_v19 = vrot.slane %v1523_v37, 1  ;;  %v1603_v52 = vsel %vm1564_vm6, %v1601_v59, %v1602_v31  ;;  %v1606_v32 = vsel %vm1564_vm6, %v1604_v20, %v1605_v53  ;;  %v1611_v23 = vrot.slane %v10630_v45, 1 }
 0x1d0   : > { %v10659_v12 = vadd.f32 %v1567_v2, %v10287_v34  ;;  %v1609_v42 = vsel %vm1564_vm6, %v1607_v46, %v1608_v24  ;;  %v10663_v39 = vadd.f32 %v1570_v7, %v10308_v50  ;;  %v10666_v13 = vadd.f32 %v1573_v62, %v10312_v48 }
 0x1d1   : > { %v10669_v49 = vadd.f32 %v1576_v1, %v10331_v11  ;;  %v1612_v37 = vsel %vm1564_vm6, %v1610_v19, %v1611_v23  ;;  %v10673_v38 = vadd.f32 %v1579_v57, %v10335_v21  ;;  %v10676_v45 = vadd.f32 %v1582_v58, %v10339_v56  ;;  %v12277_v58 = vld [vmem:[#allocation77_spill] sm:$0xff] }
 0x1d2   : > { %v10679_v34 = vadd.f32 %v1585_v16, %v10343_v27  ;;  %v10682_v50 = vadd.f32 %v1588_v61, %v10357_v22  ;;  %v10685_v48 = vadd.f32 %v1566_v5, %v10361_v14  ;;  %v10688_v11 = vadd.f32 %v1569_v10, %v10377_v0  ;;  %v12279_v16 = vld [vmem:[#allocation78_spill] sm:$0xff]  ;;  %v12290_v19 = vld [vmem:[#allocation41_spill] sm:$0xff] }
 0x1d3   : > { %v10691_v2 = vadd.f32 %v1572_v54, %v10381_v9  ;;  %v10694_v21 = vadd.f32 %v1575_v29, %v10385_v17  ;;  %v10697_v56 = vadd.f32 %v1578_v60, %v10389_v26  ;;  %v10700_v27 = vadd.f32 %v1581_v18, %v10405_v15  ;;  %v12257_v26 = vld [vmem:[#allocation61_spill] sm:$0xff]  ;;  %v12259_v15 = vld [vmem:[#allocation62_spill] sm:$0xff] }
 0x1d4   : > { %v10703_v22 = vadd.f32 %v1584_v8, %v10409_v51  ;;  %v10706_v14 = vadd.f32 %v1587_v6, %v10430_v4  ;;  %v10709_v0 = vadd.f32 %v1591_v25, %v10434_v28  ;;  %v10712_v9 = vadd.f32 %v1594_v44, %v10455_v40  ;;  %v12261_v51 = vld [vmem:[#allocation66_spill] sm:$0xff]  ;;  %v12263_v4 = vld [vmem:[#allocation67_spill] sm:$0xff]  ;;  %v12265_v28 = vld [vmem:[#allocation68_spill] sm:$0xff] }
 0x1d5   : > { %v10715_v17 = vadd.f32 %v1597_v3, %v10459_v30  ;;  %v10718_v54 = vadd.f32 %v1600_v33, %v12257_v26  ;;  %v10721_v10 = vadd.f32 %v1603_v52, %v12259_v15  ;;  %v10724_v5 = vadd.f32 %v1606_v32, %v12261_v51  ;;  %v12267_v40 = vld [vmem:[#allocation69_spill] sm:$0xff]  ;;  %v12271_v18 = vld [vmem:[#allocation74_spill] sm:$0xff]  ;;  %v12273_v8 = vld [vmem:[#allocation75_spill] sm:$0xff] }
 0x1d6   : > { %v10727_v29 = vadd.f32 %v1609_v42, %v12263_v4  ;;  %v10730_v60 = vadd.f32 %v1612_v37, %v12265_v28  ;;  %v10733_v7 = vadd.f32 %v1590_v55, %v12267_v40  ;;  %v12269_v30 = vld [vmem:[#allocation73_spill] sm:$0xff]  ;;  %v10739_v1 = vadd.f32 %v1596_v43, %v12271_v18  ;;  %v12275_v6 = vld [vmem:[#allocation76_spill] sm:$0xff]  ;;  %v12281_v55 = vld [vmem:[#allocation79_spill] sm:$0xff] }
 0x1d7   : > { %12258 = vst [vmem:[#allocation61_spill] sm:$0xff] %v10718_v54  ;;  %12260 = vst [vmem:[#allocation62_spill] sm:$0xff] %v10721_v10  ;;  %v10736_v62 = vadd.f32 %v1593_v35, %v12269_v30  ;;  %v10742_v57 = vadd.f32 %v1599_v47, %v12273_v8  ;;  %v10745_v63 = vadd.f32 %v1602_v31, %v12275_v6  ;;  %v12283_v35 = vld [vmem:[#allocation35_spill] sm:$0xff]  ;;  %v12284_v25 = vld [vmem:[#allocation80_spill] sm:$0xff] }
 0x1d8   : > { %12262 = vst [vmem:[#allocation66_spill] sm:$0xff] %v10724_v5  ;;  %12264 = vst [vmem:[#allocation67_spill] sm:$0xff] %v10727_v29  ;;  %v10748_v41 = vadd.f32 %v1605_v53, %v12277_v58  ;;  %v10751_v61 = vadd.f32 %v1608_v24, %v12279_v16  ;;  %v10754_v36 = vadd.f32 %v1611_v23, %v12281_v55  ;;  %v12285_v43 = vld [vmem:[#allocation36_spill] sm:$0xff]  ;;  %v12286_v47 = vld [vmem:[#allocation37_spill] sm:$0xff] }
 0x1d9   : > { %12266 = vst [vmem:[#allocation68_spill] sm:$0xff] %v10730_v60  ;;  %12268 = vst [vmem:[#allocation69_spill] sm:$0xff] %v10733_v7  ;;  %v1678_v59 = vmul.f32 %v12284_v25, %v12283_v35  ;;  %v1679_v44 = vmul.f32 %v12284_v25, %v12285_v43  ;;  %v1680_v20 = vmul.f32 %v12284_v25, %v12286_v47  ;;  %v12287_v31 = vld [vmem:[#allocation38_spill] sm:$0xff]  ;;  %v12288_v53 = vld [vmem:[#allocation39_spill] sm:$0xff] }
 0x1da   : > { %12270 = vst [vmem:[#allocation73_spill] sm:$0xff] %v10736_v62  ;;  %12272 = vst [vmem:[#allocation74_spill] sm:$0xff] %v10739_v1  ;;  %v1681_v46 = vmul.f32 %v12284_v25, %v12287_v31  ;;  %v1682_v3 = vmul.f32 %v12284_v25, %v12288_v53  ;;  %v12289_v33 = vld [vmem:[#allocation40_spill] sm:$0xff]  ;;  %v1684_v52 = vmul.f32 %v12284_v25, %v12290_v19  ;;  %v12291_v32 = vld [vmem:[#allocation42_spill] sm:$0xff] }
 0x1db   : > { %12274 = vst [vmem:[#allocation75_spill] sm:$0xff] %v10742_v57  ;;  %12276 = vst [vmem:[#allocation76_spill] sm:$0xff] %v10745_v63  ;;  %v1683_v24 = vmul.f32 %v12284_v25, %v12289_v33  ;;  %v1685_v23 = vmul.f32 %v12284_v25, %v12291_v32  ;;  %v12292_v42 = vld [vmem:[#allocation43_spill] sm:$0xff]  ;;  %v12293_v26 = vld [vmem:[#allocation44_spill] sm:$0xff]  ;;  %v1743_v1 = vrot.slane %v1678_v59, 2  ;;  %v1746_v62 = vrot.slane %v1679_v44, 2 }
 0x1dc   : > { %12278 = vst [vmem:[#allocation77_spill] sm:$0xff] %v10748_v41  ;;  %12280 = vst [vmem:[#allocation78_spill] sm:$0xff] %v10751_v61  ;;  %v10774_v37 = vmul.f32 %v12284_v25, %v12292_v42  ;;  %v10778_v15 = vmul.f32 %v12284_v25, %v12293_v26  ;;  %v12294_v51 = vld [vmem:[#allocation45_spill] sm:$0xff]  ;;  %v12295_v28 = vld [vmem:[#allocation46_spill] sm:$0xff]  ;;  %v1752_v29 = vrot.slane %v1681_v46, 2 }
 0x1dd   : > { %12282 = vst [vmem:[#allocation79_spill] sm:$0xff] %v10754_v36  ;;  %v10782_v4 = vmul.f32 %v12284_v25, %v12294_v51  ;;  %v10786_v40 = vmul.f32 %v12284_v25, %v12295_v28  ;;  %v12296_v30 = vld [vmem:[#allocation47_spill] sm:$0xff]  ;;  %v12297_v8 = vld [vmem:[#allocation48_spill] sm:$0xff]  ;;  %v12298_v58 = vld [vmem:[#allocation49_spill] sm:$0xff]  ;;  %v1764_v54 = vrot.slane %v1685_v23, 2 }
 0x1de   : > { %v10790_v18 = vmul.f32 %v12284_v25, %v12296_v30  ;;  %v10794_v6 = vmul.f32 %v12284_v25, %v12297_v8  ;;  %v10798_v16 = vmul.f32 %v12284_v25, %v12298_v58  ;;  %v12299_v55 = vld [vmem:[#allocation50_spill] sm:$0xff]  ;;  %v12300_v43 = vld [vmem:[#allocation51_spill] sm:$0xff]  ;;  %v12301_v31 = vld [vmem:[#allocation52_spill] sm:$0xff]  ;;  %v1747_v7 = vrot.slane %v10778_v15, 2 }
 0x1df   : > { %v10802_v35 = vmul.f32 %v12284_v25, %v12299_v55  ;;  %v1694_v47 = vmul.f32 %v12284_v25, %v12300_v43  ;;  %v1695_v53 = vmul.f32 %v12284_v25, %v12301_v31  ;;  %v12302_v33 = vld [vmem:[#allocation53_spill] sm:$0xff]  ;;  %v12303_v32 = vld [vmem:[#allocation54_spill] sm:$0xff]  ;;  %v12304_v26 = vld [vmem:[#allocation55_spill] sm:$0xff]  ;;  %v1750_v60 = vrot.slane %v10782_v4, 2 }
 0x1e0   : > { %v1696_v19 = vmul.f32 %v12284_v25, %v12302_v33  ;;  %v1697_v42 = vmul.f32 %v12284_v25, %v12303_v32  ;;  %v1698_v51 = vmul.f32 %v12284_v25, %v12304_v26  ;;  %v12305_v28 = vld [vmem:[#allocation56_spill] sm:$0xff]  ;;  %v12306_v8 = vld [vmem:[#allocation57_spill] sm:$0xff]  ;;  %v12307_v55 = vld [vmem:[#allocation58_spill] sm:$0xff]  ;;  %v1756_v59 = vrot.slane %v10790_v18, 2 }
 0x1e1   : > { %v1699_v30 = vmul.f32 %v12284_v25, %v12305_v28  ;;  %v1700_v58 = vmul.f32 %v12284_v25, %v12306_v8  ;;  %v10820_v43 = vmul.f32 %v12284_v25, %v12307_v55  ;;  %v12308_v31 = vld [vmem:[#allocation59_spill] sm:$0xff]  ;;  %v12309_v33 = vld [vmem:[#allocation60_spill] sm:$0xff]  ;;  %v12312_v8 = vld [vmem:[#allocation65_spill] sm:$0xff]  ;;  %v1758_v15 = vrot.slane %v1683_v24, 2 }
 0x1e2   : > { %v10824_v36 = vmul.f32 %v12284_v25, %v12308_v31  ;;  %v10828_v32 = vmul.f32 %v12284_v25, %v12309_v33  ;;  %v12310_v61 = vld [vmem:[#allocation63_spill] sm:$0xff]  ;;  %v12311_v28 = vld [vmem:[#allocation64_spill] sm:$0xff]  ;;  %v10840_v55 = vmul.f32 %v12284_v25, %v12312_v8  ;;  %v12313_v63 = vld [vmem:[#allocation70_spill] sm:$0xff]  ;;  %v1753_v8 = vrot.slane %v10786_v40, 2 }
 0x1e3   : > { %v10832_v26 = vmul.f32 %v12284_v25, %v12310_v61  ;;  %v10836_v41 = vmul.f32 %v12284_v25, %v12311_v28  ;;  %v10844_v31 = vmul.f32 %v12284_v25, %v12313_v63  ;;  %v12314_v57 = vld [vmem:[#allocation71_spill] sm:$0xff]  ;;  %v1744_v61 = vrot.slane %v10774_v37, 2  ;;  %v12315_v5 = vld [vmem:[#allocation72_spill] sm:$0xff] }
 0x1e4   : > { %v10848_v33 = vmul.f32 %v12284_v25, %v12314_v57  ;;  %v1749_v28 = vrot.slane %v1680_v20, 2  ;;  %v10856_v63 = vmul.f32 %v12284_v25, %v12315_v5  ;;  %v1755_v57 = vrot.slane %v1682_v3, 2 }
 0x1e5   : > { %v1745_v10 = vsel %vm1742_vm7, %v1743_v1, %v1744_v61  ;;  %v1748_v37 = vsel %vm1742_vm7, %v1746_v62, %v1747_v7  ;;  %v1759_v20 = vrot.slane %v10794_v6, 2  ;;  %v1754_v46 = vsel %vm1742_vm7, %v1752_v29, %v1753_v8 }
 0x1e6   : > { %v1751_v44 = vsel %vm1742_vm7, %v1749_v28, %v1750_v60  ;;  %v1761_v4 = vrot.slane %v1684_v52, 2  ;;  %v1762_v40 = vrot.slane %v10798_v16, 2  ;;  %v1757_v5 = vsel %vm1742_vm7, %v1755_v57, %v1756_v59 }
 0x1e7   : > { %v1765_v1 = vrot.slane %v10802_v35, 2  ;;  %v1767_v25 = vrot.slane %v1694_v47, 2  ;;  %v1768_v3 = vrot.slane %v10824_v36, 2  ;;  %v1760_v62 = vsel %vm1742_vm7, %v1758_v15, %v1759_v20 }
 0x1e8   : > { %v1770_v18 = vrot.slane %v1695_v53, 2  ;;  %v1771_v24 = vrot.slane %v10828_v32, 2  ;;  %v1773_v28 = vrot.slane %v1696_v19, 2  ;;  %v1763_v6 = vsel %vm1742_vm7, %v1761_v4, %v1762_v40 }
 0x1e9   : > { %v1766_v29 = vsel %vm1742_vm7, %v1764_v54, %v1765_v1  ;;  %v1774_v52 = vrot.slane %v10832_v26, 2  ;;  %v1776_v23 = vrot.slane %v1697_v42, 2  ;;  %v1769_v16 = vsel %vm1742_vm7, %v1767_v25, %v1768_v3 }
 0x1ea   : > { %v1777_v35 = vrot.slane %v10836_v41, 2  ;;  %v1779_v47 = vrot.slane %v1698_v51, 2  ;;  %v1780_v36 = vrot.slane %v10840_v55, 2  ;;  %v1772_v57 = vsel %vm1742_vm7, %v1770_v18, %v1771_v24 }
 0x1eb   : > { %v1782_v53 = vrot.slane %v1699_v30, 2  ;;  %v1783_v32 = vrot.slane %v10844_v31, 2  ;;  %v1785_v19 = vrot.slane %v1700_v58, 2  ;;  %v1775_v15 = vsel %vm1742_vm7, %v1773_v28, %v1774_v52 }
 0x1ec   : > { %v1778_v54 = vsel %vm1742_vm7, %v1776_v23, %v1777_v35  ;;  %v1786_v26 = vrot.slane %v10848_v33, 2  ;;  %v1788_v42 = vrot.slane %v10820_v43, 2  ;;  %v1781_v4 = vsel %vm1742_vm7, %v1779_v47, %v1780_v36  ;;  %v12328_v23 = vld [vmem:[#allocation79_spill] sm:$0xff] }
 0x1ed   : > { %v1784_v41 = vsel %vm1742_vm7, %v1782_v53, %v1783_v32  ;;  %v1789_v51 = vrot.slane %v10856_v63, 2  ;;  %v1823_v55 = vadd.f32 %v1745_v10, %v10659_v12  ;;  %v1824_v58 = vadd.f32 %v1748_v37, %v10663_v39 }
 0x1ee   : > { %v1787_v30 = vsel %vm1742_vm7, %v1785_v19, %v1786_v26  ;;  %v1825_v31 = vadd.f32 %v1751_v44, %v10666_v13  ;;  %v1826_v33 = vadd.f32 %v1754_v46, %v10669_v49  ;;  %v1827_v25 = vadd.f32 %v1757_v5, %v10673_v38  ;;  %v12325_v5 = vld [vmem:[#allocation76_spill] sm:$0xff] }
 0x1ef   : > { %v1790_v43 = vsel %vm1742_vm7, %v1788_v42, %v1789_v51  ;;  %v1828_v18 = vadd.f32 %v1760_v62, %v10676_v45  ;;  %v1829_v63 = vadd.f32 %v1763_v6, %v10679_v34  ;;  %v1830_v12 = vadd.f32 %v1766_v29, %v10682_v50  ;;  %v12327_v6 = vld [vmem:[#allocation78_spill] sm:$0xff] }
 0x1f0   : > { %v1831_v10 = vadd.f32 %v1744_v61, %v10685_v48  ;;  %v1832_v28 = vadd.f32 %v1747_v7, %v10688_v11  ;;  %v1833_v39 = vadd.f32 %v1750_v60, %v10691_v2  ;;  %v1834_v13 = vadd.f32 %v1753_v8, %v10694_v21  ;;  %v12316_v11 = vld [vmem:[#allocation61_spill] sm:$0xff]  ;;  %v12317_v2 = vld [vmem:[#allocation62_spill] sm:$0xff] }
 0x1f1   : > { %v1835_v49 = vadd.f32 %v1756_v59, %v10697_v56  ;;  %v1836_v37 = vadd.f32 %v1759_v20, %v10700_v27  ;;  %v1837_v38 = vadd.f32 %v1762_v40, %v10703_v22  ;;  %v1838_v45 = vadd.f32 %v1765_v1, %v10706_v14  ;;  %v12318_v21 = vld [vmem:[#allocation66_spill] sm:$0xff]  ;;  %v12319_v56 = vld [vmem:[#allocation67_spill] sm:$0xff]  ;;  %v12320_v27 = vld [vmem:[#allocation68_spill] sm:$0xff] }
 0x1f2   : > { %v1839_v34 = vadd.f32 %v1769_v16, %v10709_v0  ;;  %v1840_v50 = vadd.f32 %v1772_v57, %v10712_v9  ;;  %v1841_v48 = vadd.f32 %v1775_v15, %v10715_v17  ;;  %v1842_v7 = vadd.f32 %v1778_v54, %v12316_v11  ;;  %v12321_v22 = vld [vmem:[#allocation69_spill] sm:$0xff]  ;;  %v12323_v0 = vld [vmem:[#allocation74_spill] sm:$0xff]  ;;  %v12324_v40 = vld [vmem:[#allocation75_spill] sm:$0xff] }
 0x1f3   : > { %v1843_v60 = vadd.f32 %v1781_v4, %v12317_v2  ;;  %v1844_v61 = vadd.f32 %v1784_v41, %v12318_v21  ;;  %v1845_v8 = vadd.f32 %v1787_v30, %v12319_v56  ;;  %v1846_v59 = vadd.f32 %v1790_v43, %v12320_v27  ;;  %v12322_v14 = vld [vmem:[#allocation73_spill] sm:$0xff] }
 0x1f4   : > { %v1847_v44 = vadd.f32 %v1768_v3, %v12321_v22  ;;  %v1848_v20 = vadd.f32 %v1771_v24, %v12322_v14  ;;  %v1849_v46 = vadd.f32 %v1774_v52, %v12323_v0  ;;  %v1850_v9 = vadd.f32 %v1777_v35, %v12324_v40  ;;  %v12326_v1 = vld [vmem:[#allocation77_spill] sm:$0xff] }
 0x1f5   : > { %v1851_v17 = vadd.f32 %v1780_v36, %v12325_v5  ;;  %v1852_v62 = vadd.f32 %v1783_v32, %v12326_v1  ;;  %v1853_v29 = vadd.f32 %v1786_v26, %v12327_v6  ;;  %v1854_v16 = vadd.f32 %v1789_v51, %v12328_v23 }
 0x1f6   : > { %v1855_v47 = vstv %s10886_s7  ;;  %v12329_v57 = vlaneseq  ;;  %v9293_v35 = vmov 0.0  }
 0x1f7   : > { %v10923_v53 = vadd.f32 %v1855_v47, %v1823_v55  ;;  %v10925_v3 = vadd.f32 %v1855_v47, %v1824_v58  ;;  %v10927_v24 = vadd.f32 %v1855_v47, %v1825_v31  ;;  %v10929_v52 = vadd.f32 %v1855_v47, %v1826_v33 }
 0x1f8   : > { %vm2154_vm8 = vcmp.lt.s32.totalorder %v12329_v57, 256  ;;  %v10931_v36 = vadd.f32 %v1855_v47, %v1827_v25  ;;  %v10933_v32 = vadd.f32 %v1855_v47, %v1828_v18  ;;  %v10935_v19 = vadd.f32 %v1855_v47, %v1829_v63 }
 0x1f9   : > { %2156 = vst.msk [vmem:[#allocation5] sm:$0x3] %vm2154_vm8, %v9293_v35  ;;  %v10937_v15 = vadd.f32 %v1855_v47, %v1830_v12  ;;  %v1864_v54 = vadd.f32 %v1855_v47, %v1831_v10  ;;  %v1865_v26 = vadd.f32 %v1855_v47, %v1832_v28  ;;  %v1866_v42 = vadd.f32 %v1855_v47, %v1833_v39 }
 0x1fa   : > { %v1867_v4 = vadd.f32 %v1855_v47, %v1834_v13  ;;  %v1868_v41 = vadd.f32 %v1855_v47, %v1835_v49  ;;  %v1869_v51 = vadd.f32 %v1855_v47, %v1836_v37  ;;  %v1870_v55 = vadd.f32 %v1855_v47, %v1837_v38 }
 0x1fb   : > { %v1871_v30 = vadd.f32 %v1855_v47, %v1838_v45  ;;  %v10939_v58 = vadd.f32 %v1855_v47, %v1839_v34  ;;  %v10941_v31 = vadd.f32 %v1855_v47, %v1840_v50  ;;  %v10943_v33 = vadd.f32 %v1855_v47, %v1841_v48 }
 0x1fc   : > { %v10945_v43 = vadd.f32 %v1855_v47, %v1842_v7  ;;  %v10947_v25 = vadd.f32 %v1855_v47, %v1843_v60  ;;  %v10949_v18 = vadd.f32 %v1855_v47, %v1844_v61  ;;  %v10951_v63 = vadd.f32 %v1855_v47, %v1845_v8 }
 0x1fd   : > { %v10953_v12 = vadd.f32 %v1855_v47, %v1846_v59  ;;  %v10955_v10 = vadd.f32 %v1855_v47, %v1847_v44  ;;  %v10957_v28 = vadd.f32 %v1855_v47, %v1848_v20  ;;  %v10959_v39 = vadd.f32 %v1855_v47, %v1849_v46 }
 0x1fe   : > { %v10961_v13 = vadd.f32 %v1855_v47, %v1850_v9  ;;  %v10963_v49 = vadd.f32 %v1855_v47, %v1851_v17  ;;  %v10965_v37 = vadd.f32 %v1855_v47, %v1852_v62  ;;  %v10967_v38 = vadd.f32 %v1855_v47, %v1853_v29 }
 0x1ff   : > { %v10969_v45 = vadd.f32 %v1855_v47, %v1854_v16  ;;  %v1888_v34 = vmax.f32 %v10923_v53, 0.0  ;;  %v1889_v50 = vmax.f32 %v10925_v3, 0.0  ;;  %v1890_v48 = vmax.f32 %v10927_v24, 0.0 }
 0x200   : > { %v1891_v11 = vmax.f32 %v10929_v52, 0.0  ;;  %v1892_v7 = vmax.f32 %v10931_v36, 0.0  ;;  %v1893_v2 = vmax.f32 %v10933_v32, 0.0  ;;  %v1894_v60 = vmax.f32 %v10935_v19, 0.0 }
 0x201   : > { %v1895_v21 = vmax.f32 %v10937_v15, 0.0  ;;  %v1896_v61 = vmax.f32 %v1864_v54, 0.0  ;;  %v1897_v56 = vmax.f32 %v1865_v26, 0.0  ;;  %v1898_v8 = vmax.f32 %v1866_v42, 0.0 }
 0x202   : > { %v1899_v27 = vmax.f32 %v1867_v4, 0.0  ;;  %v1900_v59 = vmax.f32 %v1868_v41, 0.0  ;;  %v1901_v22 = vmax.f32 %v1869_v51, 0.0  ;;  %v1902_v44 = vmax.f32 %v1870_v55, 0.0 }
 0x203   : > { %v1903_v14 = vmax.f32 %v1871_v30, 0.0  ;;  %v1904_v20 = vmax.f32 %v10939_v58, 0.0  ;;  %v1905_v0 = vmax.f32 %v10941_v31, 0.0  ;;  %v1906_v46 = vmax.f32 %v10943_v33, 0.0 }
 0x204   : > { %v1907_v40 = vmax.f32 %v10945_v43, 0.0  ;;  %v1912_v62 = vmax.f32 %v10955_v10, 0.0  ;;  %v1913_v6 = vmax.f32 %v10957_v28, 0.0  ;;  %v1914_v29 = vmax.f32 %v10959_v39, 0.0 }
 0x205   : > { %v1915_v23 = vmax.f32 %v10961_v13, 0.0  ;;  %v1916_v16 = vmax.f32 %v10963_v49, 0.0  ;;  %v1917_v47 = vmax.f32 %v10965_v37, 0.0  ;;  %v1918_v57 = vmax.f32 %v10967_v38, 0.0 }
 0x206   : > { %v1919_v53 = vmax.f32 %v10969_v45, 0.0  ;;  %v1921_v3 = vsel %vm1920_vm9, %v1896_v61, -inf  ;;  %v1929_v24 = vsel %vm1920_vm9, %v1897_v56, -inf  ;;  %v1937_v52 = vsel %vm1920_vm9, %v1898_v8, -inf }
 0x207   : > { %v1945_v35 = vsel %vm1920_vm9, %v1899_v27, -inf  ;;  %v1922_v36 = vmax.f32 %v1888_v34, %v1921_v3  ;;  %v1930_v32 = vmax.f32 %v1889_v50, %v1929_v24  ;;  %v1938_v19 = vmax.f32 %v1890_v48, %v1937_v52 }
 0x208   : > { %v1946_v15 = vmax.f32 %v1891_v11, %v1945_v35  ;;  %v1953_v54 = vsel %vm1920_vm9, %v1900_v59, -inf  ;;  %v1961_v26 = vsel %vm1920_vm9, %v1901_v22, -inf  ;;  %v1969_v42 = vsel %vm1920_vm9, %v1902_v44, -inf }
 0x209   : > { %v1977_v4 = vsel %vm1920_vm9, %v1903_v14, -inf  ;;  %v1923_v41 = vrot.slane %v1922_v36, 4  ;;  %v1931_v51 = vrot.slane %v1930_v32, 4  ;;  %v1939_v55 = vrot.slane %v1938_v19, 4 }
 0x20a   : > { %v1947_v30 = vrot.slane %v1946_v15, 4  ;;  %v1954_v61 = vmax.f32 %v1892_v7, %v1953_v54  ;;  %v1962_v56 = vmax.f32 %v1893_v2, %v1961_v26  ;;  %v1970_v8 = vmax.f32 %v1894_v60, %v1969_v42 }
 0x20b   : > { %v1978_v27 = vmax.f32 %v1895_v21, %v1977_v4  ;;  %v1924_v34 = vmax.f32 %v1922_v36, %v1923_v41  ;;  %v1932_v50 = vmax.f32 %v1930_v32, %v1931_v51  ;;  %v1940_v48 = vmax.f32 %v1938_v19, %v1939_v55 }
 0x20c   : > { %v1948_v11 = vmax.f32 %v1946_v15, %v1947_v30  ;;  %v1955_v3 = vrot.slane %v1954_v61, 4  ;;  %v1963_v59 = vrot.slane %v1962_v56, 4  ;;  %v1971_v24 = vrot.slane %v1970_v8, 4 }
 0x20d   : > { %v1979_v22 = vrot.slane %v1978_v27, 4  ;;  %v1925_v52 = vrot.slane %v1924_v34, 2  ;;  %v1933_v44 = vrot.slane %v1932_v50, 2  ;;  %v1941_v35 = vrot.slane %v1940_v48, 2 }
 0x20e   : > { %v1949_v14 = vrot.slane %v1948_v11, 2  ;;  %v1956_v1 = vmax.f32 %v1954_v61, %v1955_v3  ;;  %v1964_v17 = vmax.f32 %v1962_v56, %v1963_v59  ;;  %v1972_v5 = vmax.f32 %v1970_v8, %v1971_v24 }
 0x20f   : > { %v1980_v9 = vmax.f32 %v1978_v27, %v1979_v22  ;;  %v1926_v7 = vmax.f32 %v1924_v34, %v1925_v52  ;;  %v1934_v2 = vmax.f32 %v1932_v50, %v1933_v44  ;;  %v1942_v60 = vmax.f32 %v1940_v48, %v1941_v35 }
 0x210   : > { %v1950_v21 = vmax.f32 %v1948_v11, %v1949_v14  ;;  %v1957_v36 = vrot.slane %v1956_v1, 2  ;;  %v1965_v32 = vrot.slane %v1964_v17, 2  ;;  %v1973_v19 = vrot.slane %v1972_v5, 2 }
 0x211   : > { %v1981_v15 = vrot.slane %v1980_v9, 2  ;;  %v1927_v54 = vrot.slane %v1926_v7, 1  ;;  %v1935_v26 = vrot.slane %v1934_v2, 1  ;;  %v1943_v42 = vrot.slane %v1942_v60, 1 }
 0x212   : > { %v1951_v4 = vrot.slane %v1950_v21, 1  ;;  %v1958_v41 = vmax.f32 %v1956_v1, %v1957_v36  ;;  %v1966_v51 = vmax.f32 %v1964_v17, %v1965_v32  ;;  %v1974_v55 = vmax.f32 %v1972_v5, %v1973_v19 }
 0x213   : > { %v1982_v30 = vmax.f32 %v1980_v9, %v1981_v15  ;;  %v11003_v61 = vmax.f32 %v1926_v7, %v1927_v54  ;;  %v11005_v56 = vmax.f32 %v1934_v2, %v1935_v26  ;;  %v11007_v8 = vmax.f32 %v1942_v60, %v1943_v42 }
 0x214   : > { %v11009_v27 = vmax.f32 %v1950_v21, %v1951_v4  ;;  %v1959_v34 = vrot.slane %v1958_v41, 1  ;;  %v1967_v50 = vrot.slane %v1966_v51, 1  ;;  %v1975_v48 = vrot.slane %v1974_v55, 1 }
 0x215   : > { %v1983_v11 = vrot.slane %v1982_v30, 1  ;;  %v1985_v3 = vsel %vm1920_vm9, %v1912_v62, -inf  ;;  %v1993_v9 = vsel %vm1920_vm9, %v1913_v6, -inf  ;;  %v2001_v5 = vsel %vm1920_vm9, %v1914_v29, -inf }
 0x216   : > { %v2009_v17 = vsel %vm1920_vm9, %v1915_v23, -inf  ;;  %v11023_v1 = vmax.f32 %v1958_v41, %v1959_v34  ;;  %v11025_v59 = vmax.f32 %v1966_v51, %v1967_v50  ;;  %v11027_v24 = vmax.f32 %v1974_v55, %v1975_v48 }
 0x217   : > { %v11029_v10 = vmax.f32 %v1982_v30, %v1983_v11  ;;  %v1986_v28 = vmax.f32 %v1904_v20, %v1985_v3  ;;  %v1994_v39 = vmax.f32 %v1905_v0, %v1993_v9  ;;  %v2002_v62 = vmax.f32 %v1906_v46, %v2001_v5 }
 0x218   : > { %v2010_v13 = vmax.f32 %v1907_v40, %v2009_v17  ;;  %v2017_v6 = vsel %vm1920_vm9, %v1916_v16, -inf  ;;  %v2025_v29 = vsel %vm1920_vm9, %v1917_v47, -inf  ;;  %v2033_v58 = vsel %vm1920_vm9, %v1918_v57, -inf }
 0x219   : > { %v2041_v31 = vsel %vm1920_vm9, %v1919_v53, -inf  ;;  %v1987_v33 = vrot.slane %v1986_v28, 4  ;;  %v1995_v20 = vrot.slane %v1994_v39, 4  ;;  %v2003_v43 = vrot.slane %v2002_v62, 4 }
 0x21a   : > { %v2011_v0 = vrot.slane %v2010_v13, 4  ;;  %v12330_v49 = vmax.f32 %v10947_v25, 0.0  ;;  %v12331_v40 = vmax.f32 %v10949_v18, 0.0  ;;  %v12332_v23 = vmax.f32 %v10951_v63, 0.0 }
 0x21b   : > { %v12333_v38 = vmax.f32 %v10953_v12, 0.0  ;;  %v1988_v57 = vmax.f32 %v1986_v28, %v1987_v33  ;;  %v1996_v45 = vmax.f32 %v1994_v39, %v1995_v20  ;;  %v2004_v22 = vmax.f32 %v2002_v62, %v2003_v43 }
 0x21c   : > { %v2018_v46 = vmax.f32 %v12330_v49, %v2017_v6  ;;  %v2026_v37 = vmax.f32 %v12331_v40, %v2025_v29  ;;  %v2034_v16 = vmax.f32 %v12332_v23, %v2033_v58  ;;  %v2012_v53 = vmax.f32 %v2010_v13, %v2011_v0  ;;  %v12334_v49 = vld [vmem:[#allocation34_spill] sm:$0xff] }
 0x21d   : > { %v2042_v47 = vmax.f32 %v12333_v38, %v2041_v31  ;;  %v1989_v7 = vrot.slane %v1988_v57, 2  ;;  %v1997_v25 = vrot.slane %v1996_v45, 2  ;;  %v2005_v2 = vrot.slane %v2004_v22, 2 }
 0x21e   : > { %v2019_v52 = vrot.slane %v2018_v46, 4  ;;  %v2027_v44 = vrot.slane %v2026_v37, 4  ;;  %v2035_v35 = vrot.slane %v2034_v16, 4  ;;  %v2013_v60 = vrot.slane %v2012_v53, 2 }
 0x21f   : > { %v2043_v14 = vrot.slane %v2042_v47, 4  ;;  %v1990_v32 = vmax.f32 %v1988_v57, %v1989_v7  ;;  %v1998_v19 = vmax.f32 %v1996_v45, %v1997_v25  ;;  %v2006_v12 = vmax.f32 %v2004_v22, %v2005_v2 }
 0x220   : > { %v2020_v18 = vmax.f32 %v2018_v46, %v2019_v52  ;;  %v2028_v21 = vmax.f32 %v2026_v37, %v2027_v44  ;;  %v2036_v36 = vmax.f32 %v2034_v16, %v2035_v35  ;;  %v2014_v15 = vmax.f32 %v2012_v53, %v2013_v60 }
 0x221   : > { %v2044_v63 = vmax.f32 %v2042_v47, %v2043_v14  ;;  %v1991_v41 = vrot.slane %v1990_v32, 1  ;;  %v1999_v51 = vrot.slane %v1998_v19, 1  ;;  %v2007_v55 = vrot.slane %v2006_v12, 1 }
 0x222   : > { %v2021_v54 = vrot.slane %v2020_v18, 2  ;;  %v2029_v26 = vrot.slane %v2028_v21, 2  ;;  %v2037_v42 = vrot.slane %v2036_v36, 2  ;;  %v2015_v30 = vrot.slane %v2014_v15, 1 }
 0x223   : > { %v2045_v4 = vrot.slane %v2044_v63, 2  ;;  %v1992_v3 = vmax.f32 %v1990_v32, %v1991_v41  ;;  %v2000_v9 = vmax.f32 %v1998_v19, %v1999_v51  ;;  %v2008_v5 = vmax.f32 %v2006_v12, %v2007_v55 }
 0x224   : > { %v2022_v34 = vmax.f32 %v2020_v18, %v2021_v54  ;;  %v2030_v50 = vmax.f32 %v2028_v21, %v2029_v26  ;;  %v2038_v48 = vmax.f32 %v2036_v36, %v2037_v42  ;;  %v2016_v17 = vmax.f32 %v2014_v15, %v2015_v30 }
 0x225   : > { %v2046_v11 = vmax.f32 %v2044_v63, %v2045_v4  ;;  %v2065_v6 = vcombine.low %v11003_v61, %v11005_v56  ;;  %v2066_v29 = vcombine.low %v11007_v8, %v11009_v27  ;;  %v2082_v58 = vcombine.low %v11023_v1, %v11025_v59 }
 0x226   : > { %v2023_v28 = vrot.slane %v2022_v34, 1  ;;  %v2031_v39 = vrot.slane %v2030_v50, 1  ;;  %v2039_v62 = vrot.slane %v2038_v48, 1  ;;  %v2083_v31 = vcombine.low %v11027_v24, %v11029_v10 }
 0x227   : > { %v2047_v13 = vrot.slane %v2046_v11, 1  ;;  %v2073_v46 = vrot.slane %v2065_v6, %v12334_v49  ;;  %v2080_v40 = vrot.slane %v2066_v29, %v12334_v49  ;;  %v2090_v37 = vrot.slane %v2082_v58, %v12334_v49 }
 0x228   : > { %v2024_v33 = vmax.f32 %v2022_v34, %v2023_v28  ;;  %v2032_v20 = vmax.f32 %v2030_v50, %v2031_v39  ;;  %v2040_v43 = vmax.f32 %v2038_v48, %v2039_v62  ;;  %v2097_v61 = vrot.slane %v2083_v31, %v12334_v49 }
 0x229   : > { %v2048_v0 = vmax.f32 %v2046_v11, %v2047_v13  ;;  %v2099_v56 = vcombine.low %v1992_v3, %v2000_v9  ;;  %v2100_v8 = vcombine.low %v2008_v5, %v2016_v17  ;;  %v2081_v16 = vcombine.low %v2073_v46, %v2080_v40 }
 0x22a   : > { %v2116_v27 = vcombine.low %v2024_v33, %v2032_v20  ;;  %v2098_v38 = vcombine.low %v2090_v37, %v2097_v61 }
 0x22b   : > { %v2117_v23 = vcombine.low %v2040_v43, %v2048_v0  ;;  %v2107_v1 = vrot.slane %v2099_v56, %v12334_v49  ;;  %v2114_v59 = vrot.slane %v2100_v8, %v12334_v49 }
 0x22c   : > { %v2124_v24 = vrot.slane %v2116_v27, %v12334_v49 }
 0x22d   : > { %v2131_v10 = vrot.slane %v2117_v23, %v12334_v49  ;;  %v2115_v47 = vcombine.low %v2107_v1, %v2114_v59 }
 0x22f   : > { %v2132_v57 = vcombine.low %v2124_v24, %v2131_v10  ;;  %v2135_v45 = vrot.slane %v2115_v47, 7 }
 0x231   : > { %v2142_v22 = vrot.slane %v2132_v57, 7  ;;  %v2136_v53 = vsel %vm949_vm1, %v2135_v45, %v2081_v16 }
 0x232   : > { %v2137_v44 = vsel %vm951_vm2, %v2135_v45, %v2136_v53 }
 0x233   : > { %v2143_v52 = vsel %vm949_vm1, %v2142_v22, %v2098_v38  ;;  %v2138_v14 = vsel %vm953_vm3, %v2135_v45, %v2137_v44 }
 0x234   : > { %v2144_v35 = vsel %vm951_vm2, %v2142_v22, %v2143_v52  ;;  %v2139_v25 = vsel %vm955_vm4, %v2135_v45, %v2138_v14 }
 0x235   : > { %v2145_v7 = vsel %vm953_vm3, %v2142_v22, %v2144_v35  ;;  %2150 = vst [vmem:[#allocation2 + $0x40] sm:$0xff] %v2139_v25 }
 0x236   : > { %v2146_v2 = vsel %vm955_vm4, %v2142_v22, %v2145_v7 }
 0x237   : > { %2151 = vst [vmem:[#allocation2 + $0x48] sm:$0xff] %v2146_v2 }
 0x238 PF: > { %v8161_v60 = vld [vmem:[%s9703_s24 + $0x4] ss:$16 sps:$4 sm:$0xff]   ;;  %v8163_v18 = vld [vmem:[%s9703_s24 + $0xc] ss:$16 sps:$4 sm:$0xff]   ;;  %v8165_v21 = vld [vmem:[%s9703_s24] ss:$16 sps:$4 sm:$0xff]   ;;  %v2168_v46 = vlaneseq }
 0x239   : > { %3750 = vmatprep.subr.bf16.mxu0 %v8161_v60  ;;  %v8166_v36 = vld [vmem:[%s9703_s24 + $0x8] ss:$16 sps:$4 sm:$0xff]   ;;  %3914 = vmatprep.subr.bf16.mxu1 %v8163_v18  ;;  %v8167_v63 = vld [vmem:[%s9703_s24 + $0x24] ss:$16 sps:$4 sm:$0xff]   ;;  %v8169_v32 = vld [vmem:[%s9703_s24 + $0x2c] ss:$16 sps:$4 sm:$0xff]  }
 0x23a   : > { %3751 = vmatpush1.bf16.msra.mxu0 %v8165_v21  ;;  %3915 = vmatpush1.bf16.msra.mxu1 %v8166_v36  ;;  %v8171_v19 = vld [vmem:[%s9703_s24 + $0x20] ss:$16 sps:$4 sm:$0xff]   ;;  %v8172_v12 = vld [vmem:[%s9703_s24 + $0x28] ss:$16 sps:$4 sm:$0xff]   ;;  %v8173_v15 = vld [vmem:[%s9703_s24 + $0x44] ss:$16 sps:$4 sm:$0xff]  }
 0x23b   : > { %3752 = vmatprep.subr.bf16.mxu0 %v8167_v63  ;;  %3916 = vmatprep.subr.bf16.mxu1 %v8169_v32  ;;  %v8175_v54 = vld [vmem:[%s9703_s24 + $0x4c] ss:$16 sps:$4 sm:$0xff]   ;;  %v8177_v26 = vld [vmem:[%s9703_s24 + $0x40] ss:$16 sps:$4 sm:$0xff]   ;;  %v8178_v42 = vld [vmem:[%s9703_s24 + $0x48] ss:$16 sps:$4 sm:$0xff]  }
 0x23c   : > { %v8179_v4 = vld [vmem:[%s9703_s24 + $0x64] ss:$16 sps:$4 sm:$0xff]   ;;  %v8181_v41 = vld [vmem:[%s9703_s24 + $0x6c] ss:$16 sps:$4 sm:$0xff]   ;;  %v8183_v51 = vld [vmem:[%s9703_s24 + $0x60] ss:$16 sps:$4 sm:$0xff]  }
 0x23d   : > { %v8184_v55 = vld [vmem:[%s9703_s24 + $0x68] ss:$16 sps:$4 sm:$0xff]   ;;  %v8185_v30 = vld [vmem:[%s9703_s24 + $0x84] ss:$16 sps:$4 sm:$0xff]   ;;  %v8187_v34 = vld [vmem:[%s9703_s24 + $0x8c] ss:$16 sps:$4 sm:$0xff]  }
 0x23e   : > { %3753 = vmatpush1.bf16.msra.mxu0 %v8171_v19  ;;  %3917 = vmatpush1.bf16.msra.mxu1 %v8172_v12  ;;  %v8189_v50 = vld [vmem:[%s9703_s24 + $0x80] ss:$16 sps:$4 sm:$0xff]   ;;  %v8190_v48 = vld [vmem:[%s9703_s24 + $0x88] ss:$16 sps:$4 sm:$0xff]   ;;  %v8191_v11 = vld [vmem:[%s9703_s24 + $0xa4] ss:$16 sps:$4 sm:$0xff]  }
 0x23f   : > { %3754 = vmatprep.subr.bf16.mxu0 %v8173_v15  ;;  %3918 = vmatprep.subr.bf16.mxu1 %v8175_v54  ;;  %v8193_v3 = vld [vmem:[%s9703_s24 + $0xac] ss:$16 sps:$4 sm:$0xff]   ;;  %v8195_v9 = vld [vmem:[%s9703_s24 + $0xa0] ss:$16 sps:$4 sm:$0xff]   ;;  %v8196_v5 = vld [vmem:[%s9703_s24 + $0xa8] ss:$16 sps:$4 sm:$0xff]  }
 0x240   : > { %v8197_v17 = vld [vmem:[%s9703_s24 + $0xc4] ss:$16 sps:$4 sm:$0xff]   ;;  %v8199_v28 = vld [vmem:[%s9703_s24 + $0xcc] ss:$16 sps:$4 sm:$0xff]   ;;  %v8201_v39 = vld [vmem:[%s9703_s24 + $0xc0] ss:$16 sps:$4 sm:$0xff]  }
 0x241   : > { %v8202_v62 = vld [vmem:[%s9703_s24 + $0xc8] ss:$16 sps:$4 sm:$0xff]   ;;  %v8203_v13 = vld [vmem:[%s9703_s24 + $0xe4] ss:$16 sps:$4 sm:$0xff]   ;;  %v8205_v6 = vld [vmem:[%s9703_s24 + $0xec] ss:$16 sps:$4 sm:$0xff]  }
 0x242   : > { %3755 = vmatpush1.bf16.msra.mxu0 %v8177_v26  ;;  %3919 = vmatpush1.bf16.msra.mxu1 %v8178_v42  ;;  %v8207_v29 = vld [vmem:[%s9703_s24 + $0xe0] ss:$16 sps:$4 sm:$0xff]   ;;  %v8208_v58 = vld [vmem:[%s9703_s24 + $0xe8] ss:$16 sps:$4 sm:$0xff]   ;;  %v8209_v31 = vld [vmem:[%s9703_s24 + $0x104] ss:$16 sps:$4 sm:$0xff]  }
 0x243   : > { %3756 = vmatprep.subr.bf16.mxu0 %v8179_v4  ;;  %3920 = vmatprep.subr.bf16.mxu1 %v8181_v41  ;;  %v8211_v33 = vld [vmem:[%s9703_s24 + $0x10c] ss:$16 sps:$4 sm:$0xff]   ;;  %v8213_v20 = vld [vmem:[%s9703_s24 + $0x100] ss:$16 sps:$4 sm:$0xff]   ;;  %v8214_v43 = vld [vmem:[%s9703_s24 + $0x108] ss:$16 sps:$4 sm:$0xff]  }
 0x244   : > { %v9294_v0 = vmov 1983009808   ;;  %s12335_s21 = sld [smem:[#allocation28_spill]]  ;;  %v8215_v40 = vld [vmem:[%s9703_s24 + $0x124] ss:$16 sps:$4 sm:$0xff]   ;;  %v11123_v8 = vshrl.u32 %v2168_v46, 7 }
 0x245   : > { %v2166_v49 = vunpack.c.l.s4 %v9294_v0  ;;  %v8217_v37 = vld [vmem:[%s9703_s24 + $0x12c] ss:$16 sps:$4 sm:$0xff]   ;;  %v8219_v61 = vld [vmem:[%s9703_s24 + $0x120] ss:$16 sps:$4 sm:$0xff]   ;;  %v8220_v27 = vld [vmem:[%s9703_s24 + $0x128] ss:$16 sps:$4 sm:$0xff]  }
 0x246   : > { %3757 = vmatpush1.bf16.msra.mxu0 %v8183_v51  ;;  %3921 = vmatpush1.bf16.msra.mxu1 %v8184_v55  ;;  %v8221_v23 = vld [vmem:[%s9703_s24 + $0x144] ss:$16 sps:$4 sm:$0xff]   ;;  %v8223_v1 = vld [vmem:[%s9703_s24 + $0x14c] ss:$16 sps:$4 sm:$0xff]   ;;  %v8225_v59 = vld [vmem:[%s9703_s24 + $0x140] ss:$16 sps:$4 sm:$0xff]  }
 0x247   : > { %3758 = vmatprep.subr.bf16.mxu0 %v8185_v30  ;;  %3922 = vmatprep.subr.bf16.mxu1 %v8187_v34  ;;  %v2167_v56 = vunpack.c.0.s8 %v2166_v49  ;;  %v8226_v24 = vld [vmem:[%s9703_s24 + $0x148] ss:$16 sps:$4 sm:$0xff]   ;;  %v8227_v16 = vld [vmem:[%s9703_s24 + $0x164] ss:$16 sps:$4 sm:$0xff]   ;;  %v8229_v38 = vld [vmem:[%s9703_s24 + $0x16c] ss:$16 sps:$4 sm:$0xff]  }
 0x248   : > { %v8231_v57 = vld [vmem:[%s9703_s24 + $0x160] ss:$16 sps:$4 sm:$0xff]   ;;  %v8232_v22 = vld [vmem:[%s9703_s24 + $0x168] ss:$16 sps:$4 sm:$0xff]   ;;  %v8233_v53 = vld [vmem:[%s9703_s24 + $0x184] ss:$16 sps:$4 sm:$0xff]  }
 0x249   : > { %v11132_v10 = vsub.s32 %v2167_v56, %v11123_v8  ;;  %v8235_v52 = vld [vmem:[%s9703_s24 + $0x18c] ss:$16 sps:$4 sm:$0xff]   ;;  %v8237_v35 = vld [vmem:[%s9703_s24 + $0x180] ss:$16 sps:$4 sm:$0xff]   ;;  %v8238_v7 = vld [vmem:[%s9703_s24 + $0x188] ss:$16 sps:$4 sm:$0xff]  }
 0x24a   : > { %3759 = vmatpush1.bf16.msra.mxu0 %v8189_v50  ;;  %3923 = vmatpush1.bf16.msra.mxu1 %v8190_v48  ;;  %s7740_s20 = sshll.u32 %s12335_s21, 4  ;;  %v8239_v25 = vld [vmem:[%s9703_s24 + $0x1a4] ss:$16 sps:$4 sm:$0xff]   ;;  %v8241_v2 = vld [vmem:[%s9703_s24 + $0x1ac] ss:$16 sps:$4 sm:$0xff]   ;;  %s7741_s5 = sshll.u32 %s12335_s21, 3 }
 0x24b   : > { %3760 = vmatprep.subr.bf16.mxu0 %v8191_v11  ;;  %3924 = vmatprep.subr.bf16.mxu1 %v8193_v3  ;;  %s11136_s23 = scalar_lea.vmem [#allocation2], %s7740_s20  ;;  %v8243_v60 = vld [vmem:[%s9703_s24 + $0x1a0] ss:$16 sps:$4 sm:$0xff]   ;;  %v8244_v18 = vld [vmem:[%s9703_s24 + $0x1a8] ss:$16 sps:$4 sm:$0xff]   ;;  %s4106_s12 = scalar_lea.vmem [#allocation3], %s7741_s5 }
 0x24c   : > { %v2160_v47 = vld [vmem:[%s11136_s23] sm:$0xff]  ;;  %v8250_v19 = vld [vmem:[%s9703_s24 + $0x1c8] ss:$16 sps:$4 sm:$0xff]   ;;  %p5998_p12 = scmp.eq.s32.totalorder %s12335_s21, 4  ;;  %p7733_p2 = scmp.ne.s32.totalorder %s12335_s21, 4 }
 0x24d   : > { %v2171_v45 = vrot.slane %v2160_v47, %v11132_v10  ;;  %v8245_v21 = vld [vmem:[%s9703_s24 + $0x1c4] ss:$16 sps:$4 sm:$0xff]   ;;  %v8247_v36 = vld [vmem:[%s9703_s24 + $0x1cc] ss:$16 sps:$4 sm:$0xff]   ;;  %v2164_v63 = vcombine.high %v2160_v47, %v2160_v47  ;;  %v8249_v32 = vld [vmem:[%s9703_s24 + $0x1c0] ss:$16 sps:$4 sm:$0xff]  }
 0x24e   : > { %3761 = vmatpush1.bf16.msra.mxu0 %v8195_v9  ;;  %3925 = vmatpush1.bf16.msra.mxu1 %v8196_v5  ;;  %v8251_v12 = vld [vmem:[%s9703_s24 + $0x1e4] ss:$16 sps:$4 sm:$0xff]   ;;  %v8253_v15 = vld [vmem:[%s9703_s24 + $0x1ec] ss:$16 sps:$4 sm:$0xff]   ;;  %v8255_v26 = vld [vmem:[%s9703_s24 + $0x1e0] ss:$16 sps:$4 sm:$0xff]  }
 0x24f   : > { %3762 = vmatprep.subr.bf16.mxu0 %v8197_v17  ;;  %3926 = vmatprep.subr.bf16.mxu1 %v8199_v28  ;;  %v2179_v44 = vcombine.high %v2171_v45, %v2171_v45  ;;  %v11161_v54 = vrot.slane %v2164_v63, %v11132_v10  ;;  %v8256_v42 = vld [vmem:[%s9703_s24 + $0x1e8] ss:$16 sps:$4 sm:$0xff]   ;;  %v8259_v4 = vld [vmem:[%s9703_s24 + $0x204] ss:$16 sps:$4 sm:$0xff]   ;;  %v8262_v41 = vld [vmem:[%s9703_s24 + $0x20c] ss:$16 sps:$4 sm:$0xff]   ;;  %v11170_v30 = vpack.c.bf16 %v2171_v45, %v2171_v45 }
 0x250   : > { %v8257_v55 = vld [vmem:[%s9703_s24 + $0x200] ss:$16 sps:$4 sm:$0xff]   ;;  %v8260_v34 = vld [vmem:[%s9703_s24 + $0x208] ss:$16 sps:$4 sm:$0xff]   ;;  %v8265_v50 = vld [vmem:[%s9703_s24 + $0x224] ss:$16 sps:$4 sm:$0xff]  }
 0x251   : > { %v11145_v14 = vpack.c.bf16 %v2179_v44, %v2179_v44  ;;  %v2180_v51 = vcombine.high %v11161_v54, %v11161_v54  ;;  %v8268_v48 = vld [vmem:[%s9703_s24 + $0x22c] ss:$16 sps:$4 sm:$0xff]   ;;  %v8263_v3 = vld [vmem:[%s9703_s24 + $0x220] ss:$16 sps:$4 sm:$0xff]   ;;  %v8266_v9 = vld [vmem:[%s9703_s24 + $0x228] ss:$16 sps:$4 sm:$0xff]  }
 0x252   : > { %3763 = vmatpush1.bf16.msra.mxu0 %v8201_v39  ;;  %3927 = vmatpush1.bf16.msra.mxu1 %v8202_v62  ;;  %v8271_v5 = vld [vmem:[%s9703_s24 + $0x244] ss:$16 sps:$4 sm:$0xff]   ;;  %v8274_v17 = vld [vmem:[%s9703_s24 + $0x24c] ss:$16 sps:$4 sm:$0xff]   ;;  %v8269_v28 = vld [vmem:[%s9703_s24 + $0x240] ss:$16 sps:$4 sm:$0xff]  }
 0x253   : > { %3764 = vmatprep.subr.bf16.mxu0 %v8203_v13  ;;  %3928 = vmatprep.subr.bf16.mxu1 %v8205_v6  ;;  %v11175_v11 = vpack.c.bf16 %v2180_v51, %v2180_v51  ;;  %v8272_v39 = vld [vmem:[%s9703_s24 + $0x248] ss:$16 sps:$4 sm:$0xff]   ;;  %v8277_v62 = vld [vmem:[%s9703_s24 + $0x264] ss:$16 sps:$4 sm:$0xff]   ;;  %v8280_v13 = vld [vmem:[%s9703_s24 + $0x26c] ss:$16 sps:$4 sm:$0xff]  }
 0x254   : > { %3782 = vmatprep.mubr.bf16.mxu0 %v11145_v14  ;;  %3946 = vmatprep.mubr.bf16.mxu1 %v11145_v14  ;;  %v8275_v6 = vld [vmem:[%s9703_s24 + $0x260] ss:$16 sps:$4 sm:$0xff]   ;;  %v8292_v0 = vld [vmem:[%s9703_s24 + $0x2ac] ss:$16 sps:$4 sm:$0xff]   ;;  %v8313_v45 = vld [vmem:[%s9703_s24 + $0x324] ss:$16 sps:$4 sm:$0xff]  }
 0x255   : > { %v8287_v49 = vld [vmem:[%s9703_s24 + $0x2a0] ss:$16 sps:$4 sm:$0xff]   ;;  %v8319_v44 = vld [vmem:[%s9703_s24 + $0x344] ss:$16 sps:$4 sm:$0xff]   ;;  %v8334_v63 = vld [vmem:[%s9703_s24 + $0x38c] ss:$16 sps:$4 sm:$0xff]  }
 0x256   : > { %3765 = vmatpush1.bf16.msra.mxu0 %v8207_v29  ;;  %3929 = vmatpush1.bf16.msra.mxu1 %v8208_v58  ;;  %v8278_v29 = vld [vmem:[%s9703_s24 + $0x268] ss:$16 sps:$4 sm:$0xff]   ;;  %v8283_v58 = vld [vmem:[%s9703_s24 + $0x284] ss:$16 sps:$4 sm:$0xff]   ;;  %v8293_v56 = vld [vmem:[%s9703_s24 + $0x2c0] ss:$16 sps:$4 sm:$0xff]  }
 0x257   : > { %3766 = vmatprep.subr.bf16.mxu0 %v8209_v31  ;;  %3930 = vmatprep.subr.bf16.mxu1 %v8211_v33  ;;  %v8286_v31 = vld [vmem:[%s9703_s24 + $0x28c] ss:$16 sps:$4 sm:$0xff]   ;;  %v8281_v33 = vld [vmem:[%s9703_s24 + $0x280] ss:$16 sps:$4 sm:$0xff]   ;;  %vm6136_vm10 = vcmask (!%p7733_p2), 1041408   ;;  %vm6649_vm11 = vcmp.lt.s32.totalorder (!%p7733_p2), %v2168_v46, 256 }
 0x258   : > { %v8305_v47 = vld [vmem:[%s9703_s24 + $0x300] ss:$16 sps:$4 sm:$0xff]  }
 0x259   : > { %v8341_v51 = vld [vmem:[%s9703_s24 + $0x3c0] ss:$16 sps:$4 sm:$0xff]  }
 0x25a   : > { %3767 = vmatpush1.bf16.msra.mxu0 %v8213_v20  ;;  %3931 = vmatpush1.bf16.msra.mxu1 %v8214_v43  ;;  %v8284_v20 = vld [vmem:[%s9703_s24 + $0x288] ss:$16 sps:$4 sm:$0xff]   ;;  %v8289_v43 = vld [vmem:[%s9703_s24 + $0x2a4] ss:$16 sps:$4 sm:$0xff]  }
 0x25b   : > { %3768 = vmatprep.subr.bf16.mxu0 %v8215_v40  ;;  %3932 = vmatprep.subr.bf16.mxu1 %v8217_v37  ;;  %v8290_v40 = vld [vmem:[%s9703_s24 + $0x2a8] ss:$16 sps:$4 sm:$0xff]   ;;  %v8295_v37 = vld [vmem:[%s9703_s24 + $0x2c4] ss:$16 sps:$4 sm:$0xff]  }
 0x25e   : > { %3769 = vmatpush1.bf16.msra.mxu0 %v8219_v61  ;;  %3933 = vmatpush1.bf16.msra.mxu1 %v8220_v27  ;;  %v8298_v61 = vld [vmem:[%s9703_s24 + $0x2cc] ss:$16 sps:$4 sm:$0xff]   ;;  %v8296_v27 = vld [vmem:[%s9703_s24 + $0x2c8] ss:$16 sps:$4 sm:$0xff]  }
 0x25f   : > { %3770 = vmatprep.subr.bf16.mxu0 %v8221_v23  ;;  %3934 = vmatprep.subr.bf16.mxu1 %v8223_v1  ;;  %v8301_v23 = vld [vmem:[%s9703_s24 + $0x2e4] ss:$16 sps:$4 sm:$0xff]   ;;  %v8304_v1 = vld [vmem:[%s9703_s24 + $0x2ec] ss:$16 sps:$4 sm:$0xff]  }
 0x262   : > { %3771 = vmatpush1.bf16.msra.mxu0 %v8225_v59  ;;  %3935 = vmatpush1.bf16.msra.mxu1 %v8226_v24  ;;  %v8299_v59 = vld [vmem:[%s9703_s24 + $0x2e0] ss:$16 sps:$4 sm:$0xff]   ;;  %v8302_v24 = vld [vmem:[%s9703_s24 + $0x2e8] ss:$16 sps:$4 sm:$0xff]  }
 0x263   : > { %3772 = vmatprep.subr.bf16.mxu0 %v8227_v16  ;;  %3936 = vmatprep.subr.bf16.mxu1 %v8229_v38  ;;  %v8307_v16 = vld [vmem:[%s9703_s24 + $0x304] ss:$16 sps:$4 sm:$0xff]   ;;  %v8310_v38 = vld [vmem:[%s9703_s24 + $0x30c] ss:$16 sps:$4 sm:$0xff]  }
 0x266   : > { %3773 = vmatpush1.bf16.msra.mxu0 %v8231_v57  ;;  %3937 = vmatpush1.bf16.msra.mxu1 %v8232_v22  ;;  %v8308_v57 = vld [vmem:[%s9703_s24 + $0x308] ss:$16 sps:$4 sm:$0xff]   ;;  %v8316_v22 = vld [vmem:[%s9703_s24 + $0x32c] ss:$16 sps:$4 sm:$0xff]  }
 0x267   : > { %3774 = vmatprep.subr.bf16.mxu0 %v8233_v53  ;;  %3938 = vmatprep.subr.bf16.mxu1 %v8235_v52  ;;  %v8311_v53 = vld [vmem:[%s9703_s24 + $0x320] ss:$16 sps:$4 sm:$0xff]   ;;  %v8314_v52 = vld [vmem:[%s9703_s24 + $0x328] ss:$16 sps:$4 sm:$0xff]  }
 0x26a   : > { %3775 = vmatpush1.bf16.msra.mxu0 %v8237_v35  ;;  %3939 = vmatpush1.bf16.msra.mxu1 %v8238_v7  ;;  %v8322_v35 = vld [vmem:[%s9703_s24 + $0x34c] ss:$16 sps:$4 sm:$0xff]   ;;  %v8317_v7 = vld [vmem:[%s9703_s24 + $0x340] ss:$16 sps:$4 sm:$0xff]  }
 0x26b   : > { %3776 = vmatprep.subr.bf16.mxu0 %v8239_v25  ;;  %3940 = vmatprep.subr.bf16.mxu1 %v8241_v2  ;;  %v8320_v25 = vld [vmem:[%s9703_s24 + $0x348] ss:$16 sps:$4 sm:$0xff]   ;;  %v8325_v2 = vld [vmem:[%s9703_s24 + $0x364] ss:$16 sps:$4 sm:$0xff]  }
 0x26e   : > { %3777 = vmatpush1.bf16.msra.mxu0 %v8243_v60  ;;  %3941 = vmatpush1.bf16.msra.mxu1 %v8244_v18  ;;  %v8328_v60 = vld [vmem:[%s9703_s24 + $0x36c] ss:$16 sps:$4 sm:$0xff]   ;;  %v8323_v18 = vld [vmem:[%s9703_s24 + $0x360] ss:$16 sps:$4 sm:$0xff]  }
 0x26f   : > { %3778 = vmatprep.subr.bf16.mxu0 %v8245_v21  ;;  %3942 = vmatprep.subr.bf16.mxu1 %v8247_v36  ;;  %v8326_v21 = vld [vmem:[%s9703_s24 + $0x368] ss:$16 sps:$4 sm:$0xff]   ;;  %v8331_v36 = vld [vmem:[%s9703_s24 + $0x384] ss:$16 sps:$4 sm:$0xff]  }
 0x272   : > { %3779 = vmatpush1.bf16.msra.mxu0 %v8249_v32  ;;  %3943 = vmatpush1.bf16.msra.mxu1 %v8250_v19  ;;  %v8329_v32 = vld [vmem:[%s9703_s24 + $0x380] ss:$16 sps:$4 sm:$0xff]   ;;  %v8332_v19 = vld [vmem:[%s9703_s24 + $0x388] ss:$16 sps:$4 sm:$0xff]  }
 0x273   : > { %3780 = vmatprep.subr.bf16.mxu0 %v8251_v12  ;;  %3944 = vmatprep.subr.bf16.mxu1 %v8253_v15  ;;  %v8337_v12 = vld [vmem:[%s9703_s24 + $0x3a4] ss:$16 sps:$4 sm:$0xff]   ;;  %v8340_v15 = vld [vmem:[%s9703_s24 + $0x3ac] ss:$16 sps:$4 sm:$0xff]  }
 0x276   : > { %3781 = vmatpush1.bf16.msra.mxu0 %v8255_v26  ;;  %3945 = vmatpush1.bf16.msra.mxu1 %v8256_v42  ;;  %v8335_v26 = vld [vmem:[%s9703_s24 + $0x3a0] ss:$16 sps:$4 sm:$0xff]   ;;  %v8338_v42 = vld [vmem:[%s9703_s24 + $0x3a8] ss:$16 sps:$4 sm:$0xff]  }
 0x277   : > { %3791 = vmatprep.subr.bf16.mxu0 %v8259_v4  ;;  %3955 = vmatprep.subr.bf16.mxu1 %v8262_v41  ;;  %v8343_v4 = vld [vmem:[%s9703_s24 + $0x3c4] ss:$16 sps:$4 sm:$0xff]   ;;  %v8346_v41 = vld [vmem:[%s9703_s24 + $0x3cc] ss:$16 sps:$4 sm:$0xff]  }
 0x279   : > { %3783 = vmatmul.mubr.bf16.vlgmr.msra.gmra.mrb[0].mxu0 %v11170_v30  ;;  %3947 = vmatmul.mubr.bf16.vlgmr.msra.gmra.mrb[0].mxu1 %v11170_v30 }
 0x27a   : > { %3792 = vmatpush1.bf16.msra.mxu0 %v8257_v55  ;;  %3956 = vmatpush1.bf16.msra.mxu1 %v8260_v34  ;;  %v8344_v55 = vld [vmem:[%s9703_s24 + $0x3c8] ss:$16 sps:$4 sm:$0xff]   ;;  %v8349_v34 = vld [vmem:[%s9703_s24 + $0x3e4] ss:$16 sps:$4 sm:$0xff]  }
 0x27b   : > { %3793 = vmatprep.subr.bf16.mxu0 %v8265_v50  ;;  %3957 = vmatprep.subr.bf16.mxu1 %v8268_v48  ;;  %v8352_v50 = vld [vmem:[%s9703_s24 + $0x3ec] ss:$16 sps:$4 sm:$0xff]   ;;  %v8347_v48 = vld [vmem:[%s9703_s24 + $0x3e0] ss:$16 sps:$4 sm:$0xff]  }
 0x27c   : > { %3823 = vmatprep.mubr.bf16.mxu0 %v11175_v11  ;;  %3987 = vmatprep.mubr.bf16.mxu1 %v11175_v11 }
 0x27e   : > { %3794 = vmatpush1.bf16.msra.mxu0 %v8263_v3  ;;  %3958 = vmatpush1.bf16.msra.mxu1 %v8266_v9  ;;  %v8350_v3 = vld [vmem:[%s9703_s24 + $0x3e8] ss:$16 sps:$4 sm:$0xff]   ;;  %v8356_v9 = vld [vmem:[%s9703_s24 + $0x404] ss:$16 sps:$4 sm:$0xff]  }
 0x27f   : > { %3795 = vmatprep.subr.bf16.mxu0 %v8271_v5  ;;  %3959 = vmatprep.subr.bf16.mxu1 %v8274_v17  ;;  %v8359_v5 = vld [vmem:[%s9703_s24 + $0x40c] ss:$16 sps:$4 sm:$0xff]   ;;  %v8354_v17 = vld [vmem:[%s9703_s24 + $0x400] ss:$16 sps:$4 sm:$0xff]  }
 0x282   : > { %3796 = vmatpush1.bf16.msra.mxu0 %v8269_v28  ;;  %3960 = vmatpush1.bf16.msra.mxu1 %v8272_v39  ;;  %v11244_v28 = vpack.c.bf16 %v11161_v54, %v11161_v54  ;;  %v8357_v39 = vld [vmem:[%s9703_s24 + $0x408] ss:$16 sps:$4 sm:$0xff]  }
 0x283   : > { %3797 = vmatprep.subr.bf16.mxu0 %v8277_v62  ;;  %3961 = vmatprep.subr.bf16.mxu1 %v8280_v13  ;;  %v11248_v62 = vld [vmem:[%s11136_s23 + $0x8] sm:$0xff] }
 0x284   : > { %v8362_v13 = vld [vmem:[%s9703_s24 + $0x424] ss:$16 sps:$4 sm:$0xff]  }
 0x286   : > { %3798 = vmatpush1.bf16.msra.mxu0 %v8275_v6  ;;  %3962 = vmatpush1.bf16.msra.mxu1 %v8278_v29  ;;  %v8365_v6 = vld [vmem:[%s9703_s24 + $0x42c] ss:$16 sps:$4 sm:$0xff]   ;;  %v11254_v29 = vrot.slane %v11248_v62, %v11132_v10 }
 0x287   : > { %3799 = vmatprep.subr.bf16.mxu0 %v8283_v58  ;;  %3963 = vmatprep.subr.bf16.mxu1 %v8286_v31  ;;  %v8360_v58 = vld [vmem:[%s9703_s24 + $0x420] ss:$16 sps:$4 sm:$0xff]   ;;  %v8363_v31 = vld [vmem:[%s9703_s24 + $0x428] ss:$16 sps:$4 sm:$0xff]  }
 0x288   : > { %v2196_v54 = vcombine.high %v11254_v29, %v11254_v29 }
 0x28a   : > { %3800 = vmatpush1.bf16.msra.mxu0 %v8281_v33  ;;  %3964 = vmatpush1.bf16.msra.mxu1 %v8284_v20  ;;  %v8368_v33 = vld [vmem:[%s9703_s24 + $0x444] ss:$16 sps:$4 sm:$0xff]   ;;  %v8371_v20 = vld [vmem:[%s9703_s24 + $0x44c] ss:$16 sps:$4 sm:$0xff]  }
 0x28b   : > { %3801 = vmatprep.subr.bf16.mxu0 %v8289_v43  ;;  %3965 = vmatprep.subr.bf16.mxu1 %v8292_v0  ;;  %v11264_v43 = vpack.c.bf16 %v2196_v54, %v2196_v54  ;;  %v8366_v0 = vld [vmem:[%s9703_s24 + $0x440] ss:$16 sps:$4 sm:$0xff]  }
 0x28c   : > { %v8438_v54 = vld [vmem:[%s9703_s24 + $0x5c0] ss:$16 sps:$4 sm:$0xff]  }
 0x28e   : > { %3802 = vmatpush1.bf16.msra.mxu0 %v8287_v49  ;;  %3966 = vmatpush1.bf16.msra.mxu1 %v8290_v40  ;;  %v8369_v49 = vld [vmem:[%s9703_s24 + $0x448] ss:$16 sps:$4 sm:$0xff]   ;;  %v8374_v40 = vld [vmem:[%s9703_s24 + $0x464] ss:$16 sps:$4 sm:$0xff]  }
 0x28f   : > { %3803 = vmatprep.subr.bf16.mxu0 %v8295_v37  ;;  %3967 = vmatprep.subr.bf16.mxu1 %v8298_v61  ;;  %v8377_v37 = vld [vmem:[%s9703_s24 + $0x46c] ss:$16 sps:$4 sm:$0xff]   ;;  %v8372_v61 = vld [vmem:[%s9703_s24 + $0x460] ss:$16 sps:$4 sm:$0xff]  }
 0x292   : > { %3804 = vmatpush1.bf16.msra.mxu0 %v8293_v56  ;;  %3968 = vmatpush1.bf16.msra.mxu1 %v8296_v27  ;;  %v8375_v56 = vld [vmem:[%s9703_s24 + $0x468] ss:$16 sps:$4 sm:$0xff]   ;;  %v8380_v27 = vld [vmem:[%s9703_s24 + $0x484] ss:$16 sps:$4 sm:$0xff]  }
 0x293   : > { %3805 = vmatprep.subr.bf16.mxu0 %v8301_v23  ;;  %3969 = vmatprep.subr.bf16.mxu1 %v8304_v1  ;;  %v8383_v23 = vld [vmem:[%s9703_s24 + $0x48c] ss:$16 sps:$4 sm:$0xff]   ;;  %v8378_v1 = vld [vmem:[%s9703_s24 + $0x480] ss:$16 sps:$4 sm:$0xff]  }
 0x296   : > { %3806 = vmatpush1.bf16.msra.mxu0 %v8299_v59  ;;  %3970 = vmatpush1.bf16.msra.mxu1 %v8302_v24  ;;  %v8381_v59 = vld [vmem:[%s9703_s24 + $0x488] ss:$16 sps:$4 sm:$0xff]   ;;  %v8386_v24 = vld [vmem:[%s9703_s24 + $0x4a4] ss:$16 sps:$4 sm:$0xff]  }
 0x297   : > { %3807 = vmatprep.subr.bf16.mxu0 %v8307_v16  ;;  %3971 = vmatprep.subr.bf16.mxu1 %v8310_v38  ;;  %v8389_v16 = vld [vmem:[%s9703_s24 + $0x4ac] ss:$16 sps:$4 sm:$0xff]   ;;  %v8384_v38 = vld [vmem:[%s9703_s24 + $0x4a0] ss:$16 sps:$4 sm:$0xff]  }
 0x29a   : > { %3808 = vmatpush1.bf16.msra.mxu0 %v8305_v47  ;;  %3972 = vmatpush1.bf16.msra.mxu1 %v8308_v57  ;;  %v8387_v47 = vld [vmem:[%s9703_s24 + $0x4a8] ss:$16 sps:$4 sm:$0xff]   ;;  %v8392_v57 = vld [vmem:[%s9703_s24 + $0x4c4] ss:$16 sps:$4 sm:$0xff]  }
 0x29b   : > { %3809 = vmatprep.subr.bf16.mxu0 %v8313_v45  ;;  %3973 = vmatprep.subr.bf16.mxu1 %v8316_v22  ;;  %v8395_v45 = vld [vmem:[%s9703_s24 + $0x4cc] ss:$16 sps:$4 sm:$0xff]   ;;  %v8390_v22 = vld [vmem:[%s9703_s24 + $0x4c0] ss:$16 sps:$4 sm:$0xff]  }
 0x29e   : > { %3810 = vmatpush1.bf16.msra.mxu0 %v8311_v53  ;;  %3974 = vmatpush1.bf16.msra.mxu1 %v8314_v52  ;;  %v8393_v53 = vld [vmem:[%s9703_s24 + $0x4c8] ss:$16 sps:$4 sm:$0xff]   ;;  %v8398_v52 = vld [vmem:[%s9703_s24 + $0x4e4] ss:$16 sps:$4 sm:$0xff]  }
 0x29f   : > { %3811 = vmatprep.subr.bf16.mxu0 %v8319_v44  ;;  %3975 = vmatprep.subr.bf16.mxu1 %v8322_v35  ;;  %v8401_v44 = vld [vmem:[%s9703_s24 + $0x4ec] ss:$16 sps:$4 sm:$0xff]   ;;  %v8396_v35 = vld [vmem:[%s9703_s24 + $0x4e0] ss:$16 sps:$4 sm:$0xff]  }
 0x2a2   : > { %3812 = vmatpush1.bf16.msra.mxu0 %v8317_v7  ;;  %3976 = vmatpush1.bf16.msra.mxu1 %v8320_v25  ;;  %v8399_v7 = vld [vmem:[%s9703_s24 + $0x4e8] ss:$16 sps:$4 sm:$0xff]   ;;  %v8404_v25 = vld [vmem:[%s9703_s24 + $0x504] ss:$16 sps:$4 sm:$0xff]  }
 0x2a3   : > { %3813 = vmatprep.subr.bf16.mxu0 %v8325_v2  ;;  %3977 = vmatprep.subr.bf16.mxu1 %v8328_v60  ;;  %v8407_v2 = vld [vmem:[%s9703_s24 + $0x50c] ss:$16 sps:$4 sm:$0xff]   ;;  %v8402_v60 = vld [vmem:[%s9703_s24 + $0x500] ss:$16 sps:$4 sm:$0xff]  }
 0x2a6   : > { %3814 = vmatpush1.bf16.msra.mxu0 %v8323_v18  ;;  %3978 = vmatpush1.bf16.msra.mxu1 %v8326_v21  ;;  %v8405_v18 = vld [vmem:[%s9703_s24 + $0x508] ss:$16 sps:$4 sm:$0xff]   ;;  %v8410_v21 = vld [vmem:[%s9703_s24 + $0x524] ss:$16 sps:$4 sm:$0xff]  }
 0x2a7   : > { %3815 = vmatprep.subr.bf16.mxu0 %v8331_v36  ;;  %3979 = vmatprep.subr.bf16.mxu1 %v8334_v63  ;;  %v8413_v36 = vld [vmem:[%s9703_s24 + $0x52c] ss:$16 sps:$4 sm:$0xff]   ;;  %v8408_v63 = vld [vmem:[%s9703_s24 + $0x520] ss:$16 sps:$4 sm:$0xff]  }
 0x2aa   : > { %3816 = vmatpush1.bf16.msra.mxu0 %v8329_v32  ;;  %3980 = vmatpush1.bf16.msra.mxu1 %v8332_v19  ;;  %v8411_v32 = vld [vmem:[%s9703_s24 + $0x528] ss:$16 sps:$4 sm:$0xff]   ;;  %v8416_v19 = vld [vmem:[%s9703_s24 + $0x544] ss:$16 sps:$4 sm:$0xff]  }
 0x2ab   : > { %3817 = vmatprep.subr.bf16.mxu0 %v8337_v12  ;;  %3981 = vmatprep.subr.bf16.mxu1 %v8340_v15  ;;  %v8419_v12 = vld [vmem:[%s9703_s24 + $0x54c] ss:$16 sps:$4 sm:$0xff]   ;;  %v8414_v15 = vld [vmem:[%s9703_s24 + $0x540] ss:$16 sps:$4 sm:$0xff]  }
 0x2ae   : > { %3818 = vmatpush1.bf16.msra.mxu0 %v8335_v26  ;;  %3982 = vmatpush1.bf16.msra.mxu1 %v8338_v42  ;;  %v8417_v26 = vld [vmem:[%s9703_s24 + $0x548] ss:$16 sps:$4 sm:$0xff]   ;;  %v8422_v42 = vld [vmem:[%s9703_s24 + $0x564] ss:$16 sps:$4 sm:$0xff]  }
 0x2af   : > { %3819 = vmatprep.subr.bf16.mxu0 %v8343_v4  ;;  %3983 = vmatprep.subr.bf16.mxu1 %v8346_v41  ;;  %v8425_v4 = vld [vmem:[%s9703_s24 + $0x56c] ss:$16 sps:$4 sm:$0xff]   ;;  %v8420_v41 = vld [vmem:[%s9703_s24 + $0x560] ss:$16 sps:$4 sm:$0xff]  }
 0x2b2   : > { %3820 = vmatpush1.bf16.msra.mxu0 %v8341_v51  ;;  %3984 = vmatpush1.bf16.msra.mxu1 %v8344_v55  ;;  %v8423_v51 = vld [vmem:[%s9703_s24 + $0x568] ss:$16 sps:$4 sm:$0xff]   ;;  %v8428_v55 = vld [vmem:[%s9703_s24 + $0x584] ss:$16 sps:$4 sm:$0xff]  }
 0x2b3   : > { %3821 = vmatprep.subr.bf16.mxu0 %v8349_v34  ;;  %3985 = vmatprep.subr.bf16.mxu1 %v8352_v50  ;;  %v8431_v34 = vld [vmem:[%s9703_s24 + $0x58c] ss:$16 sps:$4 sm:$0xff]   ;;  %v8426_v50 = vld [vmem:[%s9703_s24 + $0x580] ss:$16 sps:$4 sm:$0xff]  }
 0x2b6   : > { %3822 = vmatpush1.bf16.msra.mxu0 %v8347_v48  ;;  %3986 = vmatpush1.bf16.msra.mxu1 %v8350_v3  ;;  %v8429_v48 = vld [vmem:[%s9703_s24 + $0x588] ss:$16 sps:$4 sm:$0xff]   ;;  %v8434_v3 = vld [vmem:[%s9703_s24 + $0x5a4] ss:$16 sps:$4 sm:$0xff]  }
 0x2b7   : > { %3832 = vmatprep.subr.bf16.mxu0 %v8356_v9  ;;  %3996 = vmatprep.subr.bf16.mxu1 %v8359_v5  ;;  %v8437_v9 = vld [vmem:[%s9703_s24 + $0x5ac] ss:$16 sps:$4 sm:$0xff]   ;;  %v8432_v5 = vld [vmem:[%s9703_s24 + $0x5a0] ss:$16 sps:$4 sm:$0xff]  }
 0x2b9   : > { %3824 = vmatmul.mubr.bf16.vlgmr.msra.gmra.mrb[0].mxu0 %v11244_v28  ;;  %3988 = vmatmul.mubr.bf16.vlgmr.msra.gmra.mrb[0].mxu1 %v11244_v28 }
 0x2ba   : > { %3833 = vmatpush1.bf16.msra.mxu0 %v8354_v17  ;;  %3997 = vmatpush1.bf16.msra.mxu1 %v8357_v39  ;;  %v8435_v17 = vld [vmem:[%s9703_s24 + $0x5a8] ss:$16 sps:$4 sm:$0xff]   ;;  %v8440_v39 = vld [vmem:[%s9703_s24 + $0x5c4] ss:$16 sps:$4 sm:$0xff]  }
 0x2bb   : > { %3834 = vmatprep.subr.bf16.mxu0 %v8362_v13  ;;  %3998 = vmatprep.subr.bf16.mxu1 %v8365_v6  ;;  %v8443_v13 = vld [vmem:[%s9703_s24 + $0x5cc] ss:$16 sps:$4 sm:$0xff]   ;;  %v2181_v6 = vcombine.high %v11248_v62, %v11248_v62  ;;  %v8444_v62 = vld [vmem:[%s9703_s24 + $0x5e0] ss:$16 sps:$4 sm:$0xff]  }
 0x2bc   : > { %3864 = vmatprep.mubr.bf16.mxu0 %v11264_v43  ;;  %4028 = vmatprep.mubr.bf16.mxu1 %v11264_v43 }
 0x2be   : > { %3835 = vmatpush1.bf16.msra.mxu0 %v8360_v58  ;;  %3999 = vmatpush1.bf16.msra.mxu1 %v8363_v31  ;;  %v8441_v58 = vld [vmem:[%s9703_s24 + $0x5c8] ss:$16 sps:$4 sm:$0xff]   ;;  %v8446_v31 = vld [vmem:[%s9703_s24 + $0x5e4] ss:$16 sps:$4 sm:$0xff]  }
 0x2bf   : > { %3836 = vmatprep.subr.bf16.mxu0 %v8368_v33  ;;  %4000 = vmatprep.subr.bf16.mxu1 %v8371_v20  ;;  %v8449_v33 = vld [vmem:[%s9703_s24 + $0x5ec] ss:$16 sps:$4 sm:$0xff]   ;;  %v11323_v20 = vrot.slane %v2181_v6, %v11132_v10 }
 0x2c0   : > { %v8521_v6 = vld [vmem:[%s9703_s24 + $0x76c] ss:$16 sps:$4 sm:$0xff]  }
 0x2c2   : > { %3837 = vmatpush1.bf16.msra.mxu0 %v8366_v0  ;;  %4001 = vmatpush1.bf16.msra.mxu1 %v8369_v49  ;;  %v8447_v0 = vld [vmem:[%s9703_s24 + $0x5e8] ss:$16 sps:$4 sm:$0xff]   ;;  %v8452_v49 = vld [vmem:[%s9703_s24 + $0x604] ss:$16 sps:$4 sm:$0xff]  }
 0x2c3   : > { %3838 = vmatprep.subr.bf16.mxu0 %v8374_v40  ;;  %4002 = vmatprep.subr.bf16.mxu1 %v8377_v37  ;;  %v8455_v40 = vld [vmem:[%s9703_s24 + $0x60c] ss:$16 sps:$4 sm:$0xff]   ;;  %v2197_v37 = vcombine.high %v11323_v20, %v11323_v20 }
 0x2c6   : > { %3839 = vmatpush1.bf16.msra.mxu0 %v8372_v61  ;;  %4003 = vmatpush1.bf16.msra.mxu1 %v8375_v56  ;;  %v11333_v61 = vpack.c.bf16 %v11254_v29, %v11254_v29  ;;  %v8450_v56 = vld [vmem:[%s9703_s24 + $0x600] ss:$16 sps:$4 sm:$0xff]  }
 0x2c7   : > { %3840 = vmatprep.subr.bf16.mxu0 %v8380_v27  ;;  %4004 = vmatprep.subr.bf16.mxu1 %v8383_v23  ;;  %v8453_v27 = vld [vmem:[%s9703_s24 + $0x608] ss:$16 sps:$4 sm:$0xff]   ;;  %v8458_v23 = vld [vmem:[%s9703_s24 + $0x624] ss:$16 sps:$4 sm:$0xff]   ;;  %v8456_v29 = vld [vmem:[%s9703_s24 + $0x620] ss:$16 sps:$4 sm:$0xff]  }
 0x2ca   : > { %3841 = vmatpush1.bf16.msra.mxu0 %v8378_v1  ;;  %4005 = vmatpush1.bf16.msra.mxu1 %v8381_v59  ;;  %v8461_v1 = vld [vmem:[%s9703_s24 + $0x62c] ss:$16 sps:$4 sm:$0xff]   ;;  %v11339_v59 = vpack.c.bf16 %v2197_v37, %v2197_v37  ;;  %v8528_v37 = vld [vmem:[%s9703_s24 + $0x7a0] ss:$16 sps:$4 sm:$0xff]  }
 0x2cb   : > { %3842 = vmatprep.subr.bf16.mxu0 %v8386_v24  ;;  %4006 = vmatprep.subr.bf16.mxu1 %v8389_v16  ;;  %v8459_v24 = vld [vmem:[%s9703_s24 + $0x628] ss:$16 sps:$4 sm:$0xff]   ;;  %v8464_v16 = vld [vmem:[%s9703_s24 + $0x644] ss:$16 sps:$4 sm:$0xff]  }
 0x2ce   : > { %3843 = vmatpush1.bf16.msra.mxu0 %v8384_v38  ;;  %4007 = vmatpush1.bf16.msra.mxu1 %v8387_v47  ;;  %v8467_v38 = vld [vmem:[%s9703_s24 + $0x64c] ss:$16 sps:$4 sm:$0xff]   ;;  %v8462_v47 = vld [vmem:[%s9703_s24 + $0x640] ss:$16 sps:$4 sm:$0xff]  }
 0x2cf   : > { %3844 = vmatprep.subr.bf16.mxu0 %v8392_v57  ;;  %4008 = vmatprep.subr.bf16.mxu1 %v8395_v45  ;;  %v8465_v57 = vld [vmem:[%s9703_s24 + $0x648] ss:$16 sps:$4 sm:$0xff]   ;;  %v8470_v45 = vld [vmem:[%s9703_s24 + $0x664] ss:$16 sps:$4 sm:$0xff]  }
 0x2d2   : > { %3845 = vmatpush1.bf16.msra.mxu0 %v8390_v22  ;;  %4009 = vmatpush1.bf16.msra.mxu1 %v8393_v53  ;;  %v8473_v22 = vld [vmem:[%s9703_s24 + $0x66c] ss:$16 sps:$4 sm:$0xff]   ;;  %v8468_v53 = vld [vmem:[%s9703_s24 + $0x660] ss:$16 sps:$4 sm:$0xff]  }
 0x2d3   : > { %3846 = vmatprep.subr.bf16.mxu0 %v8398_v52  ;;  %4010 = vmatprep.subr.bf16.mxu1 %v8401_v44  ;;  %v8471_v52 = vld [vmem:[%s9703_s24 + $0x668] ss:$16 sps:$4 sm:$0xff]   ;;  %v8476_v44 = vld [vmem:[%s9703_s24 + $0x684] ss:$16 sps:$4 sm:$0xff]  }
 0x2d6   : > { %3847 = vmatpush1.bf16.msra.mxu0 %v8396_v35  ;;  %4011 = vmatpush1.bf16.msra.mxu1 %v8399_v7  ;;  %v8479_v35 = vld [vmem:[%s9703_s24 + $0x68c] ss:$16 sps:$4 sm:$0xff]   ;;  %v8474_v7 = vld [vmem:[%s9703_s24 + $0x680] ss:$16 sps:$4 sm:$0xff]  }
 0x2d7   : > { %3848 = vmatprep.subr.bf16.mxu0 %v8404_v25  ;;  %4012 = vmatprep.subr.bf16.mxu1 %v8407_v2  ;;  %v8477_v25 = vld [vmem:[%s9703_s24 + $0x688] ss:$16 sps:$4 sm:$0xff]   ;;  %v8482_v2 = vld [vmem:[%s9703_s24 + $0x6a4] ss:$16 sps:$4 sm:$0xff]  }
 0x2da   : > { %3849 = vmatpush1.bf16.msra.mxu0 %v8402_v60  ;;  %4013 = vmatpush1.bf16.msra.mxu1 %v8405_v18  ;;  %v8485_v60 = vld [vmem:[%s9703_s24 + $0x6ac] ss:$16 sps:$4 sm:$0xff]   ;;  %v8480_v18 = vld [vmem:[%s9703_s24 + $0x6a0] ss:$16 sps:$4 sm:$0xff]  }
 0x2db   : > { %3850 = vmatprep.subr.bf16.mxu0 %v8410_v21  ;;  %4014 = vmatprep.subr.bf16.mxu1 %v8413_v36  ;;  %v8483_v21 = vld [vmem:[%s9703_s24 + $0x6a8] ss:$16 sps:$4 sm:$0xff]   ;;  %v8488_v36 = vld [vmem:[%s9703_s24 + $0x6c4] ss:$16 sps:$4 sm:$0xff]  }
 0x2de   : > { %3851 = vmatpush1.bf16.msra.mxu0 %v8408_v63  ;;  %4015 = vmatpush1.bf16.msra.mxu1 %v8411_v32  ;;  %v8491_v63 = vld [vmem:[%s9703_s24 + $0x6cc] ss:$16 sps:$4 sm:$0xff]   ;;  %v8486_v32 = vld [vmem:[%s9703_s24 + $0x6c0] ss:$16 sps:$4 sm:$0xff]  }
 0x2df   : > { %3852 = vmatprep.subr.bf16.mxu0 %v8416_v19  ;;  %4016 = vmatprep.subr.bf16.mxu1 %v8419_v12  ;;  %v8489_v19 = vld [vmem:[%s9703_s24 + $0x6c8] ss:$16 sps:$4 sm:$0xff]   ;;  %v8494_v12 = vld [vmem:[%s9703_s24 + $0x6e4] ss:$16 sps:$4 sm:$0xff]  }
 0x2e2   : > { %3853 = vmatpush1.bf16.msra.mxu0 %v8414_v15  ;;  %4017 = vmatpush1.bf16.msra.mxu1 %v8417_v26  ;;  %v8497_v15 = vld [vmem:[%s9703_s24 + $0x6ec] ss:$16 sps:$4 sm:$0xff]   ;;  %v8492_v26 = vld [vmem:[%s9703_s24 + $0x6e0] ss:$16 sps:$4 sm:$0xff]  }
 0x2e3   : > { %3854 = vmatprep.subr.bf16.mxu0 %v8422_v42  ;;  %4018 = vmatprep.subr.bf16.mxu1 %v8425_v4  ;;  %v8495_v42 = vld [vmem:[%s9703_s24 + $0x6e8] ss:$16 sps:$4 sm:$0xff]   ;;  %v8500_v4 = vld [vmem:[%s9703_s24 + $0x704] ss:$16 sps:$4 sm:$0xff]  }
 0x2e6   : > { %3855 = vmatpush1.bf16.msra.mxu0 %v8420_v41  ;;  %4019 = vmatpush1.bf16.msra.mxu1 %v8423_v51  ;;  %v8503_v41 = vld [vmem:[%s9703_s24 + $0x70c] ss:$16 sps:$4 sm:$0xff]   ;;  %v8498_v51 = vld [vmem:[%s9703_s24 + $0x700] ss:$16 sps:$4 sm:$0xff]  }
 0x2e7   : > { %3856 = vmatprep.subr.bf16.mxu0 %v8428_v55  ;;  %4020 = vmatprep.subr.bf16.mxu1 %v8431_v34  ;;  %v8501_v55 = vld [vmem:[%s9703_s24 + $0x708] ss:$16 sps:$4 sm:$0xff]   ;;  %v8506_v34 = vld [vmem:[%s9703_s24 + $0x724] ss:$16 sps:$4 sm:$0xff]  }
 0x2ea   : > { %3857 = vmatpush1.bf16.msra.mxu0 %v8426_v50  ;;  %4021 = vmatpush1.bf16.msra.mxu1 %v8429_v48  ;;  %v8509_v50 = vld [vmem:[%s9703_s24 + $0x72c] ss:$16 sps:$4 sm:$0xff]   ;;  %v8504_v48 = vld [vmem:[%s9703_s24 + $0x720] ss:$16 sps:$4 sm:$0xff]  }
 0x2eb   : > { %3858 = vmatprep.subr.bf16.mxu0 %v8434_v3  ;;  %4022 = vmatprep.subr.bf16.mxu1 %v8437_v9  ;;  %v8507_v3 = vld [vmem:[%s9703_s24 + $0x728] ss:$16 sps:$4 sm:$0xff]   ;;  %v8512_v9 = vld [vmem:[%s9703_s24 + $0x744] ss:$16 sps:$4 sm:$0xff]  }
 0x2ee   : > { %3859 = vmatpush1.bf16.msra.mxu0 %v8432_v5  ;;  %4023 = vmatpush1.bf16.msra.mxu1 %v8435_v17  ;;  %v8515_v5 = vld [vmem:[%s9703_s24 + $0x74c] ss:$16 sps:$4 sm:$0xff]   ;;  %v8510_v17 = vld [vmem:[%s9703_s24 + $0x740] ss:$16 sps:$4 sm:$0xff]  }
 0x2ef   : > { %3860 = vmatprep.subr.bf16.mxu0 %v8440_v39  ;;  %4024 = vmatprep.subr.bf16.mxu1 %v8443_v13  ;;  %v8513_v39 = vld [vmem:[%s9703_s24 + $0x748] ss:$16 sps:$4 sm:$0xff]   ;;  %v8518_v13 = vld [vmem:[%s9703_s24 + $0x764] ss:$16 sps:$4 sm:$0xff]  }
 0x2f2   : > { %3861 = vmatpush1.bf16.msra.mxu0 %v8438_v54  ;;  %4025 = vmatpush1.bf16.msra.mxu1 %v8441_v58  ;;  %v8516_v54 = vld [vmem:[%s9703_s24 + $0x760] ss:$16 sps:$4 sm:$0xff]   ;;  %v8519_v58 = vld [vmem:[%s9703_s24 + $0x768] ss:$16 sps:$4 sm:$0xff]  }
 0x2f3   : > { %3862 = vmatprep.subr.bf16.mxu0 %v8446_v31  ;;  %4026 = vmatprep.subr.bf16.mxu1 %v8449_v33  ;;  %v8524_v31 = vld [vmem:[%s9703_s24 + $0x784] ss:$16 sps:$4 sm:$0xff]   ;;  %v8527_v33 = vld [vmem:[%s9703_s24 + $0x78c] ss:$16 sps:$4 sm:$0xff]  }
 0x2f6   : > { %3863 = vmatpush1.bf16.msra.mxu0 %v8444_v62  ;;  %4027 = vmatpush1.bf16.msra.mxu1 %v8447_v0  ;;  %v8522_v62 = vld [vmem:[%s9703_s24 + $0x780] ss:$16 sps:$4 sm:$0xff]   ;;  %v8525_v0 = vld [vmem:[%s9703_s24 + $0x788] ss:$16 sps:$4 sm:$0xff]  }
 0x2f7   : > { %3873 = vmatprep.subr.bf16.mxu0 %v8452_v49  ;;  %4037 = vmatprep.subr.bf16.mxu1 %v8455_v40  ;;  %v8530_v49 = vld [vmem:[%s9703_s24 + $0x7a4] ss:$16 sps:$4 sm:$0xff]   ;;  %v8533_v40 = vld [vmem:[%s9703_s24 + $0x7ac] ss:$16 sps:$4 sm:$0xff]  }
 0x2f9   : > { %3865 = vmatmul.mubr.bf16.vlgmr.msra.gmra.mrb[0].mxu0 %v11333_v61  ;;  %4029 = vmatmul.mubr.bf16.vlgmr.msra.gmra.mrb[0].mxu1 %v11333_v61 }
 0x2fa   : > { %3874 = vmatpush1.bf16.msra.mxu0 %v8450_v56  ;;  %4038 = vmatpush1.bf16.msra.mxu1 %v8453_v27  ;;  %v8531_v56 = vld [vmem:[%s9703_s24 + $0x7a8] ss:$16 sps:$4 sm:$0xff]   ;;  %v8536_v27 = vld [vmem:[%s9703_s24 + $0x7c4] ss:$16 sps:$4 sm:$0xff]  }
 0x2fb   : > { %3875 = vmatprep.subr.bf16.mxu0 %v8458_v23  ;;  %4039 = vmatprep.subr.bf16.mxu1 %v8461_v1  ;;  %v8539_v23 = vld [vmem:[%s9703_s24 + $0x7cc] ss:$16 sps:$4 sm:$0xff]   ;;  %v8534_v1 = vld [vmem:[%s9703_s24 + $0x7c0] ss:$16 sps:$4 sm:$0xff]  }
 0x2fc   : > { %3905 = vmatprep.mubr.bf16.mxu0 %v11339_v59  ;;  %4069 = vmatprep.mubr.bf16.mxu1 %v11339_v59 }
 0x2fe   : > { %3876 = vmatpush1.bf16.msra.mxu0 %v8456_v29  ;;  %4040 = vmatpush1.bf16.msra.mxu1 %v8459_v24  ;;  %v8537_v29 = vld [vmem:[%s9703_s24 + $0x7c8] ss:$16 sps:$4 sm:$0xff]   ;;  %v8542_v24 = vld [vmem:[%s9703_s24 + $0x7e4] ss:$16 sps:$4 sm:$0xff]  }
 0x2ff   : > { %3877 = vmatprep.subr.bf16.mxu0 %v8464_v16  ;;  %4041 = vmatprep.subr.bf16.mxu1 %v8467_v38  ;;  %v8545_v16 = vld [vmem:[%s9703_s24 + $0x7ec] ss:$16 sps:$4 sm:$0xff]   ;;  %v8540_v38 = vld [vmem:[%s9703_s24 + $0x7e0] ss:$16 sps:$4 sm:$0xff]  }
 0x302   : > { %3878 = vmatpush1.bf16.msra.mxu0 %v8462_v47  ;;  %4042 = vmatpush1.bf16.msra.mxu1 %v8465_v57  ;;  %v8543_v47 = vld [vmem:[%s9703_s24 + $0x7e8] ss:$16 sps:$4 sm:$0xff]   ;;  %v8549_v57 = vld [vmem:[%s9703_s24 + $0x804] ss:$16 sps:$4 sm:$0xff]  }
 0x303   : > { %3879 = vmatprep.subr.bf16.mxu0 %v8470_v45  ;;  %4043 = vmatprep.subr.bf16.mxu1 %v8473_v22  ;;  %v8552_v45 = vld [vmem:[%s9703_s24 + $0x80c] ss:$16 sps:$4 sm:$0xff]   ;;  %v11407_v22 = vpack.c.bf16 %v11323_v20, %v11323_v20  ;;  %v8553_v20 = vld [vmem:[%s9703_s24 + $0x820] ss:$16 sps:$4 sm:$0xff]  }
 0x306   : > { %3880 = vmatpush1.bf16.msra.mxu0 %v8468_v53  ;;  %4044 = vmatpush1.bf16.msra.mxu1 %v8471_v52  ;;  %v8547_v53 = vld [vmem:[%s9703_s24 + $0x800] ss:$16 sps:$4 sm:$0xff]   ;;  %v8550_v52 = vld [vmem:[%s9703_s24 + $0x808] ss:$16 sps:$4 sm:$0xff]  }
 0x307   : > { %3881 = vmatprep.subr.bf16.mxu0 %v8476_v44  ;;  %4045 = vmatprep.subr.bf16.mxu1 %v8479_v35  ;;  %v8555_v44 = vld [vmem:[%s9703_s24 + $0x824] ss:$16 sps:$4 sm:$0xff]   ;;  %v8558_v35 = vld [vmem:[%s9703_s24 + $0x82c] ss:$16 sps:$4 sm:$0xff]  }
 0x30a   : > { %3882 = vmatpush1.bf16.msra.mxu0 %v8474_v7  ;;  %4046 = vmatpush1.bf16.msra.mxu1 %v8477_v25  ;;  %v8556_v7 = vld [vmem:[%s9703_s24 + $0x828] ss:$16 sps:$4 sm:$0xff]   ;;  %v8561_v25 = vld [vmem:[%s9703_s24 + $0x844] ss:$16 sps:$4 sm:$0xff]  }
 0x30b   : > { %3883 = vmatprep.subr.bf16.mxu0 %v8482_v2  ;;  %4047 = vmatprep.subr.bf16.mxu1 %v8485_v60  ;;  %v8564_v2 = vld [vmem:[%s9703_s24 + $0x84c] ss:$16 sps:$4 sm:$0xff]   ;;  %v8559_v60 = vld [vmem:[%s9703_s24 + $0x840] ss:$16 sps:$4 sm:$0xff]  }
 0x30e   : > { %3884 = vmatpush1.bf16.msra.mxu0 %v8480_v18  ;;  %4048 = vmatpush1.bf16.msra.mxu1 %v8483_v21  ;;  %v8562_v18 = vld [vmem:[%s9703_s24 + $0x848] ss:$16 sps:$4 sm:$0xff]   ;;  %v8567_v21 = vld [vmem:[%s9703_s24 + $0x864] ss:$16 sps:$4 sm:$0xff]  }
 0x30f   : > { %3885 = vmatprep.subr.bf16.mxu0 %v8488_v36  ;;  %4049 = vmatprep.subr.bf16.mxu1 %v8491_v63  ;;  %v8570_v36 = vld [vmem:[%s9703_s24 + $0x86c] ss:$16 sps:$4 sm:$0xff]   ;;  %v8565_v63 = vld [vmem:[%s9703_s24 + $0x860] ss:$16 sps:$4 sm:$0xff]  }
 0x312   : > { %3886 = vmatpush1.bf16.msra.mxu0 %v8486_v32  ;;  %4050 = vmatpush1.bf16.msra.mxu1 %v8489_v19  ;;  %v8568_v32 = vld [vmem:[%s9703_s24 + $0x868] ss:$16 sps:$4 sm:$0xff]   ;;  %v8576_v19 = vld [vmem:[%s9703_s24 + $0x88c] ss:$16 sps:$4 sm:$0xff]  }
 0x313   : > { %3887 = vmatprep.subr.bf16.mxu0 %v8494_v12  ;;  %4051 = vmatprep.subr.bf16.mxu1 %v8497_v15  ;;  %v8571_v12 = vld [vmem:[%s9703_s24 + $0x880] ss:$16 sps:$4 sm:$0xff]   ;;  %v8574_v15 = vld [vmem:[%s9703_s24 + $0x888] ss:$16 sps:$4 sm:$0xff]  }
 0x316   : > { %3888 = vmatpush1.bf16.msra.mxu0 %v8492_v26  ;;  %4052 = vmatpush1.bf16.msra.mxu1 %v8495_v42  ;;  %v8579_v26 = vld [vmem:[%s9703_s24 + $0x8a4] ss:$16 sps:$4 sm:$0xff]   ;;  %v8582_v42 = vld [vmem:[%s9703_s24 + $0x8ac] ss:$16 sps:$4 sm:$0xff]  }
 0x317   : > { %3889 = vmatprep.subr.bf16.mxu0 %v8500_v4  ;;  %4053 = vmatprep.subr.bf16.mxu1 %v8503_v41  ;;  %v8577_v4 = vld [vmem:[%s9703_s24 + $0x8a0] ss:$16 sps:$4 sm:$0xff]   ;;  %v8580_v41 = vld [vmem:[%s9703_s24 + $0x8a8] ss:$16 sps:$4 sm:$0xff]  }
 0x31a   : > { %3890 = vmatpush1.bf16.msra.mxu0 %v8498_v51  ;;  %4054 = vmatpush1.bf16.msra.mxu1 %v8501_v55  ;;  %v8585_v51 = vld [vmem:[%s9703_s24 + $0x8c4] ss:$16 sps:$4 sm:$0xff]   ;;  %v8588_v55 = vld [vmem:[%s9703_s24 + $0x8cc] ss:$16 sps:$4 sm:$0xff]  }
 0x31b   : > { %3891 = vmatprep.subr.bf16.mxu0 %v8506_v34  ;;  %4055 = vmatprep.subr.bf16.mxu1 %v8509_v50  ;;  %v8583_v34 = vld [vmem:[%s9703_s24 + $0x8c0] ss:$16 sps:$4 sm:$0xff]   ;;  %v8586_v50 = vld [vmem:[%s9703_s24 + $0x8c8] ss:$16 sps:$4 sm:$0xff]  }
 0x31e   : > { %3892 = vmatpush1.bf16.msra.mxu0 %v8504_v48  ;;  %4056 = vmatpush1.bf16.msra.mxu1 %v8507_v3  ;;  %v8591_v48 = vld [vmem:[%s9703_s24 + $0x8e4] ss:$16 sps:$4 sm:$0xff]   ;;  %v8594_v3 = vld [vmem:[%s9703_s24 + $0x8ec] ss:$16 sps:$4 sm:$0xff]  }
 0x31f   : > { %3893 = vmatprep.subr.bf16.mxu0 %v8512_v9  ;;  %4057 = vmatprep.subr.bf16.mxu1 %v8515_v5  ;;  %v8589_v9 = vld [vmem:[%s9703_s24 + $0x8e0] ss:$16 sps:$4 sm:$0xff]   ;;  %v8592_v5 = vld [vmem:[%s9703_s24 + $0x8e8] ss:$16 sps:$4 sm:$0xff]  }
 0x322   : > { %3894 = vmatpush1.bf16.msra.mxu0 %v8510_v17  ;;  %4058 = vmatpush1.bf16.msra.mxu1 %v8513_v39  ;;  %v8597_v17 = vld [vmem:[%s9703_s24 + $0x904] ss:$16 sps:$4 sm:$0xff]   ;;  %v8600_v39 = vld [vmem:[%s9703_s24 + $0x90c] ss:$16 sps:$4 sm:$0xff]  }
 0x323   : > { %3895 = vmatprep.subr.bf16.mxu0 %v8518_v13  ;;  %4059 = vmatprep.subr.bf16.mxu1 %v8521_v6  ;;  %v8595_v13 = vld [vmem:[%s9703_s24 + $0x900] ss:$16 sps:$4 sm:$0xff]   ;;  %v8598_v6 = vld [vmem:[%s9703_s24 + $0x908] ss:$16 sps:$4 sm:$0xff]  }
 0x326   : > { %3896 = vmatpush1.bf16.msra.mxu0 %v8516_v54  ;;  %4060 = vmatpush1.bf16.msra.mxu1 %v8519_v58  ;;  %v8603_v54 = vld [vmem:[%s9703_s24 + $0x924] ss:$16 sps:$4 sm:$0xff]   ;;  %v8606_v58 = vld [vmem:[%s9703_s24 + $0x92c] ss:$16 sps:$4 sm:$0xff]  }
 0x327   : > { %3897 = vmatprep.subr.bf16.mxu0 %v8524_v31  ;;  %4061 = vmatprep.subr.bf16.mxu1 %v8527_v33  ;;  %v8601_v31 = vld [vmem:[%s9703_s24 + $0x920] ss:$16 sps:$4 sm:$0xff]   ;;  %v8604_v33 = vld [vmem:[%s9703_s24 + $0x928] ss:$16 sps:$4 sm:$0xff]  }
 0x32a   : > { %3898 = vmatpush1.bf16.msra.mxu0 %v8522_v62  ;;  %4062 = vmatpush1.bf16.msra.mxu1 %v8525_v0  ;;  %v8609_v62 = vld [vmem:[%s9703_s24 + $0x944] ss:$16 sps:$4 sm:$0xff]   ;;  %v8612_v0 = vld [vmem:[%s9703_s24 + $0x94c] ss:$16 sps:$4 sm:$0xff]  }
 0x32b   : > { %3899 = vmatprep.subr.bf16.mxu0 %v8530_v49  ;;  %4063 = vmatprep.subr.bf16.mxu1 %v8533_v40  ;;  %v8607_v49 = vld [vmem:[%s9703_s24 + $0x940] ss:$16 sps:$4 sm:$0xff]   ;;  %v8610_v40 = vld [vmem:[%s9703_s24 + $0x948] ss:$16 sps:$4 sm:$0xff]  }
 0x32e   : > { %3900 = vmatpush1.bf16.msra.mxu0 %v8528_v37  ;;  %4064 = vmatpush1.bf16.msra.mxu1 %v8531_v56  ;;  %v8615_v37 = vld [vmem:[%s9703_s24 + $0x964] ss:$16 sps:$4 sm:$0xff]   ;;  %v8618_v56 = vld [vmem:[%s9703_s24 + $0x96c] ss:$16 sps:$4 sm:$0xff]  }
 0x32f   : > { %3901 = vmatprep.subr.bf16.mxu0 %v8536_v27  ;;  %4065 = vmatprep.subr.bf16.mxu1 %v8539_v23  ;;  %v8613_v27 = vld [vmem:[%s9703_s24 + $0x960] ss:$16 sps:$4 sm:$0xff]   ;;  %v8616_v23 = vld [vmem:[%s9703_s24 + $0x968] ss:$16 sps:$4 sm:$0xff]  }
 0x332   : > { %3902 = vmatpush1.bf16.msra.mxu0 %v8534_v1  ;;  %4066 = vmatpush1.bf16.msra.mxu1 %v8537_v29  ;;  %v8621_v1 = vld [vmem:[%s9703_s24 + $0x984] ss:$16 sps:$4 sm:$0xff]   ;;  %v8624_v29 = vld [vmem:[%s9703_s24 + $0x98c] ss:$16 sps:$4 sm:$0xff]  }
 0x333   : > { %3903 = vmatprep.subr.bf16.mxu0 %v8542_v24  ;;  %4067 = vmatprep.subr.bf16.mxu1 %v8545_v16  ;;  %v8619_v24 = vld [vmem:[%s9703_s24 + $0x980] ss:$16 sps:$4 sm:$0xff]   ;;  %v8622_v16 = vld [vmem:[%s9703_s24 + $0x988] ss:$16 sps:$4 sm:$0xff]  }
 0x336   : > { %3904 = vmatpush1.bf16.msra.mxu0 %v8540_v38  ;;  %4068 = vmatpush1.bf16.msra.mxu1 %v8543_v47  ;;  %v8627_v38 = vld [vmem:[%s9703_s24 + $0x9a4] ss:$16 sps:$4 sm:$0xff]   ;;  %v8630_v47 = vld [vmem:[%s9703_s24 + $0x9ac] ss:$16 sps:$4 sm:$0xff]  }
 0x337   : > { %5645 = vmatprep.subr.bf16.mxu0 %v8549_v57  ;;  %5809 = vmatprep.subr.bf16.mxu1 %v8552_v45  ;;  %v8625_v57 = vld [vmem:[%s9703_s24 + $0x9a0] ss:$16 sps:$4 sm:$0xff]   ;;  %v8628_v45 = vld [vmem:[%s9703_s24 + $0x9a8] ss:$16 sps:$4 sm:$0xff]  }
 0x339   : > { %3906 = vmatmul.mubr.bf16.vlgmr.msra.gmra.mrb[0].mxu0 %v11407_v22  ;;  %4070 = vmatmul.mubr.bf16.vlgmr.msra.gmra.mrb[0].mxu1 %v11407_v22 }
 0x33a   : > { %5646 = vmatpush1.bf16.msra.mxu0 %v8547_v53  ;;  %5810 = vmatpush1.bf16.msra.mxu1 %v8550_v52  ;;  %v8633_v53 = vld [vmem:[%s9703_s24 + $0x9c4] ss:$16 sps:$4 sm:$0xff]   ;;  %v8636_v52 = vld [vmem:[%s9703_s24 + $0x9cc] ss:$16 sps:$4 sm:$0xff]  }
 0x33b   : > { %5647 = vmatprep.subr.bf16.mxu0 %v8555_v44  ;;  %5811 = vmatprep.subr.bf16.mxu1 %v8558_v35  ;;  %v8631_v44 = vld [vmem:[%s9703_s24 + $0x9c0] ss:$16 sps:$4 sm:$0xff]   ;;  %v8634_v35 = vld [vmem:[%s9703_s24 + $0x9c8] ss:$16 sps:$4 sm:$0xff]  }
 0x33c   : > { %5677 = vmatprep.mubr.bf16.mxu0 %v11145_v14  ;;  %5841 = vmatprep.mubr.bf16.mxu1 %v11145_v14  ;;  %v8573_v14 = vld [vmem:[%s9703_s24 + $0x884] ss:$16 sps:$4 sm:$0xff]  }
 0x33e   : > { %5648 = vmatpush1.bf16.msra.mxu0 %v8553_v20  ;;  %5812 = vmatpush1.bf16.msra.mxu1 %v8556_v7  ;;  %v8639_v20 = vld [vmem:[%s9703_s24 + $0x9e4] ss:$16 sps:$4 sm:$0xff]   ;;  %v8642_v7 = vld [vmem:[%s9703_s24 + $0x9ec] ss:$16 sps:$4 sm:$0xff]  }
 0x33f   : > { %5649 = vmatprep.subr.bf16.mxu0 %v8561_v25  ;;  %5813 = vmatprep.subr.bf16.mxu1 %v8564_v2  ;;  %v8637_v25 = vld [vmem:[%s9703_s24 + $0x9e0] ss:$16 sps:$4 sm:$0xff]   ;;  %v8640_v2 = vld [vmem:[%s9703_s24 + $0x9e8] ss:$16 sps:$4 sm:$0xff]  }
 0x342   : > { %5650 = vmatpush1.bf16.msra.mxu0 %v8559_v60  ;;  %5814 = vmatpush1.bf16.msra.mxu1 %v8562_v18  ;;  %v8645_v60 = vld [vmem:[%s9703_s24 + $0xa04] ss:$16 sps:$4 sm:$0xff]   ;;  %v8648_v18 = vld [vmem:[%s9703_s24 + $0xa0c] ss:$16 sps:$4 sm:$0xff]  }
 0x343   : > { %5651 = vmatprep.subr.bf16.mxu0 %v8567_v21  ;;  %5815 = vmatprep.subr.bf16.mxu1 %v8570_v36  ;;  %v8643_v21 = vld [vmem:[%s9703_s24 + $0xa00] ss:$16 sps:$4 sm:$0xff]   ;;  %v8646_v36 = vld [vmem:[%s9703_s24 + $0xa08] ss:$16 sps:$4 sm:$0xff]  }
 0x346   : > { %5652 = vmatpush1.bf16.msra.mxu0 %v8565_v63  ;;  %5816 = vmatpush1.bf16.msra.mxu1 %v8568_v32  ;;  %v8651_v63 = vld [vmem:[%s9703_s24 + $0xa24] ss:$16 sps:$4 sm:$0xff]   ;;  %v8654_v32 = vld [vmem:[%s9703_s24 + $0xa2c] ss:$16 sps:$4 sm:$0xff]  }
 0x347   : > { %5653 = vmatprep.subr.bf16.mxu0 %v8573_v14  ;;  %5817 = vmatprep.subr.bf16.mxu1 %v8576_v19  ;;  %v8649_v14 = vld [vmem:[%s9703_s24 + $0xa20] ss:$16 sps:$4 sm:$0xff]   ;;  %v8652_v19 = vld [vmem:[%s9703_s24 + $0xa28] ss:$16 sps:$4 sm:$0xff]  }
 0x34a   : > { %5654 = vmatpush1.bf16.msra.mxu0 %v8571_v12  ;;  %5818 = vmatpush1.bf16.msra.mxu1 %v8574_v15  ;;  %v8657_v12 = vld [vmem:[%s9703_s24 + $0xa44] ss:$16 sps:$4 sm:$0xff]   ;;  %v8660_v15 = vld [vmem:[%s9703_s24 + $0xa4c] ss:$16 sps:$4 sm:$0xff]  }
 0x34b   : > { %5655 = vmatprep.subr.bf16.mxu0 %v8579_v26  ;;  %5819 = vmatprep.subr.bf16.mxu1 %v8582_v42  ;;  %v8658_v26 = vld [vmem:[%s9703_s24 + $0xa48] ss:$16 sps:$4 sm:$0xff]   ;;  %v8663_v42 = vld [vmem:[%s9703_s24 + $0xa64] ss:$16 sps:$4 sm:$0xff]  }
 0x34e   : > { %5656 = vmatpush1.bf16.msra.mxu0 %v8577_v4  ;;  %5820 = vmatpush1.bf16.msra.mxu1 %v8580_v41  ;;  %v8666_v4 = vld [vmem:[%s9703_s24 + $0xa6c] ss:$16 sps:$4 sm:$0xff]   ;;  %v8661_v41 = vld [vmem:[%s9703_s24 + $0xa60] ss:$16 sps:$4 sm:$0xff]  }
 0x34f   : > { %5657 = vmatprep.subr.bf16.mxu0 %v8585_v51  ;;  %5821 = vmatprep.subr.bf16.mxu1 %v8588_v55  ;;  %v8664_v51 = vld [vmem:[%s9703_s24 + $0xa68] ss:$16 sps:$4 sm:$0xff]   ;;  %v8672_v55 = vld [vmem:[%s9703_s24 + $0xa8c] ss:$16 sps:$4 sm:$0xff]  }
 0x352   : > { %5658 = vmatpush1.bf16.msra.mxu0 %v8583_v34  ;;  %5822 = vmatpush1.bf16.msra.mxu1 %v8586_v50  ;;  %v8667_v34 = vld [vmem:[%s9703_s24 + $0xa80] ss:$16 sps:$4 sm:$0xff]   ;;  %v8670_v50 = vld [vmem:[%s9703_s24 + $0xa88] ss:$16 sps:$4 sm:$0xff]  }
 0x353   : > { %5659 = vmatprep.subr.bf16.mxu0 %v8591_v48  ;;  %5823 = vmatprep.subr.bf16.mxu1 %v8594_v3  ;;  %v8675_v48 = vld [vmem:[%s9703_s24 + $0xaa4] ss:$16 sps:$4 sm:$0xff]   ;;  %v8678_v3 = vld [vmem:[%s9703_s24 + $0xaac] ss:$16 sps:$4 sm:$0xff]  }
 0x356   : > { %5660 = vmatpush1.bf16.msra.mxu0 %v8589_v9  ;;  %5824 = vmatpush1.bf16.msra.mxu1 %v8592_v5  ;;  %v8673_v9 = vld [vmem:[%s9703_s24 + $0xaa0] ss:$16 sps:$4 sm:$0xff]   ;;  %v8676_v5 = vld [vmem:[%s9703_s24 + $0xaa8] ss:$16 sps:$4 sm:$0xff]  }
 0x357   : > { %5661 = vmatprep.subr.bf16.mxu0 %v8597_v17  ;;  %5825 = vmatprep.subr.bf16.mxu1 %v8600_v39  ;;  %v8681_v17 = vld [vmem:[%s9703_s24 + $0xac4] ss:$16 sps:$4 sm:$0xff]   ;;  %v8684_v39 = vld [vmem:[%s9703_s24 + $0xacc] ss:$16 sps:$4 sm:$0xff]  }
 0x35a   : > { %5662 = vmatpush1.bf16.msra.mxu0 %v8595_v13  ;;  %5826 = vmatpush1.bf16.msra.mxu1 %v8598_v6  ;;  %v8679_v13 = vld [vmem:[%s9703_s24 + $0xac0] ss:$16 sps:$4 sm:$0xff]   ;;  %v8682_v6 = vld [vmem:[%s9703_s24 + $0xac8] ss:$16 sps:$4 sm:$0xff]  }
 0x35b   : > { %5663 = vmatprep.subr.bf16.mxu0 %v8603_v54  ;;  %5827 = vmatprep.subr.bf16.mxu1 %v8606_v58  ;;  %v8687_v54 = vld [vmem:[%s9703_s24 + $0xae4] ss:$16 sps:$4 sm:$0xff]   ;;  %v8690_v58 = vld [vmem:[%s9703_s24 + $0xaec] ss:$16 sps:$4 sm:$0xff]  }
 0x35e   : > { %5664 = vmatpush1.bf16.msra.mxu0 %v8601_v31  ;;  %5828 = vmatpush1.bf16.msra.mxu1 %v8604_v33  ;;  %v8685_v31 = vld [vmem:[%s9703_s24 + $0xae0] ss:$16 sps:$4 sm:$0xff]   ;;  %v8688_v33 = vld [vmem:[%s9703_s24 + $0xae8] ss:$16 sps:$4 sm:$0xff]  }
 0x35f   : > { %5665 = vmatprep.subr.bf16.mxu0 %v8609_v62  ;;  %5829 = vmatprep.subr.bf16.mxu1 %v8612_v0  ;;  %v8693_v62 = vld [vmem:[%s9703_s24 + $0xb04] ss:$16 sps:$4 sm:$0xff]   ;;  %v8696_v0 = vld [vmem:[%s9703_s24 + $0xb0c] ss:$16 sps:$4 sm:$0xff]  }
 0x362   : > { %5666 = vmatpush1.bf16.msra.mxu0 %v8607_v49  ;;  %5830 = vmatpush1.bf16.msra.mxu1 %v8610_v40  ;;  %v8691_v49 = vld [vmem:[%s9703_s24 + $0xb00] ss:$16 sps:$4 sm:$0xff]   ;;  %v8694_v40 = vld [vmem:[%s9703_s24 + $0xb08] ss:$16 sps:$4 sm:$0xff]  }
 0x363   : > { %5667 = vmatprep.subr.bf16.mxu0 %v8615_v37  ;;  %5831 = vmatprep.subr.bf16.mxu1 %v8618_v56  ;;  %v8699_v37 = vld [vmem:[%s9703_s24 + $0xb24] ss:$16 sps:$4 sm:$0xff]   ;;  %v8702_v56 = vld [vmem:[%s9703_s24 + $0xb2c] ss:$16 sps:$4 sm:$0xff]  }
 0x366   : > { %5668 = vmatpush1.bf16.msra.mxu0 %v8613_v27  ;;  %5832 = vmatpush1.bf16.msra.mxu1 %v8616_v23  ;;  %v8697_v27 = vld [vmem:[%s9703_s24 + $0xb20] ss:$16 sps:$4 sm:$0xff]   ;;  %v8700_v23 = vld [vmem:[%s9703_s24 + $0xb28] ss:$16 sps:$4 sm:$0xff]  }
 0x367   : > { %5669 = vmatprep.subr.bf16.mxu0 %v8621_v1  ;;  %5833 = vmatprep.subr.bf16.mxu1 %v8624_v29  ;;  %v8705_v1 = vld [vmem:[%s9703_s24 + $0xb44] ss:$16 sps:$4 sm:$0xff]   ;;  %v8708_v29 = vld [vmem:[%s9703_s24 + $0xb4c] ss:$16 sps:$4 sm:$0xff]  }
 0x36a   : > { %5670 = vmatpush1.bf16.msra.mxu0 %v8619_v24  ;;  %5834 = vmatpush1.bf16.msra.mxu1 %v8622_v16  ;;  %v8703_v24 = vld [vmem:[%s9703_s24 + $0xb40] ss:$16 sps:$4 sm:$0xff]   ;;  %v8706_v16 = vld [vmem:[%s9703_s24 + $0xb48] ss:$16 sps:$4 sm:$0xff]  }
 0x36b   : > { %5671 = vmatprep.subr.bf16.mxu0 %v8627_v38  ;;  %5835 = vmatprep.subr.bf16.mxu1 %v8630_v47  ;;  %v8711_v38 = vld [vmem:[%s9703_s24 + $0xb64] ss:$16 sps:$4 sm:$0xff]   ;;  %v8714_v47 = vld [vmem:[%s9703_s24 + $0xb6c] ss:$16 sps:$4 sm:$0xff]  }
 0x36e   : > { %5672 = vmatpush1.bf16.msra.mxu0 %v8625_v57  ;;  %5836 = vmatpush1.bf16.msra.mxu1 %v8628_v45  ;;  %v8709_v57 = vld [vmem:[%s9703_s24 + $0xb60] ss:$16 sps:$4 sm:$0xff]   ;;  %v8712_v45 = vld [vmem:[%s9703_s24 + $0xb68] ss:$16 sps:$4 sm:$0xff]  }
 0x36f   : > { %5673 = vmatprep.subr.bf16.mxu0 %v8633_v53  ;;  %5837 = vmatprep.subr.bf16.mxu1 %v8636_v52  ;;  %v8717_v53 = vld [vmem:[%s9703_s24 + $0xb84] ss:$16 sps:$4 sm:$0xff]   ;;  %v8720_v52 = vld [vmem:[%s9703_s24 + $0xb8c] ss:$16 sps:$4 sm:$0xff]  }
 0x372   : > { %5674 = vmatpush1.bf16.msra.mxu0 %v8631_v44  ;;  %5838 = vmatpush1.bf16.msra.mxu1 %v8634_v35  ;;  %v8715_v44 = vld [vmem:[%s9703_s24 + $0xb80] ss:$16 sps:$4 sm:$0xff]   ;;  %v8718_v35 = vld [vmem:[%s9703_s24 + $0xb88] ss:$16 sps:$4 sm:$0xff]  }
 0x373   : > { %5675 = vmatprep.subr.bf16.mxu0 %v8639_v20  ;;  %5839 = vmatprep.subr.bf16.mxu1 %v8642_v7  ;;  %v8723_v20 = vld [vmem:[%s9703_s24 + $0xba4] ss:$16 sps:$4 sm:$0xff]   ;;  %v8726_v7 = vld [vmem:[%s9703_s24 + $0xbac] ss:$16 sps:$4 sm:$0xff]  }
 0x376   : > { %5676 = vmatpush1.bf16.msra.mxu0 %v8637_v25  ;;  %5840 = vmatpush1.bf16.msra.mxu1 %v8640_v2  ;;  %v8721_v25 = vld [vmem:[%s9703_s24 + $0xba0] ss:$16 sps:$4 sm:$0xff]   ;;  %v8724_v2 = vld [vmem:[%s9703_s24 + $0xba8] ss:$16 sps:$4 sm:$0xff]  }
 0x377   : > { %5686 = vmatprep.subr.bf16.mxu0 %v8645_v60  ;;  %5850 = vmatprep.subr.bf16.mxu1 %v8648_v18  ;;  %v8729_v60 = vld [vmem:[%s9703_s24 + $0xbc4] ss:$16 sps:$4 sm:$0xff]   ;;  %v8732_v18 = vld [vmem:[%s9703_s24 + $0xbcc] ss:$16 sps:$4 sm:$0xff]  }
 0x379   : > { %5678 = vmatmul.mubr.bf16.vlgmr.msra.gmra.mrb[4].mxu0 %v11170_v30  ;;  %5842 = vmatmul.mubr.bf16.vlgmr.msra.gmra.mrb[4].mxu1 %v11170_v30  ;;  %v8655_v30 = vld [vmem:[%s9703_s24 + $0xa40] ss:$16 sps:$4 sm:$0xff]  }
 0x37a   : > { %5687 = vmatpush1.bf16.msra.mxu0 %v8643_v21  ;;  %5851 = vmatpush1.bf16.msra.mxu1 %v8646_v36  ;;  %v8727_v21 = vld [vmem:[%s9703_s24 + $0xbc0] ss:$16 sps:$4 sm:$0xff]   ;;  %v8730_v36 = vld [vmem:[%s9703_s24 + $0xbc8] ss:$16 sps:$4 sm:$0xff]  }
 0x37b   : > { %5688 = vmatprep.subr.bf16.mxu0 %v8651_v63  ;;  %5852 = vmatprep.subr.bf16.mxu1 %v8654_v32  ;;  %v8735_v63 = vld [vmem:[%s9703_s24 + $0xbe4] ss:$16 sps:$4 sm:$0xff]   ;;  %v8738_v32 = vld [vmem:[%s9703_s24 + $0xbec] ss:$16 sps:$4 sm:$0xff]  }
 0x37c   : > { %5718 = vmatprep.mubr.bf16.mxu0 %v11175_v11  ;;  %5882 = vmatprep.mubr.bf16.mxu1 %v11175_v11  ;;  %v8669_v11 = vld [vmem:[%s9703_s24 + $0xa84] ss:$16 sps:$4 sm:$0xff]  }
 0x37e   : > { %5689 = vmatpush1.bf16.msra.mxu0 %v8649_v14  ;;  %5853 = vmatpush1.bf16.msra.mxu1 %v8652_v19  ;;  %v8733_v14 = vld [vmem:[%s9703_s24 + $0xbe0] ss:$16 sps:$4 sm:$0xff]   ;;  %v8736_v19 = vld [vmem:[%s9703_s24 + $0xbe8] ss:$16 sps:$4 sm:$0xff]  }
 0x37f   : > { %5690 = vmatprep.subr.bf16.mxu0 %v8657_v12  ;;  %5854 = vmatprep.subr.bf16.mxu1 %v8660_v15  ;;  %v8741_v12 = vld [vmem:[%s9703_s24 + $0xc04] ss:$16 sps:$4 sm:$0xff]   ;;  %v8744_v15 = vld [vmem:[%s9703_s24 + $0xc0c] ss:$16 sps:$4 sm:$0xff]  }
 0x382   : > { %5691 = vmatpush1.bf16.msra.mxu0 %v8655_v30  ;;  %5855 = vmatpush1.bf16.msra.mxu1 %v8658_v26  ;;  %v8739_v30 = vld [vmem:[%s9703_s24 + $0xc00] ss:$16 sps:$4 sm:$0xff]   ;;  %v8742_v26 = vld [vmem:[%s9703_s24 + $0xc08] ss:$16 sps:$4 sm:$0xff]  }
 0x383   : > { %5692 = vmatprep.subr.bf16.mxu0 %v8663_v42  ;;  %5856 = vmatprep.subr.bf16.mxu1 %v8666_v4  ;;  %v8747_v42 = vld [vmem:[%s9703_s24 + $0xc24] ss:$16 sps:$4 sm:$0xff]   ;;  %v8750_v4 = vld [vmem:[%s9703_s24 + $0xc2c] ss:$16 sps:$4 sm:$0xff]  }
 0x386   : > { %5693 = vmatpush1.bf16.msra.mxu0 %v8661_v41  ;;  %5857 = vmatpush1.bf16.msra.mxu1 %v8664_v51  ;;  %v8745_v41 = vld [vmem:[%s9703_s24 + $0xc20] ss:$16 sps:$4 sm:$0xff]   ;;  %v8748_v51 = vld [vmem:[%s9703_s24 + $0xc28] ss:$16 sps:$4 sm:$0xff]  }
 0x387   : > { %5694 = vmatprep.subr.bf16.mxu0 %v8669_v11  ;;  %5858 = vmatprep.subr.bf16.mxu1 %v8672_v55  ;;  %v8753_v11 = vld [vmem:[%s9703_s24 + $0xc44] ss:$16 sps:$4 sm:$0xff]   ;;  %v8756_v55 = vld [vmem:[%s9703_s24 + $0xc4c] ss:$16 sps:$4 sm:$0xff]  }
 0x38a   : > { %5695 = vmatpush1.bf16.msra.mxu0 %v8667_v34  ;;  %5859 = vmatpush1.bf16.msra.mxu1 %v8670_v50  ;;  %v8754_v34 = vld [vmem:[%s9703_s24 + $0xc48] ss:$16 sps:$4 sm:$0xff]   ;;  %v8759_v50 = vld [vmem:[%s9703_s24 + $0xc64] ss:$16 sps:$4 sm:$0xff]  }
 0x38b   : > { %5696 = vmatprep.subr.bf16.mxu0 %v8675_v48  ;;  %5860 = vmatprep.subr.bf16.mxu1 %v8678_v3  ;;  %v8762_v48 = vld [vmem:[%s9703_s24 + $0xc6c] ss:$16 sps:$4 sm:$0xff]   ;;  %v8757_v3 = vld [vmem:[%s9703_s24 + $0xc60] ss:$16 sps:$4 sm:$0xff]  }
 0x38e   : > { %5697 = vmatpush1.bf16.msra.mxu0 %v8673_v9  ;;  %5861 = vmatpush1.bf16.msra.mxu1 %v8676_v5  ;;  %v8760_v9 = vld [vmem:[%s9703_s24 + $0xc68] ss:$16 sps:$4 sm:$0xff]   ;;  %v8768_v5 = vld [vmem:[%s9703_s24 + $0xc8c] ss:$16 sps:$4 sm:$0xff]  }
 0x38f   : > { %5698 = vmatprep.subr.bf16.mxu0 %v8681_v17  ;;  %5862 = vmatprep.subr.bf16.mxu1 %v8684_v39  ;;  %v8763_v17 = vld [vmem:[%s9703_s24 + $0xc80] ss:$16 sps:$4 sm:$0xff]   ;;  %v8766_v39 = vld [vmem:[%s9703_s24 + $0xc88] ss:$16 sps:$4 sm:$0xff]  }
 0x392   : > { %5699 = vmatpush1.bf16.msra.mxu0 %v8679_v13  ;;  %5863 = vmatpush1.bf16.msra.mxu1 %v8682_v6  ;;  %v8771_v13 = vld [vmem:[%s9703_s24 + $0xca4] ss:$16 sps:$4 sm:$0xff]   ;;  %v8774_v6 = vld [vmem:[%s9703_s24 + $0xcac] ss:$16 sps:$4 sm:$0xff]  }
 0x393   : > { %5700 = vmatprep.subr.bf16.mxu0 %v8687_v54  ;;  %5864 = vmatprep.subr.bf16.mxu1 %v8690_v58  ;;  %v8769_v54 = vld [vmem:[%s9703_s24 + $0xca0] ss:$16 sps:$4 sm:$0xff]   ;;  %v8772_v58 = vld [vmem:[%s9703_s24 + $0xca8] ss:$16 sps:$4 sm:$0xff]  }
 0x396   : > { %5701 = vmatpush1.bf16.msra.mxu0 %v8685_v31  ;;  %5865 = vmatpush1.bf16.msra.mxu1 %v8688_v33  ;;  %v8777_v31 = vld [vmem:[%s9703_s24 + $0xcc4] ss:$16 sps:$4 sm:$0xff]   ;;  %v8780_v33 = vld [vmem:[%s9703_s24 + $0xccc] ss:$16 sps:$4 sm:$0xff]  }
 0x397   : > { %5702 = vmatprep.subr.bf16.mxu0 %v8693_v62  ;;  %5866 = vmatprep.subr.bf16.mxu1 %v8696_v0  ;;  %v8775_v62 = vld [vmem:[%s9703_s24 + $0xcc0] ss:$16 sps:$4 sm:$0xff]   ;;  %v8778_v0 = vld [vmem:[%s9703_s24 + $0xcc8] ss:$16 sps:$4 sm:$0xff]  }
 0x39a   : > { %5703 = vmatpush1.bf16.msra.mxu0 %v8691_v49  ;;  %5867 = vmatpush1.bf16.msra.mxu1 %v8694_v40  ;;  %v8783_v49 = vld [vmem:[%s9703_s24 + $0xce4] ss:$16 sps:$4 sm:$0xff]   ;;  %v8786_v40 = vld [vmem:[%s9703_s24 + $0xcec] ss:$16 sps:$4 sm:$0xff]  }
 0x39b   : > { %5704 = vmatprep.subr.bf16.mxu0 %v8699_v37  ;;  %5868 = vmatprep.subr.bf16.mxu1 %v8702_v56  ;;  %v8781_v37 = vld [vmem:[%s9703_s24 + $0xce0] ss:$16 sps:$4 sm:$0xff]   ;;  %v8784_v56 = vld [vmem:[%s9703_s24 + $0xce8] ss:$16 sps:$4 sm:$0xff]  }
 0x39e   : > { %5705 = vmatpush1.bf16.msra.mxu0 %v8697_v27  ;;  %5869 = vmatpush1.bf16.msra.mxu1 %v8700_v23  ;;  %v8789_v27 = vld [vmem:[%s9703_s24 + $0xd04] ss:$16 sps:$4 sm:$0xff]   ;;  %v8792_v23 = vld [vmem:[%s9703_s24 + $0xd0c] ss:$16 sps:$4 sm:$0xff]  }
 0x39f   : > { %5706 = vmatprep.subr.bf16.mxu0 %v8705_v1  ;;  %5870 = vmatprep.subr.bf16.mxu1 %v8708_v29  ;;  %v8787_v1 = vld [vmem:[%s9703_s24 + $0xd00] ss:$16 sps:$4 sm:$0xff]   ;;  %v8790_v29 = vld [vmem:[%s9703_s24 + $0xd08] ss:$16 sps:$4 sm:$0xff]  }
 0x3a2   : > { %5707 = vmatpush1.bf16.msra.mxu0 %v8703_v24  ;;  %5871 = vmatpush1.bf16.msra.mxu1 %v8706_v16  ;;  %v8795_v24 = vld [vmem:[%s9703_s24 + $0xd24] ss:$16 sps:$4 sm:$0xff]   ;;  %v8798_v16 = vld [vmem:[%s9703_s24 + $0xd2c] ss:$16 sps:$4 sm:$0xff]  }
 0x3a3   : > { %5708 = vmatprep.subr.bf16.mxu0 %v8711_v38  ;;  %5872 = vmatprep.subr.bf16.mxu1 %v8714_v47  ;;  %v8793_v38 = vld [vmem:[%s9703_s24 + $0xd20] ss:$16 sps:$4 sm:$0xff]   ;;  %v8796_v47 = vld [vmem:[%s9703_s24 + $0xd28] ss:$16 sps:$4 sm:$0xff]  }
 0x3a6   : > { %5709 = vmatpush1.bf16.msra.mxu0 %v8709_v57  ;;  %5873 = vmatpush1.bf16.msra.mxu1 %v8712_v45  ;;  %v8801_v57 = vld [vmem:[%s9703_s24 + $0xd44] ss:$16 sps:$4 sm:$0xff]   ;;  %v8804_v45 = vld [vmem:[%s9703_s24 + $0xd4c] ss:$16 sps:$4 sm:$0xff]  }
 0x3a7   : > { %5710 = vmatprep.subr.bf16.mxu0 %v8717_v53  ;;  %5874 = vmatprep.subr.bf16.mxu1 %v8720_v52  ;;  %v8799_v53 = vld [vmem:[%s9703_s24 + $0xd40] ss:$16 sps:$4 sm:$0xff]   ;;  %v8802_v52 = vld [vmem:[%s9703_s24 + $0xd48] ss:$16 sps:$4 sm:$0xff]  }
 0x3aa   : > { %5711 = vmatpush1.bf16.msra.mxu0 %v8715_v44  ;;  %5875 = vmatpush1.bf16.msra.mxu1 %v8718_v35  ;;  %v8807_v44 = vld [vmem:[%s9703_s24 + $0xd64] ss:$16 sps:$4 sm:$0xff]   ;;  %v8810_v35 = vld [vmem:[%s9703_s24 + $0xd6c] ss:$16 sps:$4 sm:$0xff]  }
 0x3ab   : > { %5712 = vmatprep.subr.bf16.mxu0 %v8723_v20  ;;  %5876 = vmatprep.subr.bf16.mxu1 %v8726_v7  ;;  %v8805_v20 = vld [vmem:[%s9703_s24 + $0xd60] ss:$16 sps:$4 sm:$0xff]   ;;  %v8808_v7 = vld [vmem:[%s9703_s24 + $0xd68] ss:$16 sps:$4 sm:$0xff]  }
 0x3ae   : > { %5713 = vmatpush1.bf16.msra.mxu0 %v8721_v25  ;;  %5877 = vmatpush1.bf16.msra.mxu1 %v8724_v2  ;;  %v8813_v25 = vld [vmem:[%s9703_s24 + $0xd84] ss:$16 sps:$4 sm:$0xff]   ;;  %v8816_v2 = vld [vmem:[%s9703_s24 + $0xd8c] ss:$16 sps:$4 sm:$0xff]  }
 0x3af   : > { %5714 = vmatprep.subr.bf16.mxu0 %v8729_v60  ;;  %5878 = vmatprep.subr.bf16.mxu1 %v8732_v18  ;;  %v8811_v60 = vld [vmem:[%s9703_s24 + $0xd80] ss:$16 sps:$4 sm:$0xff]   ;;  %v8814_v18 = vld [vmem:[%s9703_s24 + $0xd88] ss:$16 sps:$4 sm:$0xff]  }
 0x3b2   : > { %5715 = vmatpush1.bf16.msra.mxu0 %v8727_v21  ;;  %5879 = vmatpush1.bf16.msra.mxu1 %v8730_v36  ;;  %v8819_v21 = vld [vmem:[%s9703_s24 + $0xda4] ss:$16 sps:$4 sm:$0xff]   ;;  %v8822_v36 = vld [vmem:[%s9703_s24 + $0xdac] ss:$16 sps:$4 sm:$0xff]  }
 0x3b3   : > { %5716 = vmatprep.subr.bf16.mxu0 %v8735_v63  ;;  %5880 = vmatprep.subr.bf16.mxu1 %v8738_v32  ;;  %v8817_v63 = vld [vmem:[%s9703_s24 + $0xda0] ss:$16 sps:$4 sm:$0xff]   ;;  %v8820_v32 = vld [vmem:[%s9703_s24 + $0xda8] ss:$16 sps:$4 sm:$0xff]  }
 0x3b6   : > { %5717 = vmatpush1.bf16.msra.mxu0 %v8733_v14  ;;  %5881 = vmatpush1.bf16.msra.mxu1 %v8736_v19  ;;  %v8825_v14 = vld [vmem:[%s9703_s24 + $0xdc4] ss:$16 sps:$4 sm:$0xff]   ;;  %v8828_v19 = vld [vmem:[%s9703_s24 + $0xdcc] ss:$16 sps:$4 sm:$0xff]  }
 0x3b7   : > { %5727 = vmatprep.subr.bf16.mxu0 %v8741_v12  ;;  %5891 = vmatprep.subr.bf16.mxu1 %v8744_v15  ;;  %v8823_v12 = vld [vmem:[%s9703_s24 + $0xdc0] ss:$16 sps:$4 sm:$0xff]   ;;  %v8826_v15 = vld [vmem:[%s9703_s24 + $0xdc8] ss:$16 sps:$4 sm:$0xff]  }
 0x3b9   : > { %5719 = vmatmul.mubr.bf16.vlgmr.msra.gmra.mrb[4].mxu0 %v11244_v28  ;;  %5883 = vmatmul.mubr.bf16.vlgmr.msra.gmra.mrb[4].mxu1 %v11244_v28  ;;  %v8751_v28 = vld [vmem:[%s9703_s24 + $0xc40] ss:$16 sps:$4 sm:$0xff]  }
 0x3ba   : > { %5728 = vmatpush1.bf16.msra.mxu0 %v8739_v30  ;;  %5892 = vmatpush1.bf16.msra.mxu1 %v8742_v26  ;;  %v8831_v30 = vld [vmem:[%s9703_s24 + $0xde4] ss:$16 sps:$4 sm:$0xff]   ;;  %v8834_v26 = vld [vmem:[%s9703_s24 + $0xdec] ss:$16 sps:$4 sm:$0xff]  }
 0x3bb   : > { %5729 = vmatprep.subr.bf16.mxu0 %v8747_v42  ;;  %5893 = vmatprep.subr.bf16.mxu1 %v8750_v4  ;;  %v8829_v42 = vld [vmem:[%s9703_s24 + $0xde0] ss:$16 sps:$4 sm:$0xff]   ;;  %v8832_v4 = vld [vmem:[%s9703_s24 + $0xde8] ss:$16 sps:$4 sm:$0xff]  }
 0x3bc   : > { %5759 = vmatprep.mubr.bf16.mxu0 %v11264_v43  ;;  %5923 = vmatprep.mubr.bf16.mxu1 %v11264_v43  ;;  %v8765_v43 = vld [vmem:[%s9703_s24 + $0xc84] ss:$16 sps:$4 sm:$0xff]  }
 0x3be   : > { %5730 = vmatpush1.bf16.msra.mxu0 %v8745_v41  ;;  %5894 = vmatpush1.bf16.msra.mxu1 %v8748_v51  ;;  %v8837_v41 = vld [vmem:[%s9703_s24 + $0xe04] ss:$16 sps:$4 sm:$0xff]   ;;  %v8840_v51 = vld [vmem:[%s9703_s24 + $0xe0c] ss:$16 sps:$4 sm:$0xff]  }
 0x3bf   : > { %5731 = vmatprep.subr.bf16.mxu0 %v8753_v11  ;;  %5895 = vmatprep.subr.bf16.mxu1 %v8756_v55  ;;  %v8835_v11 = vld [vmem:[%s9703_s24 + $0xe00] ss:$16 sps:$4 sm:$0xff]   ;;  %v8838_v55 = vld [vmem:[%s9703_s24 + $0xe08] ss:$16 sps:$4 sm:$0xff]  }
 0x3c2   : > { %5732 = vmatpush1.bf16.msra.mxu0 %v8751_v28  ;;  %5896 = vmatpush1.bf16.msra.mxu1 %v8754_v34  ;;  %v8843_v28 = vld [vmem:[%s9703_s24 + $0xe24] ss:$16 sps:$4 sm:$0xff]   ;;  %v8846_v34 = vld [vmem:[%s9703_s24 + $0xe2c] ss:$16 sps:$4 sm:$0xff]  }
 0x3c3   : > { %5733 = vmatprep.subr.bf16.mxu0 %v8759_v50  ;;  %5897 = vmatprep.subr.bf16.mxu1 %v8762_v48  ;;  %v8841_v50 = vld [vmem:[%s9703_s24 + $0xe20] ss:$16 sps:$4 sm:$0xff]   ;;  %v8844_v48 = vld [vmem:[%s9703_s24 + $0xe28] ss:$16 sps:$4 sm:$0xff]  }
 0x3c6   : > { %5734 = vmatpush1.bf16.msra.mxu0 %v8757_v3  ;;  %5898 = vmatpush1.bf16.msra.mxu1 %v8760_v9  ;;  %v8849_v3 = vld [vmem:[%s9703_s24 + $0xe44] ss:$16 sps:$4 sm:$0xff]   ;;  %v8852_v9 = vld [vmem:[%s9703_s24 + $0xe4c] ss:$16 sps:$4 sm:$0xff]  }
 0x3c7   : > { %5735 = vmatprep.subr.bf16.mxu0 %v8765_v43  ;;  %5899 = vmatprep.subr.bf16.mxu1 %v8768_v5  ;;  %v8850_v43 = vld [vmem:[%s9703_s24 + $0xe48] ss:$16 sps:$4 sm:$0xff]   ;;  %v8855_v5 = vld [vmem:[%s9703_s24 + $0xe64] ss:$16 sps:$4 sm:$0xff]  }
 0x3ca   : > { %5736 = vmatpush1.bf16.msra.mxu0 %v8763_v17  ;;  %5900 = vmatpush1.bf16.msra.mxu1 %v8766_v39  ;;  %v8858_v17 = vld [vmem:[%s9703_s24 + $0xe6c] ss:$16 sps:$4 sm:$0xff]   ;;  %v8853_v39 = vld [vmem:[%s9703_s24 + $0xe60] ss:$16 sps:$4 sm:$0xff]  }
 0x3cb   : > { %5737 = vmatprep.subr.bf16.mxu0 %v8771_v13  ;;  %5901 = vmatprep.subr.bf16.mxu1 %v8774_v6  ;;  %v8856_v13 = vld [vmem:[%s9703_s24 + $0xe68] ss:$16 sps:$4 sm:$0xff]   ;;  %v8864_v6 = vld [vmem:[%s9703_s24 + $0xe8c] ss:$16 sps:$4 sm:$0xff]  }
 0x3ce   : > { %5738 = vmatpush1.bf16.msra.mxu0 %v8769_v54  ;;  %5902 = vmatpush1.bf16.msra.mxu1 %v8772_v58  ;;  %v8859_v54 = vld [vmem:[%s9703_s24 + $0xe80] ss:$16 sps:$4 sm:$0xff]   ;;  %v8862_v58 = vld [vmem:[%s9703_s24 + $0xe88] ss:$16 sps:$4 sm:$0xff]  }
 0x3cf   : > { %5739 = vmatprep.subr.bf16.mxu0 %v8777_v31  ;;  %5903 = vmatprep.subr.bf16.mxu1 %v8780_v33  ;;  %v8867_v31 = vld [vmem:[%s9703_s24 + $0xea4] ss:$16 sps:$4 sm:$0xff]   ;;  %v8870_v33 = vld [vmem:[%s9703_s24 + $0xeac] ss:$16 sps:$4 sm:$0xff]  }
 0x3d2   : > { %5740 = vmatpush1.bf16.msra.mxu0 %v8775_v62  ;;  %5904 = vmatpush1.bf16.msra.mxu1 %v8778_v0  ;;  %v8865_v62 = vld [vmem:[%s9703_s24 + $0xea0] ss:$16 sps:$4 sm:$0xff]   ;;  %v8868_v0 = vld [vmem:[%s9703_s24 + $0xea8] ss:$16 sps:$4 sm:$0xff]  }
 0x3d3   : > { %5741 = vmatprep.subr.bf16.mxu0 %v8783_v49  ;;  %5905 = vmatprep.subr.bf16.mxu1 %v8786_v40  ;;  %v8873_v49 = vld [vmem:[%s9703_s24 + $0xec4] ss:$16 sps:$4 sm:$0xff]   ;;  %v8876_v40 = vld [vmem:[%s9703_s24 + $0xecc] ss:$16 sps:$4 sm:$0xff]  }
 0x3d6   : > { %5742 = vmatpush1.bf16.msra.mxu0 %v8781_v37  ;;  %5906 = vmatpush1.bf16.msra.mxu1 %v8784_v56 }
 0x3d7   : > { %5743 = vmatprep.subr.bf16.mxu0 %v8789_v27  ;;  %5907 = vmatprep.subr.bf16.mxu1 %v8792_v23 }
 0x3da   : > { %5744 = vmatpush1.bf16.msra.mxu0 %v8787_v1  ;;  %5908 = vmatpush1.bf16.msra.mxu1 %v8790_v29 }
 0x3db   : > { %5745 = vmatprep.subr.bf16.mxu0 %v8795_v24  ;;  %5909 = vmatprep.subr.bf16.mxu1 %v8798_v16  ;;  %v8871_v24 = vld [vmem:[%s9703_s24 + $0xec0] ss:$16 sps:$4 sm:$0xff]   ;;  %v8874_v16 = vld [vmem:[%s9703_s24 + $0xec8] ss:$16 sps:$4 sm:$0xff]  }
 0x3de   : > { %5746 = vmatpush1.bf16.msra.mxu0 %v8793_v38  ;;  %5910 = vmatpush1.bf16.msra.mxu1 %v8796_v47 }
 0x3df   : > { %5747 = vmatprep.subr.bf16.mxu0 %v8801_v57  ;;  %5911 = vmatprep.subr.bf16.mxu1 %v8804_v45  ;;  %v8879_v57 = vld [vmem:[%s9703_s24 + $0xee4] ss:$16 sps:$4 sm:$0xff]   ;;  %v8882_v45 = vld [vmem:[%s9703_s24 + $0xeec] ss:$16 sps:$4 sm:$0xff]  }
 0x3e2   : > { %5748 = vmatpush1.bf16.msra.mxu0 %v8799_v53  ;;  %5912 = vmatpush1.bf16.msra.mxu1 %v8802_v52  ;;  %v8877_v53 = vld [vmem:[%s9703_s24 + $0xee0] ss:$16 sps:$4 sm:$0xff]   ;;  %v8880_v52 = vld [vmem:[%s9703_s24 + $0xee8] ss:$16 sps:$4 sm:$0xff]  }
 0x3e3   : > { %5749 = vmatprep.subr.bf16.mxu0 %v8807_v44  ;;  %5913 = vmatprep.subr.bf16.mxu1 %v8810_v35  ;;  %v8885_v44 = vld [vmem:[%s9703_s24 + $0xf04] ss:$16 sps:$4 sm:$0xff]   ;;  %v8888_v35 = vld [vmem:[%s9703_s24 + $0xf0c] ss:$16 sps:$4 sm:$0xff]  }
 0x3e6   : > { %5750 = vmatpush1.bf16.msra.mxu0 %v8805_v20  ;;  %5914 = vmatpush1.bf16.msra.mxu1 %v8808_v7  ;;  %v8883_v20 = vld [vmem:[%s9703_s24 + $0xf00] ss:$16 sps:$4 sm:$0xff]   ;;  %v8886_v7 = vld [vmem:[%s9703_s24 + $0xf08] ss:$16 sps:$4 sm:$0xff]  }
 0x3e7   : > { %5751 = vmatprep.subr.bf16.mxu0 %v8813_v25  ;;  %5915 = vmatprep.subr.bf16.mxu1 %v8816_v2  ;;  %v8891_v2 = vld [vmem:[%s9703_s24 + $0xf24] ss:$16 sps:$4 sm:$0xff]  }
 0x3ea   : > { %5752 = vmatpush1.bf16.msra.mxu0 %v8811_v60  ;;  %5916 = vmatpush1.bf16.msra.mxu1 %v8814_v18  ;;  %v8894_v60 = vld [vmem:[%s9703_s24 + $0xf2c] ss:$16 sps:$4 sm:$0xff]  }
 0x3eb   : > { %5753 = vmatprep.subr.bf16.mxu0 %v8819_v21  ;;  %5917 = vmatprep.subr.bf16.mxu1 %v8822_v36 }
 0x3ee   : > { %5754 = vmatpush1.bf16.msra.mxu0 %v8817_v63  ;;  %5918 = vmatpush1.bf16.msra.mxu1 %v8820_v32  ;;  %v8889_v32 = vld [vmem:[%s9703_s24 + $0xf20] ss:$16 sps:$4 sm:$0xff]  }
 0x3ef   : > { %5755 = vmatprep.subr.bf16.mxu0 %v8825_v14  ;;  %5919 = vmatprep.subr.bf16.mxu1 %v8828_v19  ;;  %v8892_v14 = vld [vmem:[%s9703_s24 + $0xf28] ss:$16 sps:$4 sm:$0xff]  }
 0x3f2   : > { %5756 = vmatpush1.bf16.msra.mxu0 %v8823_v12  ;;  %5920 = vmatpush1.bf16.msra.mxu1 %v8826_v15  ;;  %v8897_v12 = vld [vmem:[%s9703_s24 + $0xf44] ss:$16 sps:$4 sm:$0xff]   ;;  %v8900_v15 = vld [vmem:[%s9703_s24 + $0xf4c] ss:$16 sps:$4 sm:$0xff]  }
 0x3f3   : > { %5757 = vmatprep.subr.bf16.mxu0 %v8831_v30  ;;  %5921 = vmatprep.subr.bf16.mxu1 %v8834_v26 }
 0x3f6   : > { %5758 = vmatpush1.bf16.msra.mxu0 %v8829_v42  ;;  %5922 = vmatpush1.bf16.msra.mxu1 %v8832_v4  ;;  %v8895_v42 = vld [vmem:[%s9703_s24 + $0xf40] ss:$16 sps:$4 sm:$0xff]   ;;  %v8898_v4 = vld [vmem:[%s9703_s24 + $0xf48] ss:$16 sps:$4 sm:$0xff]  }
 0x3f7   : > { %5768 = vmatprep.subr.bf16.mxu0 %v8837_v41  ;;  %5932 = vmatprep.subr.bf16.mxu1 %v8840_v51  ;;  %v8903_v41 = vld [vmem:[%s9703_s24 + $0xf64] ss:$16 sps:$4 sm:$0xff]   ;;  %v8906_v51 = vld [vmem:[%s9703_s24 + $0xf6c] ss:$16 sps:$4 sm:$0xff]  }
 0x3f9   : > { %5760 = vmatmul.mubr.bf16.vlgmr.msra.gmra.mrb[4].mxu0 %v11333_v61  ;;  %5924 = vmatmul.mubr.bf16.vlgmr.msra.gmra.mrb[4].mxu1 %v11333_v61  ;;  %v8847_v61 = vld [vmem:[%s9703_s24 + $0xe40] ss:$16 sps:$4 sm:$0xff]  }
 0x3fa   : > { %5769 = vmatpush1.bf16.msra.mxu0 %v8835_v11  ;;  %5933 = vmatpush1.bf16.msra.mxu1 %v8838_v55  ;;  %v8901_v55 = vld [vmem:[%s9703_s24 + $0xf60] ss:$16 sps:$4 sm:$0xff]  }
 0x3fb   : > { %5770 = vmatprep.subr.bf16.mxu0 %v8843_v28  ;;  %5934 = vmatprep.subr.bf16.mxu1 %v8846_v34  ;;  %v8904_v28 = vld [vmem:[%s9703_s24 + $0xf68] ss:$16 sps:$4 sm:$0xff]   ;;  %v8909_v34 = vld [vmem:[%s9703_s24 + $0xf84] ss:$16 sps:$4 sm:$0xff]  }
 0x3fc   : > { %5800 = vmatprep.mubr.bf16.mxu0 %v11339_v59  ;;  %5964 = vmatprep.mubr.bf16.mxu1 %v11339_v59  ;;  %v8861_v59 = vld [vmem:[%s9703_s24 + $0xe84] ss:$16 sps:$4 sm:$0xff]  }
 0x3fe   : > { %5771 = vmatpush1.bf16.msra.mxu0 %v8841_v50  ;;  %5935 = vmatpush1.bf16.msra.mxu1 %v8844_v48  ;;  %v8912_v50 = vld [vmem:[%s9703_s24 + $0xf8c] ss:$16 sps:$4 sm:$0xff]   ;;  %v8907_v48 = vld [vmem:[%s9703_s24 + $0xf80] ss:$16 sps:$4 sm:$0xff]  }
 0x3ff   : > { %5772 = vmatprep.subr.bf16.mxu0 %v8849_v3  ;;  %5936 = vmatprep.subr.bf16.mxu1 %v8852_v9  ;;  %v8910_v3 = vld [vmem:[%s9703_s24 + $0xf88] ss:$16 sps:$4 sm:$0xff]   ;;  %v8915_v9 = vld [vmem:[%s9703_s24 + $0xfa4] ss:$16 sps:$4 sm:$0xff]  }
 0x402   : > { %5773 = vmatpush1.bf16.msra.mxu0 %v8847_v61  ;;  %5937 = vmatpush1.bf16.msra.mxu1 %v8850_v43  ;;  %v8918_v61 = vld [vmem:[%s9703_s24 + $0xfac] ss:$16 sps:$4 sm:$0xff]   ;;  %v8913_v43 = vld [vmem:[%s9703_s24 + $0xfa0] ss:$16 sps:$4 sm:$0xff]  }
 0x403   : > { %5774 = vmatprep.subr.bf16.mxu0 %v8855_v5  ;;  %5938 = vmatprep.subr.bf16.mxu1 %v8858_v17  ;;  %v8916_v5 = vld [vmem:[%s9703_s24 + $0xfa8] ss:$16 sps:$4 sm:$0xff]   ;;  %v8921_v17 = vld [vmem:[%s9703_s24 + $0xfc4] ss:$16 sps:$4 sm:$0xff]  }
 0x406   : > { %5775 = vmatpush1.bf16.msra.mxu0 %v8853_v39  ;;  %5939 = vmatpush1.bf16.msra.mxu1 %v8856_v13  ;;  %v8924_v39 = vld [vmem:[%s9703_s24 + $0xfcc] ss:$16 sps:$4 sm:$0xff]   ;;  %v8919_v13 = vld [vmem:[%s9703_s24 + $0xfc0] ss:$16 sps:$4 sm:$0xff]  }
 0x407   : > { %5776 = vmatprep.subr.bf16.mxu0 %v8861_v59  ;;  %5940 = vmatprep.subr.bf16.mxu1 %v8864_v6  ;;  %v8922_v59 = vld [vmem:[%s9703_s24 + $0xfc8] ss:$16 sps:$4 sm:$0xff]   ;;  %v8927_v6 = vld [vmem:[%s9703_s24 + $0xfe4] ss:$16 sps:$4 sm:$0xff]  }
 0x40a   : > { %5777 = vmatpush1.bf16.msra.mxu0 %v8859_v54  ;;  %5941 = vmatpush1.bf16.msra.mxu1 %v8862_v58  ;;  %v8930_v54 = vld [vmem:[%s9703_s24 + $0xfec] ss:$16 sps:$4 sm:$0xff]   ;;  %v8925_v58 = vld [vmem:[%s9703_s24 + $0xfe0] ss:$16 sps:$4 sm:$0xff]  }
 0x40b   : > { %5778 = vmatprep.subr.bf16.mxu0 %v8867_v31  ;;  %5942 = vmatprep.subr.bf16.mxu1 %v8870_v33  ;;  %v8928_v31 = vld [vmem:[%s9703_s24 + $0xfe8] ss:$16 sps:$4 sm:$0xff]   ;;  %s5996_s24 = scalar_lea.vmem [#allocation4], %s7741_s5 }
 0x40c   : > { %v3907_v37 = vpop.f32.mrb[0].mxu0  ;;  %v4071_v56 = vpop.f32.mrb[0].mxu1 }
 0x40d   : > { %8931 = vtanh.f32 %v3907_v37  ;;  %v3909_v27 = vpop.f32.mrb[1].mxu0  ;;  %v4073_v23 = vpop.f32.mrb[1].mxu1 }
 0x40e   : > { %8933 = vtanh.f32 %v4071_v56  ;;  %v3911_v1 = vpop.f32.mrb[2].mxu0  ;;  %v4075_v29 = vpop.f32.mrb[2].mxu1  ;;  %5779 = vmatpush1.bf16.msra.mxu0 %v8865_v62  ;;  %5943 = vmatpush1.bf16.msra.mxu1 %v8868_v0 }
 0x40f   : > { %8935 = vtanh.f32 %v3909_v27  ;;  %v3912_v38 = vpop.f32.mrb[3].mxu0  ;;  %v4076_v47 = vpop.f32.mrb[3].mxu1  ;;  %5780 = vmatprep.subr.bf16.mxu0 %v8873_v49  ;;  %5944 = vmatprep.subr.bf16.mxu1 %v8876_v40 }
 0x410   : > { %8937 = vtanh.f32 %v4073_v23  ;;  %v6361_v38 = vld [vmem:[%s9710_s29 + $0x18] sm:$0xff] (!%p7733_p2)  ;;  %v6358_v47 = vld [vmem:[%s9710_s29] sm:$0xff] (!%p7733_p2) }
 0x412   : > { %5781 = vmatpush1.bf16.msra.mxu0 %v8871_v24  ;;  %5945 = vmatpush1.bf16.msra.mxu1 %v8874_v16 }
 0x413   : > { %5782 = vmatprep.subr.bf16.mxu0 %v8879_v57  ;;  %5946 = vmatprep.subr.bf16.mxu1 %v8882_v45  ;;  %v6360_v45 = vld [vmem:[%s9710_s29 + $0x10] sm:$0xff] (!%p7733_p2) }
 0x416   : > { %5783 = vmatpush1.bf16.msra.mxu0 %v8877_v53  ;;  %5947 = vmatpush1.bf16.msra.mxu1 %v8880_v52  ;;  %v6423_v53 = vld [vmem:[%s9710_s29 + $0x208] sm:$0xff] (!%p7733_p2)  ;;  %v6425_v52 = vld [vmem:[%s9710_s29 + $0x218] sm:$0xff] (!%p7733_p2) }
 0x417   : > { %v8932_v25 = vpop.eup %8931  ;;  %5784 = vmatprep.subr.bf16.mxu0 %v8885_v44  ;;  %5948 = vmatprep.subr.bf16.mxu1 %v8888_v35  ;;  %v7780_v44 = vpack.c.bf16 (!%p7733_p2), %v6360_v45, %v6358_v47  ;;  %v7842_v35 = vpack.c.bf16 (!%p7733_p2), %v6425_v52, %v6423_v53  ;;  %v6378_v45 = vld [vmem:[%s9710_s29 + $0xa0] sm:$0xff] (!%p7733_p2)  ;;  %v6380_v53 = vld [vmem:[%s9710_s29 + $0xb0] sm:$0xff] (!%p7733_p2) }
 0x418   : > { %v8934_v18 = vpop.eup %8933  ;;  %v6442_v52 = vld [vmem:[%s9710_s29 + $0x2a0] sm:$0xff] (!%p7733_p2) }
 0x419   : > { %v8936_v21 = vpop.eup %8935 }
 0x41a   : > { %v8938_v36 = vpop.eup %8937  ;;  %v4086_v63 = vcombine.low %v8932_v25, %v8936_v21  ;;  %5785 = vmatpush1.bf16.msra.mxu0 %v8883_v20  ;;  %5949 = vmatpush1.bf16.msra.mxu1 %v8886_v7  ;;  %v6422_v20 = vld [vmem:[%s9710_s29 + $0x200] sm:$0xff] (!%p7733_p2)  ;;  %v6424_v7 = vld [vmem:[%s9710_s29 + $0x210] sm:$0xff] (!%p7733_p2)  ;;  %v6363_v25 = vld [vmem:[%s9710_s29 + $0x28] sm:$0xff] (!%p7733_p2) }
 0x41b   : > { %v4087_v19 = vcombine.low %v8934_v18, %v8938_v36  ;;  %5786 = vmatprep.subr.bf16.mxu0 %v8891_v2  ;;  %5950 = vmatprep.subr.bf16.mxu1 %v8894_v60  ;;  %v7844_v2 = vpack.c.bf16 (!%p7733_p2), %v6424_v7, %v6422_v20  ;;  %v6365_v60 = vld [vmem:[%s9710_s29 + $0x38] sm:$0xff] (!%p7733_p2)  ;;  %v6362_v18 = vld [vmem:[%s9710_s29 + $0x20] sm:$0xff] (!%p7733_p2)  ;;  %v6364_v21 = vld [vmem:[%s9710_s29 + $0x30] sm:$0xff] (!%p7733_p2) }
 0x41c   : > { %v4094_v30 = vrot.slane %v4086_v63, %v11132_v10  ;;  %v7782_v36 = vpack.c.bf16 (!%p7733_p2), %v6365_v60, %v6363_v25  ;;  %v7784_v63 = vpack.c.bf16 (!%p7733_p2), %v6364_v21, %v6362_v18  ;;  %v6383_v20 = vld [vmem:[%s9710_s29 + $0xc8] sm:$0xff] (!%p7733_p2)  ;;  %v6385_v7 = vld [vmem:[%s9710_s29 + $0xd8] sm:$0xff] (!%p7733_p2)  ;;  %v7800_v60 = vpack.c.bf16 (!%p7733_p2), %v6380_v53, %v6378_v45  ;;  %v6400_v45 = vld [vmem:[%s9710_s29 + $0x150] sm:$0xff] (!%p7733_p2) }
 0x41d   : > { %v4101_v26 = vrot.slane %v4087_v19, %v11132_v10  ;;  %v6426_v19 = vld [vmem:[%s9710_s29 + $0x220] sm:$0xff] (!%p7733_p2)  ;;  %v6447_v25 = vld [vmem:[%s9710_s29 + $0x2c8] sm:$0xff] (!%p7733_p2)  ;;  %v7802_v21 = vpack.c.bf16 (!%p7733_p2), %v6385_v7, %v6383_v20  ;;  %v6405_v20 = vld [vmem:[%s9710_s29 + $0x178] sm:$0xff] (!%p7733_p2) }
 0x41e   : > { %5787 = vmatpush1.bf16.msra.mxu0 %v8889_v32  ;;  %5951 = vmatpush1.bf16.msra.mxu1 %v8892_v14  ;;  %v6427_v32 = vld [vmem:[%s9710_s29 + $0x228] sm:$0xff] (!%p7733_p2)  ;;  %v6429_v14 = vld [vmem:[%s9710_s29 + $0x238] sm:$0xff] (!%p7733_p2)  ;;  %v6462_v53 = vld [vmem:[%s9710_s29 + $0x340] sm:$0xff] (!%p7733_p2) }
 0x41f   : > { %5788 = vmatprep.subr.bf16.mxu0 %v8897_v12  ;;  %5952 = vmatprep.subr.bf16.mxu1 %v8900_v15  ;;  %v4102_v11 = vcombine.low %v4094_v30, %v4101_v26  ;;  %v7846_v12 = vpack.c.bf16 (!%p7733_p2), %v6429_v14, %v6427_v32  ;;  %v6428_v15 = vld [vmem:[%s9710_s29 + $0x230] sm:$0xff] (!%p7733_p2)  ;;  %v6367_v30 = vld [vmem:[%s9710_s29 + $0x48] sm:$0xff] (!%p7733_p2)  ;;  %v6369_v26 = vld [vmem:[%s9710_s29 + $0x58] sm:$0xff] (!%p7733_p2) }
 0x420   : > { %v6446_v32 = vld [vmem:[%s9710_s29 + $0x2c0] sm:$0xff] (!%p7733_p2)  ;;  %v6467_v7 = vld [vmem:[%s9710_s29 + $0x368] sm:$0xff] (!%p7733_p2) }
 0x421   : > { %4107 = vst [vmem:[%s4106_s12] sm:$0xff] %v4102_v11  ;;  %v6431_v11 = vld [vmem:[%s9710_s29 + $0x248] sm:$0xff] (!%p7733_p2) }
 0x422   : > { %5789 = vmatpush1.bf16.msra.mxu0 %v8895_v42  ;;  %5953 = vmatpush1.bf16.msra.mxu1 %v8898_v4  ;;  %v7848_v42 = vpack.c.bf16 (!%p7733_p2), %v6428_v15, %v6426_v19  ;;  %v7786_v4 = vpack.c.bf16 (!%p7733_p2), %v6369_v26, %v6367_v30  ;;  %v6448_v19 = vld [vmem:[%s9710_s29 + $0x2d0] sm:$0xff] (!%p7733_p2)  ;;  %v6389_v15 = vld [vmem:[%s9710_s29 + $0xf8] sm:$0xff] (!%p7733_p2)  ;;  %v6451_v30 = vld [vmem:[%s9710_s29 + $0x2e8] sm:$0xff] (!%p7733_p2) }
 0x423   : > { %5790 = vmatprep.subr.bf16.mxu0 %v8903_v41  ;;  %5954 = vmatprep.subr.bf16.mxu1 %v8906_v51  ;;  %v6366_v41 = vld [vmem:[%s9710_s29 + $0x40] sm:$0xff] (!%p7733_p2)  ;;  %v6368_v51 = vld [vmem:[%s9710_s29 + $0x50] sm:$0xff] (!%p7733_p2)  ;;  %v6453_v26 = vld [vmem:[%s9710_s29 + $0x2f8] sm:$0xff] (!%p7733_p2) }
 0x426   : > { %5791 = vmatpush1.bf16.msra.mxu0 %v8901_v55  ;;  %5955 = vmatpush1.bf16.msra.mxu1 %v8904_v28  ;;  %v6433_v55 = vld [vmem:[%s9710_s29 + $0x258] sm:$0xff] (!%p7733_p2)  ;;  %v6430_v28 = vld [vmem:[%s9710_s29 + $0x240] sm:$0xff] (!%p7733_p2) }
 0x427   : > { %5792 = vmatprep.subr.bf16.mxu0 %v8909_v34  ;;  %5956 = vmatprep.subr.bf16.mxu1 %v8912_v50  ;;  %v6432_v34 = vld [vmem:[%s9710_s29 + $0x250] sm:$0xff] (!%p7733_p2)  ;;  %v7788_v50 = vpack.c.bf16 (!%p7733_p2), %v6368_v51, %v6366_v41  ;;  %v6386_v51 = vld [vmem:[%s9710_s29 + $0xe0] sm:$0xff] (!%p7733_p2) }
 0x42a   : > { %5793 = vmatpush1.bf16.msra.mxu0 %v8907_v48  ;;  %5957 = vmatpush1.bf16.msra.mxu1 %v8910_v3  ;;  %v7850_v48 = vpack.c.bf16 (!%p7733_p2), %v6433_v55, %v6431_v11  ;;  %v6371_v3 = vld [vmem:[%s9710_s29 + $0x68] sm:$0xff] (!%p7733_p2)  ;;  %v6388_v11 = vld [vmem:[%s9710_s29 + $0xf0] sm:$0xff] (!%p7733_p2)  ;;  %v6450_v55 = vld [vmem:[%s9710_s29 + $0x2e0] sm:$0xff] (!%p7733_p2) }
 0x42b   : > { %5794 = vmatprep.subr.bf16.mxu0 %v8915_v9  ;;  %5958 = vmatprep.subr.bf16.mxu1 %v8918_v61  ;;  %v6373_v9 = vld [vmem:[%s9710_s29 + $0x78] sm:$0xff] (!%p7733_p2)  ;;  %v6370_v61 = vld [vmem:[%s9710_s29 + $0x60] sm:$0xff] (!%p7733_p2) }
 0x42e   : > { %5795 = vmatpush1.bf16.msra.mxu0 %v8913_v43  ;;  %5959 = vmatpush1.bf16.msra.mxu1 %v8916_v5  ;;  %v7852_v43 = vpack.c.bf16 (!%p7733_p2), %v6432_v34, %v6430_v28  ;;  %v7790_v5 = vpack.c.bf16 (!%p7733_p2), %v6373_v9, %v6371_v3  ;;  %v7870_v28 = vpack.c.bf16 (!%p7733_p2), %v6453_v26, %v6451_v30  ;;  %v6452_v34 = vld [vmem:[%s9710_s29 + $0x2f0] sm:$0xff] (!%p7733_p2)  ;;  %v6455_v3 = vld [vmem:[%s9710_s29 + $0x308] sm:$0xff] (!%p7733_p2)  ;;  %v6457_v9 = vld [vmem:[%s9710_s29 + $0x318] sm:$0xff] (!%p7733_p2) }
 0x42f   : > { %5796 = vmatprep.subr.bf16.mxu0 %v8921_v17  ;;  %5960 = vmatprep.subr.bf16.mxu1 %v8924_v39  ;;  %v6372_v17 = vld [vmem:[%s9710_s29 + $0x70] sm:$0xff] (!%p7733_p2)  ;;  %v6435_v39 = vld [vmem:[%s9710_s29 + $0x268] sm:$0xff] (!%p7733_p2)  ;;  %v6473_v26 = vld [vmem:[%s9710_s29 + $0x398] sm:$0xff] (!%p7733_p2) }
 0x432   : > { %5797 = vmatpush1.bf16.msra.mxu0 %v8919_v13  ;;  %5961 = vmatpush1.bf16.msra.mxu1 %v8922_v59  ;;  %v6437_v13 = vld [vmem:[%s9710_s29 + $0x278] sm:$0xff] (!%p7733_p2) }
 0x433   : > { %5798 = vmatprep.subr.bf16.mxu0 %v8927_v6  ;;  %5962 = vmatprep.subr.bf16.mxu1 %v8930_v54  ;;  %v7854_v59 = vpack.c.bf16 (!%p7733_p2), %v6437_v13, %v6435_v39  ;;  %v6434_v6 = vld [vmem:[%s9710_s29 + $0x260] sm:$0xff] (!%p7733_p2)  ;;  %v6436_v54 = vld [vmem:[%s9710_s29 + $0x270] sm:$0xff] (!%p7733_p2) }
 0x434   : > { %v6392_v39 = vld [vmem:[%s9710_s29 + $0x110] sm:$0xff] (!%p7733_p2)  ;;  %v6454_v13 = vld [vmem:[%s9710_s29 + $0x300] sm:$0xff] (!%p7733_p2) }
 0x436   : > { %5799 = vmatpush1.bf16.msra.mxu0 %v8925_v58  ;;  %5963 = vmatpush1.bf16.msra.mxu1 %v8928_v31  ;;  %v6375_v58 = vld [vmem:[%s9710_s29 + $0x88] sm:$0xff] (!%p7733_p2)  ;;  %v6377_v31 = vld [vmem:[%s9710_s29 + $0x98] sm:$0xff] (!%p7733_p2) }
 0x437   : > { %7843 = vmatprep.subr.bf16.mxu0 (!%p7733_p2), %v7842_v35  ;;  %v6444_v35 = vld [vmem:[%s9710_s29 + $0x2b0] sm:$0xff] (!%p7733_p2) }
 0x438   : > { %v7864_v18 = vpack.c.bf16 (!%p7733_p2), %v6444_v35, %v6442_v52  ;;  %v6403_v35 = vld [vmem:[%s9710_s29 + $0x168] sm:$0xff] (!%p7733_p2) }
 0x439   : > { %5801 = vmatmul.mubr.bf16.vlgmr.msra.gmra.mrb[4].mxu0 %v11407_v22  ;;  %5965 = vmatmul.mubr.bf16.vlgmr.msra.gmra.mrb[4].mxu1 %v11407_v22  ;;  %v6359_v22 = vld [vmem:[%s9710_s29 + $0x8] sm:$0xff] (!%p7733_p2) }
 0x43a   : > { %v7778_v57 = vpack.c.bf16 (!%p7733_p2), %v6361_v38, %v6359_v22  ;;  %7845 = vmatpush1.bf16.msra.mxu0 (!%p7733_p2), %v7844_v2  ;;  %v6445_v22 = vld [vmem:[%s9710_s29 + $0x2b8] sm:$0xff] (!%p7733_p2) }
 0x43b   : > { %7847 = vmatprep.subr.bf16.mxu0 (!%p7733_p2), %v7846_v12  ;;  %v6449_v2 = vld [vmem:[%s9710_s29 + $0x2d8] sm:$0xff] (!%p7733_p2)  ;;  %v6387_v12 = vld [vmem:[%s9710_s29 + $0xe8] sm:$0xff] (!%p7733_p2) }
 0x43c   : > { %7779 = vmatprep.subr.bf16.mxu1 (!%p7733_p2), %v7778_v57  ;;  %v7866_v14 = vpack.c.bf16 (!%p7733_p2), %v6449_v2, %v6447_v25  ;;  %v7806_v41 = vpack.c.bf16 (!%p7733_p2), %v6389_v15, %v6387_v12  ;;  %v6469_v25 = vld [vmem:[%s9710_s29 + $0x378] sm:$0xff] (!%p7733_p2)  ;;  %v6471_v15 = vld [vmem:[%s9710_s29 + $0x388] sm:$0xff] (!%p7733_p2) }
 0x43d   : > { %7781 = vmatpush1.bf16.msra.mxu1 (!%p7733_p2), %v7780_v44  ;;  %v6409_v12 = vld [vmem:[%s9710_s29 + $0x198] sm:$0xff] (!%p7733_p2) }
 0x43e   : > { %7783 = vmatprep.subr.bf16.mxu1 (!%p7733_p2), %v7782_v36  ;;  %7849 = vmatpush1.bf16.msra.mxu0 (!%p7733_p2), %v7848_v42  ;;  %v6382_v36 = vld [vmem:[%s9710_s29 + $0xc0] sm:$0xff] (!%p7733_p2) }
 0x43f   : > { %7851 = vmatprep.subr.bf16.mxu0 (!%p7733_p2), %v7850_v48  ;;  %v6393_v48 = vld [vmem:[%s9710_s29 + $0x118] sm:$0xff] (!%p7733_p2) }
 0x441   : > { %7785 = vmatpush1.bf16.msra.mxu1 (!%p7733_p2), %v7784_v63  ;;  %v6384_v63 = vld [vmem:[%s9710_s29 + $0xd0] sm:$0xff] (!%p7733_p2) }
 0x442   : > { %7787 = vmatprep.subr.bf16.mxu1 (!%p7733_p2), %v7786_v4  ;;  %7853 = vmatpush1.bf16.msra.mxu0 (!%p7733_p2), %v7852_v43  ;;  %v7804_v42 = vpack.c.bf16 (!%p7733_p2), %v6384_v63, %v6382_v36  ;;  %v7868_v4 = vpack.c.bf16 (!%p7733_p2), %v6448_v19, %v6446_v32  ;;  %v7872_v43 = vpack.c.bf16 (!%p7733_p2), %v6452_v34, %v6450_v55  ;;  %v6466_v63 = vld [vmem:[%s9710_s29 + $0x360] sm:$0xff] (!%p7733_p2)  ;;  %v6468_v32 = vld [vmem:[%s9710_s29 + $0x370] sm:$0xff] (!%p7733_p2) }
 0x443   : > { %7855 = vmatprep.subr.bf16.mxu0 (!%p7733_p2), %v7854_v59  ;;  %v7874_v59 = vpack.c.bf16 (!%p7733_p2), %v6457_v9, %v6455_v3  ;;  %v7822_v36 = vpack.c.bf16 (!%p7733_p2), %v6405_v20, %v6403_v35  ;;  %v7886_v19 = vpack.c.bf16 (!%p7733_p2), %v6469_v25, %v6467_v7  ;;  %v6406_v34 = vld [vmem:[%s9710_s29 + $0x180] sm:$0xff] (!%p7733_p2)  ;;  %v6480_v25 = vld [vmem:[%s9710_s29 + $0x3d0] sm:$0xff] (!%p7733_p2) }
 0x445   : > { %7789 = vmatpush1.bf16.msra.mxu1 (!%p7733_p2), %v7788_v50  ;;  %v6391_v50 = vld [vmem:[%s9710_s29 + $0x108] sm:$0xff] (!%p7733_p2) }
 0x446   : > { %7791 = vmatprep.subr.bf16.mxu1 (!%p7733_p2), %v7790_v5  ;;  %v7810_v5 = vpack.c.bf16 (!%p7733_p2), %v6393_v48, %v6391_v50  ;;  %v6408_v50 = vld [vmem:[%s9710_s29 + $0x190] sm:$0xff] (!%p7733_p2)  ;;  %v6470_v48 = vld [vmem:[%s9710_s29 + $0x380] sm:$0xff] (!%p7733_p2) }
 0x50c   : > { %v5802_v33 = vpop.f32.mrb[4].mxu0  ;;  %v5966_v62 = vpop.f32.mrb[4].mxu1 }
 0x50d   : > { %v5804_v0 = vpop.f32.mrb[5].mxu0  ;;  %v5968_v49 = vpop.f32.mrb[5].mxu1 }
 0x50e   : > { %v5977_v40 = vcombine.low %v5802_v33, %v5804_v0  ;;  %v5978_v37 = vcombine.low %v5966_v62, %v5968_v49  ;;  %v5806_v56 = vpop.f32.mrb[6].mxu0  ;;  %v5970_v27 = vpop.f32.mrb[6].mxu1  ;;  %6001 = sbr.rel (%p7733_p2) target bundleno = 1621 (0x655), region = 100  ;;  %v7792_v33 = vpack.c.bf16 (!%p7733_p2), %v6372_v17, %v6370_v61  ;;  %v6439_v62 = vld [vmem:[%s9710_s29 + $0x288] sm:$0xff] (!%p7733_p2)  ;;  %v6441_v0 = vld [vmem:[%s9710_s29 + $0x298] sm:$0xff] (!%p7733_p2)  ;;  %v7856_v49 = vpack.c.bf16 (!%p7733_p2), %v6436_v54, %v6434_v6  ;;  %v6390_v17 = vld [vmem:[%s9710_s29 + $0x100] sm:$0xff] (!%p7733_p2) }
 0x50f   : > { %v5807_v23 = vpop.f32.mrb[7].mxu0  ;;  %v5971_v1 = vpop.f32.mrb[7].mxu1  ;;  %v6376_v56 = vld [vmem:[%s9710_s29 + $0x90] sm:$0xff] (!%p7733_p2)  ;;  %v6438_v27 = vld [vmem:[%s9710_s29 + $0x280] sm:$0xff] (!%p7733_p2)  ;;  %v7808_v61 = vpack.c.bf16 (!%p7733_p2), %v6388_v11, %v6386_v51  ;;  %v6395_v54 = vld [vmem:[%s9710_s29 + $0x128] sm:$0xff] (!%p7733_p2)  ;;  %v7888_v51 = vpack.c.bf16 (!%p7733_p2), %v6468_v32, %v6466_v63 }
 0x510   : > { %v5985_v29 = vrot.slane %v5977_v40, %v11132_v10  ;;  %v5992_v24 = vrot.slane %v5978_v37, %v11132_v10  ;;  %v7794_v40 = vpack.c.bf16 (!%p7733_p2), %v6377_v31, %v6375_v58  ;;  %v6374_v37 = vld [vmem:[%s9710_s29 + $0x80] sm:$0xff] (!%p7733_p2)  ;;  %v7858_v23 = vpack.c.bf16 (!%p7733_p2), %v6441_v0, %v6439_v62  ;;  %v6440_v1 = vld [vmem:[%s9710_s29 + $0x290] sm:$0xff] (!%p7733_p2)  ;;  %7793 = vmatpush1.bf16.msra.mxu1 (!%p7733_p2), %v7792_v33  ;;  %v6397_v58 = vld [vmem:[%s9710_s29 + $0x138] sm:$0xff] (!%p7733_p2) }
 0x511   : > { %v7796_v38 = vpack.c.bf16 (!%p7733_p2), %v6376_v56, %v6374_v37  ;;  %7857 = vmatpush1.bf16.msra.mxu0 (!%p7733_p2), %v7856_v49  ;;  %v7860_v47 = vpack.c.bf16 (!%p7733_p2), %v6440_v1, %v6438_v27  ;;  %v6456_v6 = vld [vmem:[%s9710_s29 + $0x310] sm:$0xff] (!%p7733_p2)  ;;  %v6459_v31 = vld [vmem:[%s9710_s29 + $0x328] sm:$0xff] (!%p7733_p2)  ;;  %v6461_v33 = vld [vmem:[%s9710_s29 + $0x338] sm:$0xff] (!%p7733_p2)  ;;  %v7812_v62 = vpack.c.bf16 (!%p7733_p2), %v6392_v39, %v6390_v17  ;;  %v7814_v49 = vpack.c.bf16 (!%p7733_p2), %v6397_v58, %v6395_v54 }
 0x512   : > { %v5993_v16 = vcombine.low %v5985_v29, %v5992_v24  ;;  %v6379_v29 = vld [vmem:[%s9710_s29 + $0xa8] sm:$0xff] (!%p7733_p2)  ;;  %v6381_v24 = vld [vmem:[%s9710_s29 + $0xb8] sm:$0xff] (!%p7733_p2)  ;;  %7795 = vmatprep.subr.bf16.mxu1 (!%p7733_p2), %v7794_v40  ;;  %7859 = vmatprep.subr.bf16.mxu0 (!%p7733_p2), %v7858_v23  ;;  %v7876_v0 = vpack.c.bf16 (!%p7733_p2), %v6456_v6, %v6454_v13  ;;  %v6394_v40 = vld [vmem:[%s9710_s29 + $0x120] sm:$0xff] (!%p7733_p2)  ;;  %v7878_v27 = vpack.c.bf16 (!%p7733_p2), %v6461_v33, %v6459_v31 }
 0x513   : > { %v7798_v57 = vpack.c.bf16 (!%p7733_p2), %v6381_v24, %v6379_v29  ;;  %v6396_v37 = vld [vmem:[%s9710_s29 + $0x130] sm:$0xff] (!%p7733_p2)  ;;  %v6458_v56 = vld [vmem:[%s9710_s29 + $0x320] sm:$0xff] (!%p7733_p2)  ;;  %v6399_v1 = vld [vmem:[%s9710_s29 + $0x148] sm:$0xff] (!%p7733_p2)  ;;  %v7828_v6 = vpack.c.bf16 (!%p7733_p2), %v6408_v50, %v6406_v34 }
 0x514   : > { %5997 = vst [vmem:[%s5996_s24] sm:$0xff] %v5993_v16  ;;  %v6443_v16 = vld [vmem:[%s9710_s29 + $0x2a8] sm:$0xff] (!%p7733_p2)  ;;  %7797 = vmatpush1.bf16.msra.mxu1 (!%p7733_p2), %v7796_v38  ;;  %v6460_v23 = vld [vmem:[%s9710_s29 + $0x330] sm:$0xff] (!%p7733_p2)  ;;  %v6401_v29 = vld [vmem:[%s9710_s29 + $0x158] sm:$0xff] (!%p7733_p2) }
 0x515   : > { %v7862_v44 = vpack.c.bf16 %v6445_v22, %v6443_v16  ;;  %7861 = vmatpush1.bf16.msra.mxu0 %v7860_v47  ;;  %7799 = vmatprep.subr.bf16.mxu1 %v7798_v57  ;;  %v6463_v24 = vld [vmem:[%s9710_s29 + $0x348] sm:$0xff]  ;;  %v6465_v16 = vld [vmem:[%s9710_s29 + $0x358] sm:$0xff]  ;;  %v7816_v22 = vpack.c.bf16 %v6396_v37, %v6394_v40  ;;  %v7880_v38 = vpack.c.bf16 %v6460_v23, %v6458_v56  ;;  %v6398_v57 = vld [vmem:[%s9710_s29 + $0x140] sm:$0xff] }
 0x516   : > { %v7818_v47 = vpack.c.bf16 %v6401_v29, %v6399_v1  ;;  %v7882_v52 = vpack.c.bf16 %v6465_v16, %v6463_v24  ;;  %v7820_v2 = vpack.c.bf16 %v6400_v45, %v6398_v57  ;;  %v6413_v17 = vld [vmem:[%s9710_s29 + $0x1b8] sm:$0xff]  ;;  %v6475_v39 = vld [vmem:[%s9710_s29 + $0x3a8] sm:$0xff]  ;;  %v6410_v54 = vld [vmem:[%s9710_s29 + $0x1a0] sm:$0xff] }
 0x517   : > { %7863 = vmatprep.subr.bf16.mxu0 %v7862_v44  ;;  %v6464_v44 = vld [vmem:[%s9710_s29 + $0x350] sm:$0xff]  ;;  %v6477_v13 = vld [vmem:[%s9710_s29 + $0x3b8] sm:$0xff]  ;;  %v6415_v37 = vld [vmem:[%s9710_s29 + $0x1c8] sm:$0xff] }
 0x518   : > { %7801 = vmatpush1.bf16.msra.mxu1 %v7800_v60  ;;  %v6402_v60 = vld [vmem:[%s9710_s29 + $0x160] sm:$0xff]  ;;  %v6412_v33 = vld [vmem:[%s9710_s29 + $0x1b0] sm:$0xff]  ;;  %v7894_v40 = vpack.c.bf16 %v6477_v13, %v6475_v39  ;;  %v6417_v56 = vld [vmem:[%s9710_s29 + $0x1d8] sm:$0xff] }
 0x519   : > { %7865 = vmatpush1.bf16.msra.mxu0 %v7864_v18  ;;  %7803 = vmatprep.subr.bf16.mxu1 %v7802_v21  ;;  %v6404_v18 = vld [vmem:[%s9710_s29 + $0x170] sm:$0xff]  ;;  %v7884_v21 = vpack.c.bf16 %v6464_v44, %v6462_v53  ;;  %v6481_v23 = vld [vmem:[%s9710_s29 + $0x3d8] sm:$0xff]  ;;  %v6478_v45 = vld [vmem:[%s9710_s29 + $0x3c0] sm:$0xff] }
 0x51a   : > { %7867 = vmatprep.subr.bf16.mxu0 %v7866_v14  ;;  %v6407_v14 = vld [vmem:[%s9710_s29 + $0x188] sm:$0xff]  ;;  %v6416_v57 = vld [vmem:[%s9710_s29 + $0x1d0] sm:$0xff] }
 0x51b   : > { %v6002_v30 = vld [vmem:[#allocation4] sm:$0xff]  ;;  %v6003_v11 = vld [vmem:[#allocation4 + $0x8] sm:$0xff] }
 0x51c   : > { %7805 = vmatpush1.bf16.msra.mxu1 %v7804_v42  ;;  %v6004_v42 = vld [vmem:[#allocation4 + $0x10] sm:$0xff]  ;;  %v6006_v55 = vld [vmem:[#allocation4 + $0x20] sm:$0xff] }
 0x51d   : > { %7869 = vmatpush1.bf16.msra.mxu0 %v7868_v4  ;;  %7807 = vmatprep.subr.bf16.mxu1 %v7806_v41  ;;  %v6005_v4 = vld [vmem:[#allocation4 + $0x18] sm:$0xff]  ;;  %v7824_v41 = vpack.c.bf16 %v6404_v18, %v6402_v60  ;;  %v6007_v3 = vmax.f32 %v6002_v30, %v6006_v55  ;;  %v6421_v60 = vld [vmem:[%s9710_s29 + $0x1f8] sm:$0xff] }
 0x51e   : > { %7871 = vmatprep.subr.bf16.mxu0 %v7870_v28  ;;  %v7826_v28 = vpack.c.bf16 %v6409_v12, %v6407_v14  ;;  %v6009_v9 = vmax.f32 %v6004_v42, %v6005_v4  ;;  %v7900_v14 = vpack.c.bf16 %v6480_v25, %v6478_v45  ;;  %v6418_v12 = vld [vmem:[%s9710_s29 + $0x1e0] sm:$0xff] }
 0x520   : > { %7809 = vmatpush1.bf16.msra.mxu1 %v7808_v61  ;;  %v7890_v61 = vpack.c.bf16 %v6473_v26, %v6471_v15  ;;  %v6420_v15 = vld [vmem:[%s9710_s29 + $0x1f0] sm:$0xff]  ;;  %v6482_v26 = vld [vmem:[%s9710_s29 + $0x3e0] sm:$0xff] }
 0x521   : > { %7873 = vmatpush1.bf16.msra.mxu0 %v7872_v43  ;;  %7811 = vmatprep.subr.bf16.mxu1 %v7810_v5  ;;  %v6472_v43 = vld [vmem:[%s9710_s29 + $0x390] sm:$0xff]  ;;  %v6411_v5 = vld [vmem:[%s9710_s29 + $0x1a8] sm:$0xff] }
 0x522   : > { %7875 = vmatprep.subr.bf16.mxu0 %v7874_v59  ;;  %v6008_v59 = vmax.f32 %v6007_v3, %v6003_v11  ;;  %v7892_v58 = vpack.c.bf16 %v6472_v43, %v6470_v48  ;;  %v7830_v31 = vpack.c.bf16 %v6413_v17, %v6411_v5 }
 0x524   : > { %7813 = vmatpush1.bf16.msra.mxu1 %v7812_v62  ;;  %v6474_v62 = vld [vmem:[%s9710_s29 + $0x3a0] sm:$0xff] }
 0x525   : > { %7877 = vmatpush1.bf16.msra.mxu0 %v7876_v0  ;;  %7815 = vmatprep.subr.bf16.mxu1 %v7814_v49  ;;  %v6476_v0 = vld [vmem:[%s9710_s29 + $0x3b0] sm:$0xff]  ;;  %v6010_v49 = vmax.f32 %v6008_v59, %v6009_v9 }
 0x526   : > { %7879 = vmatprep.subr.bf16.mxu0 %v7878_v27  ;;  %v6479_v27 = vld [vmem:[%s9710_s29 + $0x3c8] sm:$0xff] }
 0x527   : > { %v6011_v1 = vsub.f32 %v6002_v30, %v6010_v49  ;;  %v6012_v29 = vsub.f32 %v6003_v11, %v6010_v49  ;;  %v6013_v24 = vsub.f32 %v6004_v42, %v6010_v49  ;;  %v6014_v16 = vsub.f32 %v6005_v4, %v6010_v49  ;;  %v6484_v42 = vld [vmem:[%s9710_s29 + $0x3f0] sm:$0xff] }
 0x528   : > { %7817 = vmatpush1.bf16.msra.mxu1 %v7816_v22  ;;  %v7832_v22 = vpack.c.bf16 %v6412_v33, %v6410_v54  ;;  %v6015_v53 = vsub.f32 %v6006_v55, %v6010_v49  ;;  %v7898_v7 = vpack.c.bf16 %v6481_v23, %v6479_v27  ;;  %v7840_v4 = vpack.c.bf16 %v6420_v15, %v6418_v12 }
 0x529   : > { %7881 = vmatpush1.bf16.msra.mxu0 %v7880_v38  ;;  %7819 = vmatprep.subr.bf16.mxu1 %v7818_v47  ;;  %v7896_v38 = vpack.c.bf16 %v6476_v0, %v6474_v62  ;;  %v6414_v47 = vld [vmem:[%s9710_s29 + $0x1c0] sm:$0xff]  ;;  %v6016_v44 = vmul.f32 1.442695, %v6011_v1  ;;  %v6018_v35 = vmul.f32 1.442695, %v6012_v29 }
 0x52a   : > { %7883 = vmatprep.subr.bf16.mxu0 %v7882_v52  ;;  %v7834_v52 = vpack.c.bf16 %v6417_v56, %v6415_v37  ;;  %v6020_v20 = vmul.f32 1.442695, %v6013_v24  ;;  %v6022_v18 = vmul.f32 1.442695, %v6014_v16  ;;  %v6024_v63 = vmul.f32 1.442695, %v6015_v53 }
 0x52b   : > { %8939 = vpow2.f32 %v6016_v44  ;;  %v7836_v32 = vpack.c.bf16 %v6416_v57, %v6414_v47 }
 0x52c   : > { %7821 = vmatpush1.bf16.msra.mxu1 %v7820_v2  ;;  %v6419_v2 = vld [vmem:[%s9710_s29 + $0x1e8] sm:$0xff]  ;;  %8941 = vpow2.f32 %v6018_v35 }
 0x52d   : > { %7885 = vmatpush1.bf16.msra.mxu0 %v7884_v21  ;;  %7823 = vmatprep.subr.bf16.mxu1 %v7822_v36  ;;  %v6483_v21 = vld [vmem:[%s9710_s29 + $0x3e8] sm:$0xff]  ;;  %v6485_v36 = vld [vmem:[%s9710_s29 + $0x3f8] sm:$0xff]  ;;  %8943 = vpow2.f32 %v6020_v20 }
 0x52e   : > { %7887 = vmatprep.subr.bf16.mxu0 %v7886_v19  ;;  %v7838_v19 = vpack.c.bf16 %v6421_v60, %v6419_v2  ;;  %v7902_v30 = vpack.c.bf16 %v6485_v36, %v6483_v21  ;;  %8945 = vpow2.f32 %v6022_v18 }
 0x52f   : > { %8947 = vpow2.f32 %v6024_v63 }
 0x530   : > { %7825 = vmatpush1.bf16.msra.mxu1 %v7824_v41  ;;  %v7904_v41 = vpack.c.bf16 %v6484_v42, %v6482_v26 }
 0x531   : > { %7889 = vmatpush1.bf16.msra.mxu0 %v7888_v51  ;;  %7827 = vmatprep.subr.bf16.mxu1 %v7826_v28 }
 0x532   : > { %7891 = vmatprep.subr.bf16.mxu0 %v7890_v61 }
 0x534   : > { %7829 = vmatpush1.bf16.msra.mxu1 %v7828_v6 }
 0x535   : > { %7893 = vmatpush1.bf16.msra.mxu0 %v7892_v58  ;;  %7831 = vmatprep.subr.bf16.mxu1 %v7830_v31  ;;  %v11820_v51 = vpop.eup %8939 }
 0x536   : > { %7895 = vmatprep.subr.bf16.mxu0 %v7894_v40  ;;  %v11822_v11 = vpop.eup %8941  ;;  %v6031_v55 = vcombine.high %v11820_v51, %v11820_v51  ;;  %v6038_v28 = vrot.slane %v11820_v51, %v11132_v10 }
 0x537   : > { %v11828_v34 = vpop.eup %8943  ;;  %v6048_v50 = vcombine.high %v11822_v11, %v11822_v11  ;;  %v6055_v48 = vrot.slane %v11822_v11, %v11132_v10 }
 0x538   : > { %7833 = vmatpush1.bf16.msra.mxu1 %v7832_v22  ;;  %v11834_v3 = vpop.eup %8945  ;;  %v6045_v9 = vrot.slane %v6031_v55, %v11132_v10  ;;  %v6065_v61 = vcombine.high %v11828_v34, %v11828_v34  ;;  %v6072_v43 = vrot.slane %v11828_v34, %v11132_v10  ;;  %v6046_v59 = vcombine.high %v6038_v28, %v6038_v28 }
 0x539   : > { %7897 = vmatpush1.bf16.msra.mxu0 %v7896_v38  ;;  %7835 = vmatprep.subr.bf16.mxu1 %v7834_v52  ;;  %v11841_v5 = vpop.eup %8947  ;;  %v6062_v17 = vrot.slane %v6048_v50, %v11132_v10  ;;  %v6082_v39 = vcombine.high %v11834_v3, %v11834_v3  ;;  %v6089_v13 = vrot.slane %v11834_v3, %v11132_v10  ;;  %v6137_v37 = vsel %vm6136_vm10, %v6038_v28, 0.0 }
 0x53a   : > { %7899 = vmatprep.subr.bf16.mxu0 %v7898_v7  ;;  %v6063_v6 = vcombine.high %v6055_v48, %v6055_v48  ;;  %v6079_v54 = vrot.slane %v6065_v61, %v11132_v10  ;;  %v6099_v58 = vcombine.high %v11841_v5, %v11841_v5  ;;  %v6047_v31 = vcombine.high %v6045_v9, %v6045_v9 }
 0x53b   : > { %v6080_v33 = vcombine.high %v6072_v43, %v6072_v43  ;;  %v6096_v62 = vrot.slane %v6082_v39, %v11132_v10  ;;  %v6106_v0 = vrot.slane %v11841_v5, %v11132_v10  ;;  %v6064_v49 = vcombine.high %v6062_v17, %v6062_v17 }
 0x53c   : > { %7837 = vmatpush1.bf16.msra.mxu1 %v7836_v32  ;;  %v6113_v40 = vrot.slane %v6099_v58, %v11132_v10  ;;  %v6138_v56 = vsel %vm6136_vm10, %v6055_v48, 0.0  ;;  %v6081_v27 = vcombine.high %v6079_v54, %v6079_v54  ;;  %v6097_v23 = vcombine.high %v6089_v13, %v6089_v13  ;;  %v6203_v58 = vld [vmem:[#allocation3 + $0x10] sm:$0xff] }
 0x53d   : > { %7901 = vmatpush1.bf16.msra.mxu0 %v7900_v14  ;;  %7839 = vmatprep.subr.bf16.mxu1 %v7838_v19  ;;  %v6139_v1 = vadd.f32 %v6138_v56, %v6137_v37  ;;  %v6140_v29 = vsel %vm6136_vm10, %v6072_v43, 0.0  ;;  %v6098_v24 = vcombine.high %v6096_v62, %v6096_v62  ;;  %v6114_v16 = vcombine.high %v6106_v0, %v6106_v0 }
 0x53e   : > { %7903 = vmatprep.subr.bf16.mxu0 %v7902_v30  ;;  %v6142_v22 = vsel %vm6136_vm10, %v6089_v13, 0.0  ;;  %v6146_v38 = vsel %vm6136_vm10, %v6046_v59, 0.0  ;;  %v6115_v47 = vcombine.high %v6113_v40, %v6113_v40  ;;  %v6147_v45 = vsel %vm6136_vm10, %v6063_v6, 0.0  ;;  %v6201_v59 = vld [vmem:[#allocation3] sm:$0xff] }
 0x53f   : > { %v6141_v57 = vadd.f32 %v6140_v29, %v6139_v1  ;;  %v6149_v53 = vsel %vm6136_vm10, %v6080_v33, 0.0  ;;  %v6144_v52 = vsel %vm6136_vm10, %v6106_v0, 0.0  ;;  %v6148_v44 = vadd.f32 %v6147_v45, %v6146_v38 }
 0x540   : > { %7841 = vmatpush1.bf16.msra.mxu1 %v7840_v4  ;;  %v6155_v35 = vsel %vm6136_vm10, %v6045_v9, 0.0  ;;  %v6156_v20 = vsel %vm6136_vm10, %v6062_v17, 0.0  ;;  %v6151_v25 = vsel %vm6136_vm10, %v6097_v23, 0.0  ;;  %v6158_v60 = vsel %vm6136_vm10, %v6079_v54, 0.0  ;;  %v6202_v54 = vld [vmem:[#allocation3 + $0x8] sm:$0xff] }
 0x541   : > { %7905 = vmatpush1.bf16.msra.mxu0 %v7904_v41  ;;  %v6143_v7 = vadd.f32 %v6142_v22, %v6141_v57  ;;  %v6157_v2 = vadd.f32 %v6156_v20, %v6155_v35  ;;  %v6150_v18 = vadd.f32 %v6149_v53, %v6148_v44  ;;  %v6160_v21 = vsel %vm6136_vm10, %v6096_v62, 0.0 }
 0x542   : > { %v6164_v36 = vsel %vm6136_vm10, %v6047_v31, 0.0  ;;  %v6165_v63 = vsel %vm6136_vm10, %v6064_v49, 0.0  ;;  %v6153_v32 = vsel %vm6136_vm10, %v6114_v16, 0.0  ;;  %v6167_v12 = vsel %vm6136_vm10, %v6081_v27, 0.0  ;;  %v6204_v31 = vld [vmem:[#allocation3 + $0x18] sm:$0xff] }
 0x543   : > { %v6159_v14 = vadd.f32 %v6158_v60, %v6157_v2  ;;  %v6166_v19 = vadd.f32 %v6165_v63, %v6164_v36  ;;  %v6145_v15 = vadd.f32 %v6144_v52, %v6143_v7  ;;  %v6152_v30 = vadd.f32 %v6151_v25, %v6150_v18 }
 0x544   : > { %v6162_v26 = vsel %vm6136_vm10, %v6113_v40, 0.0  ;;  %v6169_v42 = vsel %vm6136_vm10, %v6098_v24, 0.0  ;;  %v6171_v28 = vsel %vm6136_vm10, %v6115_v47, 0.0  ;;  %v6205_v40 = vld [vmem:[#allocation3 + $0x20] sm:$0xff] }
 0x545   : > { %v6161_v4 = vadd.f32 %v6160_v21, %v6159_v14  ;;  %v6168_v41 = vadd.f32 %v6167_v12, %v6166_v19  ;;  %v6154_v55 = vadd.f32 %v6153_v32, %v6152_v30 }
 0x547   : > { %v6163_v50 = vadd.f32 %v6162_v26, %v6161_v4  ;;  %v6170_v48 = vadd.f32 %v6169_v42, %v6168_v41  ;;  %v6177_v9 = vcombine.low %v6145_v15, %v6154_v55 }
 0x549   : > { %v6172_v61 = vadd.f32 %v6171_v28, %v6170_v48  ;;  %v6185_v17 = vrot.slane %v6177_v9, %v11132_v10 }
 0x54b   : > { %v6178_v43 = vcombine.low %v6163_v50, %v6172_v61 }
 0x54d   : > { %v6192_v39 = vrot.slane %v6178_v43, %v11132_v10 }
 0x54f   : > { %v6193_v13 = vcombine.low %v6185_v17, %v6192_v39 }
 0x551   : > { %8949 = vrcp.f32 %v6193_v13 }
 0x55b   : > { %v8950_v6 = vpop.eup %8949 }
 0x55c   : > { %v6196_v33 = vmul.f32 %v8950_v6, %v11820_v51  ;;  %v6197_v62 = vmul.f32 %v8950_v6, %v11822_v11  ;;  %v6198_v0 = vmul.f32 %v8950_v6, %v11828_v34  ;;  %v6199_v49 = vmul.f32 %v8950_v6, %v11834_v3 }
 0x55d   : > { %v6200_v37 = vmul.f32 %v8950_v6, %v11841_v5 }
 0x55e   : > { %v6206_v56 = vmul.f32 %v6201_v59, %v6196_v33  ;;  %v6207_v27 = vmul.f32 %v6202_v54, %v6197_v62  ;;  %v6208_v23 = vmul.f32 %v6203_v58, %v6198_v0  ;;  %v6209_v1 = vmul.f32 %v6204_v31, %v6199_v49 }
 0x55f   : > { %v6210_v29 = vmul.f32 %v6205_v40, %v6200_v37 }
 0x560   : > { %v6223_v24 = vrot.slane %v6206_v56, %v11132_v10  ;;  %v6240_v16 = vrot.slane %v6207_v27, %v11132_v10  ;;  %v6257_v51 = vrot.slane %v6208_v23, %v11132_v10  ;;  %v6274_v11 = vrot.slane %v6209_v1, %v11132_v10 }
 0x561   : > { %v6291_v34 = vrot.slane %v6210_v29, %v11132_v10  ;;  %v6216_v22 = vcombine.high %v6206_v56, %v6206_v56  ;;  %v6233_v3 = vcombine.high %v6207_v27, %v6207_v27  ;;  %v6250_v38 = vcombine.high %v6208_v23, %v6208_v23 }
 0x562   : > { %v6231_v47 = vcombine.high %v6223_v24, %v6223_v24  ;;  %v6248_v5 = vcombine.high %v6240_v16, %v6240_v16  ;;  %v6265_v57 = vcombine.high %v6257_v51, %v6257_v51  ;;  %v6282_v45 = vcombine.high %v6274_v11, %v6274_v11 }
 0x563   : > { %v6299_v53 = vcombine.high %v6291_v34, %v6291_v34  ;;  %v6321_v52 = vsel %vm6136_vm10, %v6223_v24, 0.0  ;;  %v6322_v44 = vsel %vm6136_vm10, %v6240_v16, 0.0  ;;  %v6324_v35 = vsel %vm6136_vm10, %v6257_v51, 0.0 }
 0x564   : > { %v6330_v20 = vsel %vm6136_vm10, %v6231_v47, 0.0  ;;  %v6331_v7 = vsel %vm6136_vm10, %v6248_v5, 0.0  ;;  %v6333_v25 = vsel %vm6136_vm10, %v6265_v57, 0.0  ;;  %v6335_v2 = vsel %vm6136_vm10, %v6282_v45, 0.0  ;;  %v6357_v45 = vld [vmem:[#allocation5] sm:$0x3] }
 0x565   : > { %v6332_v60 = vadd.f32 %v6331_v7, %v6330_v20  ;;  %v6337_v18 = vsel %vm6136_vm10, %v6299_v53, 0.0  ;;  %v6323_v21 = vadd.f32 %v6322_v44, %v6321_v52  ;;  %v6326_v36 = vsel %vm6136_vm10, %v6274_v11, 0.0 }
 0x566   : > { %v6328_v63 = vsel %vm6136_vm10, %v6291_v34, 0.0  ;;  %v6230_v32 = vrot.slane %v6216_v22, %v11132_v10  ;;  %v6247_v14 = vrot.slane %v6233_v3, %v11132_v10  ;;  %v6264_v19 = vrot.slane %v6250_v38, %v11132_v10 }
 0x567   : > { %v6334_v12 = vadd.f32 %v6333_v25, %v6332_v60  ;;  %v6325_v15 = vadd.f32 %v6324_v35, %v6323_v21  ;;  %v6267_v30 = vcombine.high %v6209_v1, %v6209_v1  ;;  %v6284_v26 = vcombine.high %v6210_v29, %v6210_v29 }
 0x568   : > { %v6232_v42 = vcombine.high %v6230_v32, %v6230_v32  ;;  %v6249_v4 = vcombine.high %v6247_v14, %v6247_v14  ;;  %v6266_v41 = vcombine.high %v6264_v19, %v6264_v19  ;;  %v6339_v55 = vsel %vm6136_vm10, %v6230_v32, 0.0 }
 0x569   : > { %v6336_v28 = vadd.f32 %v6335_v2, %v6334_v12  ;;  %v6327_v50 = vadd.f32 %v6326_v36, %v6325_v15  ;;  %v6281_v48 = vrot.slane %v6267_v30, %v11132_v10  ;;  %v6298_v9 = vrot.slane %v6284_v26, %v11132_v10 }
 0x56a   : > { %v6348_v61 = vsel %vm6136_vm10, %v6232_v42, 0.0  ;;  %v6349_v43 = vsel %vm6136_vm10, %v6249_v4, 0.0  ;;  %v6351_v17 = vsel %vm6136_vm10, %v6266_v41, 0.0  ;;  %v6340_v39 = vsel %vm6136_vm10, %v6247_v14, 0.0 }
 0x56b   : > { %v6338_v13 = vadd.f32 %v6337_v18, %v6336_v28  ;;  %v6329_v59 = vadd.f32 %v6328_v63, %v6327_v50  ;;  %v6283_v6 = vcombine.high %v6281_v48, %v6281_v48  ;;  %v6300_v54 = vcombine.high %v6298_v9, %v6298_v9 }
 0x56c   : > { %v6350_v58 = vadd.f32 %v6349_v43, %v6348_v61  ;;  %v6341_v31 = vadd.f32 %v6340_v39, %v6339_v55  ;;  %v6342_v33 = vsel %vm6136_vm10, %v6264_v19, 0.0  ;;  %v6344_v10 = vsel %vm6136_vm10, %v6281_v48, 0.0 }
 0x56d   : > { %6550 = vmatprep.mubr.f32.mxu1 %v6338_v13  ;;  %v6353_v62 = vsel %vm6136_vm10, %v6283_v6, 0.0  ;;  %v6355_v40 = vsel %vm6136_vm10, %v6300_v54, 0.0  ;;  %v6346_v37 = vsel %vm6136_vm10, %v6298_v9, 0.0  ;;  %v9295_v16 = vmov 1966171168  }
 0x56e   : > { %6551 = vmatmul.mubr.f32.vlgmr.msra.gmra.mrb[0].mxu1 %v6329_v59  ;;  %v6352_v0 = vadd.f32 %v6351_v17, %v6350_v58  ;;  %v6343_v49 = vadd.f32 %v6342_v33, %v6341_v31  ;;  %v6632_v51 = vunpack.c.l.s4 %v9295_v16 }
 0x570   : > { %v6354_v56 = vadd.f32 %v6353_v62, %v6352_v0  ;;  %v6345_v27 = vadd.f32 %v6344_v10, %v6343_v49  ;;  %v6633_v11 = vunpack.c.0.s8 %v6632_v51 }
 0x572   : > { %v6356_v23 = vadd.f32 %v6355_v40, %v6354_v56  ;;  %v6347_v1 = vadd.f32 %v6346_v37, %v6345_v27  ;;  %v6636_v47 = vsub.s32 %v6633_v11, %v11123_v8 }
 0x574   : > { %6621 = vmatprep.mubr.f32.mxu0 %v6356_v23 }
 0x575   : > { %6622 = vmatmul.mubr.f32.vlgmr.msra.gmra.mrb[0].mxu0 %v6347_v1 }
 0x641   : > { %v6552_v29 = vpop.f32.mrb[0].mxu1 }
 0x642   : > { %v6554_v24 = vpop.f32.mrb[1].mxu1 }
 0x648   : > { %v6623_v34 = vpop.f32.mrb[0].mxu0 }
 0x649   : > { %v6624_v22 = vadd.f32 %v6623_v34, %v6552_v29  ;;  %v6625_v3 = vpop.f32.mrb[1].mxu0 }
 0x64a   : > { %v6626_v38 = vadd.f32 %v6625_v3, %v6554_v24 }
 0x64c   : > { %v6630_v5 = vcombine.low %v6624_v22, %v6626_v38 }
 0x64e   : > { %v6637_v57 = vrot.slane %v6630_v5, %v6636_v47 }
 0x650   : > { %v6644_v53 = vrot.slane %v6637_v57, %v6636_v47 }
 0x652   : > { %v6646_v52 = vadd.f32 %v6644_v53, %v6357_v45 }
 0x654   : > { %6651 = vst.msk [vmem:[#allocation5] sm:$0x3] %vm6649_vm11, %v6646_v52 }
 0x655 PF: > { %s12336_s29 = sld [smem:[#allocation29_spill]] }
 0x65b   : > { %p6652_p6 = scmp.eq.s32.totalorder %s12336_s29, 1 }
 0x65d   : > { %p6653_p1 = pnand %p6652_p6, %p5998_p12 }
 0x65e   : > { %s12338_s11 = sld [smem:[#allocation87_spill]] (!%p6653_p1)  ;;  %v6657_v48 = vld [vmem:[#allocation5] sm:$0x3] (!%p6653_p1)  ;;  %v6658_v9 = vld [vmem:[#allocation15] sm:$0x3] (!%p6653_p1)  ;;  %v6701_v17 = vsub.s32 (!%p6653_p1), 1, %v11123_v8 }
 0x65f   : > { %6656 = sbr.rel (%p6653_p1) target bundleno = 1889 (0x761), region = 104  ;;  %v6659_v43 = vadd.f32 (!%p6653_p1), %v6658_v9, %v6657_v48  ;;  %v6697_v34 = vsub.s32 (!%p6653_p1), 0, %v11123_v8  ;;  %v6693_v47 = vld [vmem:[#allocation16] sm:$0x1] (!%p6653_p1)  ;;  %vm6775_vm12 = vcmask (!%p6653_p1), 73728  }
 0x661   : > { %v6660_v58 = vmax.f32 (!%p6653_p1), %v6659_v43, 0.0 }
 0x663   : > { %v6702_v33 = vrot.slane (!%p6653_p1), %v6660_v58, %v6701_v17  ;;  %v6698_v3 = vrot.slane (!%p6653_p1), %v6660_v58, %v6697_v34 }
 0x664   : > { %v6677_v44 = vld [vmem:[%s12338_s11 + $0x80] sm:$0xff] (!%p6653_p1)  ;;  %v6678_v35 = vld [vmem:[%s12338_s11 + $0x88] sm:$0xff] (!%p6653_p1)  ;;  %v6679_v25 = vld [vmem:[%s12338_s11 + $0x90] sm:$0xff] (!%p6653_p1) }
 0x665   : > { %v6661_v46 = vld [vmem:[%s12338_s11] sm:$0xff] (!%p6653_p1)  ;;  %v7906_v20 = vpack.c.bf16 (!%p6653_p1), %v6678_v35, %v6677_v44  ;;  %v6662_v7 = vld [vmem:[%s12338_s11 + $0x8] sm:$0xff] (!%p6653_p1)  ;;  %v6680_v2 = vld [vmem:[%s12338_s11 + $0x98] sm:$0xff] (!%p6653_p1)  ;;  %6769 = vmatprep.mubr.f32.mxu0 (!%p6653_p1), %v6702_v33 }
 0x666   : > { %v7908_v60 = vpack.c.bf16 %v6662_v7, %v6661_v46  ;;  %v7910_v18 = vpack.c.bf16 %v6680_v2, %v6679_v25  ;;  %v6663_v21 = vld [vmem:[%s12338_s11 + $0x10] sm:$0xff]  ;;  %v6664_v36 = vld [vmem:[%s12338_s11 + $0x18] sm:$0xff]  ;;  %v6681_v63 = vld [vmem:[%s12338_s11 + $0xa0] sm:$0xff] }
 0x667   : > { %7907 = vmatprep.subr.bf16.mxu0 %v7906_v20  ;;  %v6682_v32 = vld [vmem:[%s12338_s11 + $0xa8] sm:$0xff]  ;;  %v7912_v14 = vpack.c.bf16 %v6664_v36, %v6663_v21  ;;  %v6665_v12 = vld [vmem:[%s12338_s11 + $0x20] sm:$0xff]  ;;  %v6683_v30 = vld [vmem:[%s12338_s11 + $0xb0] sm:$0xff] }
 0x668   : > { %7909 = vmatpush3.bf16.msra.mxu0 %v7908_v60  ;;  %v7914_v19 = vpack.c.bf16 %v6682_v32, %v6681_v63  ;;  %v6666_v15 = vld [vmem:[%s12338_s11 + $0x28] sm:$0xff]  ;;  %v6684_v26 = vld [vmem:[%s12338_s11 + $0xb8] sm:$0xff]  ;;  %v6667_v41 = vld [vmem:[%s12338_s11 + $0x30] sm:$0xff] }
 0x669   : > { %7911 = vmatprep.subr.bf16.mxu0 %v7910_v18  ;;  %v7916_v42 = vpack.c.bf16 %v6666_v15, %v6665_v12  ;;  %v7918_v4 = vpack.c.bf16 %v6684_v26, %v6683_v30  ;;  %v6668_v55 = vld [vmem:[%s12338_s11 + $0x38] sm:$0xff]  ;;  %v6685_v28 = vld [vmem:[%s12338_s11 + $0xc0] sm:$0xff]  ;;  %v6686_v50 = vld [vmem:[%s12338_s11 + $0xc8] sm:$0xff] }
 0x66a   : > { %v7920_v61 = vpack.c.bf16 %v6668_v55, %v6667_v41  ;;  %v7922_v39 = vpack.c.bf16 %v6686_v50, %v6685_v28  ;;  %v6669_v13 = vld [vmem:[%s12338_s11 + $0x40] sm:$0xff]  ;;  %v6670_v59 = vld [vmem:[%s12338_s11 + $0x48] sm:$0xff]  ;;  %v6687_v6 = vld [vmem:[%s12338_s11 + $0xd0] sm:$0xff] }
 0x66b   : > { %v6688_v54 = vld [vmem:[%s12338_s11 + $0xd8] sm:$0xff]  ;;  %v7924_v31 = vpack.c.bf16 %v6670_v59, %v6669_v13  ;;  %v6671_v10 = vld [vmem:[%s12338_s11 + $0x50] sm:$0xff]  ;;  %v6689_v49 = vld [vmem:[%s12338_s11 + $0xe0] sm:$0xff] }
 0x66c   : > { %7913 = vmatpush3.bf16.msra.mxu0 %v7912_v14  ;;  %v7926_v62 = vpack.c.bf16 %v6688_v54, %v6687_v6  ;;  %v6672_v0 = vld [vmem:[%s12338_s11 + $0x58] sm:$0xff]  ;;  %v6690_v40 = vld [vmem:[%s12338_s11 + $0xe8] sm:$0xff]  ;;  %v6673_v27 = vld [vmem:[%s12338_s11 + $0x60] sm:$0xff] }
 0x66d   : > { %7915 = vmatprep.subr.bf16.mxu0 %v7914_v19  ;;  %v7928_v37 = vpack.c.bf16 %v6672_v0, %v6671_v10  ;;  %v7930_v56 = vpack.c.bf16 %v6690_v40, %v6689_v49  ;;  %v6674_v23 = vld [vmem:[%s12338_s11 + $0x68] sm:$0xff]  ;;  %v6691_v1 = vld [vmem:[%s12338_s11 + $0xf0] sm:$0xff]  ;;  %v6692_v29 = vld [vmem:[%s12338_s11 + $0xf8] sm:$0xff] }
 0x66e   : > { %v7932_v24 = vpack.c.bf16 %v6674_v23, %v6673_v27  ;;  %v7934_v16 = vpack.c.bf16 %v6692_v29, %v6691_v1  ;;  %v6675_v51 = vld [vmem:[%s12338_s11 + $0x70] sm:$0xff]  ;;  %v6676_v11 = vld [vmem:[%s12338_s11 + $0x78] sm:$0xff] }
 0x66f   : > { %v7936_v22 = vpack.c.bf16 %v6676_v11, %v6675_v51 }
 0x670   : > { %7917 = vmatpush3.bf16.msra.mxu0 %v7916_v42 }
 0x671   : > { %7919 = vmatprep.subr.bf16.mxu0 %v7918_v4 }
 0x674   : > { %7921 = vmatpush3.bf16.msra.mxu0 %v7920_v61 }
 0x675   : > { %7923 = vmatprep.subr.bf16.mxu0 %v7922_v39 }
 0x678   : > { %7925 = vmatpush3.bf16.msra.mxu0 %v7924_v31 }
 0x679   : > { %7927 = vmatprep.subr.bf16.mxu0 %v7926_v62 }
 0x67c   : > { %7929 = vmatpush3.bf16.msra.mxu0 %v7928_v37 }
 0x67d   : > { %7931 = vmatprep.subr.bf16.mxu0 %v7930_v56 }
 0x680   : > { %7933 = vmatpush3.bf16.msra.mxu0 %v7932_v24 }
 0x681   : > { %7935 = vmatprep.subr.bf16.mxu0 %v7934_v16 }
 0x684   : > { %7937 = vmatpush3.bf16.msra.mxu0 %v7936_v22 }
 0x687   : > { %6770 = vmatmul.mubr.f32.vlgmr.msra.gmra.mrb[0].mxu0 %v6698_v3 }
 0x75a   : > { %v7775_v38 = vpop.f32.mrb[0].mxu0 }
 0x75b   : > { %v7776_v5 = vpop.f32.mrb[1].mxu0 }
 0x75c   : > { %v7777_v57 = vadd.f32 %v7776_v5, %v7775_v38 }
 0x75e   : > { %v6772_v45 = vadd.f32 %v7777_v57, %v6693_v47 }
 0x760   : > { %6776 = vst.msk [vmem:[#allocation18] sm:$0x1] %vm6775_vm12, %v6772_v45 }
 0x761 PF: > { %p8050_p10 = scmp.eq.s32.totalorder %s9413_s30, 9  ;;  %s9296_s3 = smov [#allocation18]  }
 0x762   : > { %s6784_s13 = sshll.u32 %s9296_s3, 4  ;;  %s6785_s13 = int_to_ptr.vmem [resolvable:$true] %s6784_s13 }
 0x763   : > { %s9136_s14 = scalar_lea.vmem %s6785_s13, 16  ;;  %s9142_s17 = scalar_lea.vmem %s6785_s13, 32 }
 0x764   : > { %p9137_p11 = scmp.ne.s32.totalorder %s6785_s13, %s9136_s14  ;;  %p9143_p13 = scmp.lt.s32.totalorder %s6785_s13, %s6785_s13 }
 0x765   : > { %p9144_p8 = scmp.lt.s32.totalorder %s9142_s17, %s9136_s14 }
 0x766   : > { %p9138_p4 = pnand %p9137_p11, %p8050_p10 }
 0x767   : > { %p9145_p7 = por %p9144_p8, %p9143_p13 }
 0x768   : > { %p9139_p5 = pneg %p9138_p4 }
 0x76a   : > { %p9146_p3 = pnand %p9145_p7, %p9139_p5 }
 0x76c   : > { %9149 = shalt.err (!%p9146_p3)
}
 0x76d   : > { %s12339_s21 = sld [smem:[#allocation88_spill]] }
 0x773   : > { %s12340_s5 = smov %s12339_s21  ;;  %s9150_s20 = scalar_lea.hbm %s12339_s21, 16 }
 0x774   : > { %p9151_p9 = scmp.ne.s32.totalorder %s12340_s5, %s9150_s20  ;;  %p9156_p2 = scmp.lt.u32.totalorder %s9150_s20, %s12340_s5 }
 0x776   : > { %p9152_p0 = pnand %p9151_p9, %p8050_p10 }
 0x778   : > { %p9153_p12 = pneg %p9152_p0 }
 0x77a   : > { %p9158_p6 = pnand %p9156_p2, %p9153_p12 }
 0x77c   : > { %9161 = shalt.err (!%p9158_p6)
}
 0x77d   : > { %8013 = dma.vmem_to_hbm [thread:$0]  (%p8050_p10), %s6785_s13, 16, %s12340_s5, [#allocation8]  }
 0x77e   : > { %9235 = dma.done.wait (%p8050_p10), [#allocation8], 16  }
 0x77f   : > { %9237 = vsyncadd (%p8050_p10), [#allocation8], 4294967280 }
 0x780 PF: > { %s26_s27 = sadd.s32 1, %s9280_s27   ;;  %s12341_s20 = sld [smem:[#allocation27_spill]] }
 0x781   : > { %p23_p1 = scmp.ge.s32.totalorder %s26_s27, 12   ;;  %s12342_s2 = sld [smem:[#allocation31_spill]] }
 0x782   : > { %s12343_s7 = sld [smem:[#allocation32_spill]]  ;;  %s12344_s17 = smov %s9244_s18 }
 0x783   : > { %s12345_s18 = smov %s9248_s19  ;;  %s12346_s19 = smov %s9631_s15 }
 0x784   : > { %s12347_s21 = smov %s9260_s22  ;;  %s12348_s22 = smov %s9517_s4 }
 0x785   : > { %s12349_s23 = smov %s9272_s25  ;;  %s12350_s24 = smov %s9276_s26 }
 0x786   :  { %25 = sbr.rel (!%p23_p1) target bundleno = 19 (0x13), region = 152 }
 0x787   : > { %s12351_s25 = smov %s12342_s2 }
 0x788   : > { %s12352_s26 = smov %s12343_s7 }
 0x78d   :  { %6797 = vsyncpa [#allocation7], 1 }
 0x78e   :  { %6799 = vsyncpa [#allocation7 + $0x1], 1 }
 0x78f   :  { %6800 = vsyncpa [#allocation12], 1 }
 0x790   :  { %6801 = vsyncpa [#allocation17], 1 }
 0x791   :  { %6802 = vsyncpa [#allocation8], 1 }
 0x792   :  { %6804 = vsyncpa [#allocation8 + $0x1], 1 }
 0x793   :  { %6805 = vsyncpa [#allocation9], 1 }
 0x794   :  { %6807 = vsyncpa [#allocation9 + $0x1], 1 }

</bundles_post_ra>
